<compile_context>
chip_gen: v7x
topology: tpu7x:2x2x1
jax: 0.10.0
libtpu: 0.0.40
codegen_flags: <defaults>
</compile_context>

<pallas_src>
import functools

import jax
import jax.numpy as jnp
from jax.experimental import pallas as pl
from jax.experimental.pallas import tpu as pltpu


def _round_up(x, m):
    return ((x + m - 1) // m) * m


def _vmem_limit_bytes():
    """Generation-aware scoped-VMEM limit (~48 MiB on v7x, ~96 MiB on v5e/v6e)."""
    mib = 1024 * 1024
    try:
        phys = int(pltpu.get_tpu_info().vmem_capacity_bytes)
        return int(min(max(phys * 3 // 4, 32 * mib), 96 * mib))
    except Exception:
        return 32 * mib  # conservative, known-good fallback


def _make_kernel(H, W, Cin, Cout, Cip, Cop, K, Kh, P, Ph, is_causal, HV, HH, HI):
    HW = H * W
    bf16 = jnp.bfloat16
    f32 = jnp.float32

    def kernel(v_ref, h_ref, wa_ref, ba_ref, wb_ref, bb_ref, w1_ref,
               wc_ref, bc_ref, wd_ref, bd_ref, out_ref,
               xvp_ref, xhp_ref, intp_ref):
        # w-coordinate of every flattened pixel (for horizontal edge masks);
        # computed once and reused by every tap.
        wcol = jax.lax.broadcasted_iota(jnp.int32, (HW, 1), 0) % W

        # ---- stage inputs into row-halo'd, channel-padded VMEM scratch ------
        xvp_ref[HV:HV + HW, :Cin] = v_ref[0]
        xhp_ref[HH:HH + HW, :Cin] = h_ref[0]
        if Cip > Cin:
            # Pad lanes are read by the matmuls, so they are (re)written every
            # step: safe under megacore sharding (no stale-VMEM NaNs).
            zpad = jnp.zeros((HW, Cip - Cin), bf16)
            xvp_ref[HV:HV + HW, Cin:] = zpad
            xhp_ref[HH:HH + HW, Cin:] = zpad

        def hshift(ref, top, d):
            """View of the staged image shifted by d pixels along width.

            Out-of-image pixels are zeroed by the edge mask; the halo rows the
            shifted view touches are exactly those masked pixels, so the halo
            contents are never observed and need no initialization.
            """
            view = ref[top - d:top - d + HW, :]
            if d == 0:
                return view
            mask = (wcol >= d) if d > 0 else (wcol < W + d)
            return jnp.where(mask, view, jnp.zeros_like(view))

        # ---- stage A: vstack 1xK conv = K shifted-view matmuls --------------
        acc_a = None
        for k in range(K):
            t = jnp.dot(hshift(xvp_ref, HV, P - k), wa_ref[k],
                        preferred_element_type=f32)
            acc_a = t if acc_a is None else acc_a + t
        inter = acc_a + ba_ref[...]                       # (HW, Cop) f32
        intp_ref[0:HI, :] = jnp.zeros((HI, Cop), bf16)    # zero top halo (cheap)
        intp_ref[HI:HI + HW, :] = inter.astype(bf16)

        # ---- stage B: vstack Nx1 conv + fused link, then vstack 1x1 gate ----
        # Per-tap weight columns: [v_tanh | v_sigmoid | link_tanh | link_sigmoid]
        acc_b = None
        for kh in range(Kh):
            s = (P + 1 - kh) * W
            t = jnp.dot(intp_ref[HI - s:HI - s + HW, :], wb_ref[kh],
                        preferred_element_type=f32)
            acc_b = t if acc_b is None else acc_b + t
        acc_b = acc_b + bb_ref[...]                       # (HW, 4*Cop) f32
        xv = xvp_ref[HV:HV + HW, :]
        gate_v = acc_b[:, :2 * Cop] + jnp.dot(xv, w1_ref[...],
                                              preferred_element_type=f32)
        vstack = (jnp.tanh(gate_v[:, :Cop].astype(bf16))
                  * jax.nn.sigmoid(gate_v[:, Cop:].astype(bf16)))
        link_t = acc_b[:, 2 * Cop:3 * Cop]
        link_s = acc_b[:, 3 * Cop:]

        # ---- stage C: hstack 1x(K//2+1) conv = Kh shifted-view matmuls ------
        acc_c = None
        for kw in range(Kh):
            t = jnp.dot(hshift(xhp_ref, HH, Ph - kw), wc_ref[kw],
                        preferred_element_type=f32)
            acc_c = t if acc_c is None else acc_c + t
        acc_c = acc_c + bc_ref[...]                       # (HW, 2*Cop) f32
        h_t = (acc_c[:, :Cop] + link_t).astype(bf16)
        h_s = (acc_c[:, Cop:] + link_s).astype(bf16)
        h_g = jnp.tanh(h_t) * jax.nn.sigmoid(h_s)         # (HW, Cop) bf16

        # ---- stage D: residual + skip 1x1 convs, fused -----------------------
        pre_d = jnp.dot(h_g, wd_ref[...],
                        preferred_element_type=f32) + bd_ref[...]
        hstack = pre_d[:, :Cout]
        skip = pre_d[:, Cop:Cop + Cout]
        if not is_causal:
            hstack = hstack + h_ref[0].astype(f32)

        # Packed output: one contiguous writeback per image.
        out_ref[0, 0] = vstack[:, :Cout].astype(f32)
        out_ref[0, 1] = hstack
        out_ref[0, 2] = skip

    return kernel


def _prep_weights(p, Cin, Cout, Cip, Cop, K, Kh):
    """Pad / regroup / fuse PyTorch-layout params into kernel matmul weights."""
    f32 = jnp.float32
    bf16 = jnp.bfloat16

    # Stage A: vstack 1xK, per tap.  (K, Cip, Cop)
    wa = jnp.zeros((K, Cip, Cop), f32)
    for k in range(K):
        wa = wa.at[k, :Cin, :Cout].set(p["w_v1xn"][k])
    ba = jnp.zeros((1, Cop), f32).at[:, :Cout].set(p["b_v1xn"])

    # Stage B: vstack Nx1 with the link 1x1 fused per tap.  (Kh, Cop, 4*Cop)
    wb = jnp.zeros((Kh, Cop, 4 * Cop), f32)
    for kh in range(Kh):
        wv = p["w_vnx1"][kh]                    # (Cout, 2*Cout)
        wl = wv @ p["w_link"]                   # (Cout, 2*Cout) fused link tap
        wb = wb.at[kh, :Cout, 0:Cout].set(wv[:, :Cout])
        wb = wb.at[kh, :Cout, Cop:Cop + Cout].set(wv[:, Cout:])
        wb = wb.at[kh, :Cout, 2 * Cop:2 * Cop + Cout].set(wl[:, :Cout])
        wb = wb.at[kh, :Cout, 3 * Cop:3 * Cop + Cout].set(wl[:, Cout:])
    b_gate = p["b_vnx1"] + p["b_v1x1"]                       # (1, 2*Cout)
    b_link = p["b_vnx1"] @ p["w_link"] + p["b_link"]         # (1, 2*Cout)
    bb = jnp.zeros((1, 4 * Cop), f32)
    bb = bb.at[:, 0:Cout].set(b_gate[:, :Cout])
    bb = bb.at[:, Cop:Cop + Cout].set(b_gate[:, Cout:])
    bb = bb.at[:, 2 * Cop:2 * Cop + Cout].set(b_link[:, :Cout])
    bb = bb.at[:, 3 * Cop:3 * Cop + Cout].set(b_link[:, Cout:])

    # vstack 1x1 (gates only, no link contribution).  (Cip, 2*Cop)
    w1 = jnp.zeros((Cip, 2 * Cop), f32)
    w1 = w1.at[:Cin, 0:Cout].set(p["w_v1x1"][:, :Cout])
    w1 = w1.at[:Cin, Cop:Cop + Cout].set(p["w_v1x1"][:, Cout:])

    # Stage C: hstack 1x(K//2+1), per tap.  (Kh, Cip, 2*Cop)
    wc = jnp.zeros((Kh, Cip, 2 * Cop), f32)
    for kw in range(Kh):
        wh = p["w_h1xn"][kw]                    # (Cin, 2*Cout)
        wc = wc.at[kw, :Cin, 0:Cout].set(wh[:, :Cout])
        wc = wc.at[kw, :Cin, Cop:Cop + Cout].set(wh[:, Cout:])
    bc = jnp.zeros((1, 2 * Cop), f32)
    bc = bc.at[:, 0:Cout].set(p["b_h1xn"][:, :Cout])
    bc = bc.at[:, Cop:Cop + Cout].set(p["b_h1xn"][:, Cout:])

    # Stage D: residual + skip 1x1, fused.  (Cop, 2*Cop)
    wd = jnp.zeros((Cop, 2 * Cop), f32)
    wd = wd.at[:Cout, 0:Cout].set(p["w_hres"])
    wd = wd.at[:Cout, Cop:Cop + Cout].set(p["w_hskip"])
    bd = jnp.zeros((1, 2 * Cop), f32)
    bd = bd.at[:, 0:Cout].set(p["b_hres"])
    bd = bd.at[:, Cop:Cop + Cout].set(p["b_hskip"])

    return (wa.astype(bf16), ba, wb.astype(bf16), bb, w1.astype(bf16),
            wc.astype(bf16), bc, wd.astype(bf16), bd)


def make_params(key, in_channels, out_channels, kernel_size):
    """Deterministic synthetic parameters (shapes follow the PyTorch __init__)."""
    k = kernel_size
    kh = k // 2 + 1  # height of vstack_Nx1 / width of hstack_1xN
    shapes = [
        ("w_v1xn", (k, in_channels, out_channels)),
        ("b_v1xn", (1, out_channels)),
        ("w_vnx1", (kh, out_channels, 2 * out_channels)),
        ("b_vnx1", (1, 2 * out_channels)),
        ("w_v1x1", (in_channels, 2 * out_channels)),
        ("b_v1x1", (1, 2 * out_channels)),
        ("w_link", (2 * out_channels, 2 * out_channels)),
        ("b_link", (1, 2 * out_channels)),
        ("w_h1xn", (kh, in_channels, 2 * out_channels)),
        ("b_h1xn", (1, 2 * out_channels)),
        ("w_hres", (out_channels, out_channels)),
        ("b_hres", (1, out_channels)),
        ("w_hskip", (out_channels, out_channels)),
        ("b_hskip", (1, out_channels)),
    ]
    keys = jax.random.split(key, len(shapes))
    return {
        name: 0.1 * jax.random.normal(kk, shape, jnp.float32)
        for kk, (name, shape) in zip(keys, shapes)
    }


@functools.partial(jax.jit, static_argnames=("kernel_size", "is_causal"))
def gated_pixelcnn_layer(vstack_nchw, hstack_nchw, params, kernel_size=3,
                         is_causal=False):
    """Returns (vstack, hstack, skip), each NCHW, matching the PyTorch forward."""
    K = kernel_size
    assert K % 2 == 1, "kernel_size cannot be even"
    P = (K - 1) // 2
    Kh = K // 2 + 1
    Ph = P + int(is_causal)

    B, Cin, H, W = vstack_nchw.shape
    Cout = params["w_v1xn"].shape[2]
    if not is_causal:
        assert Cin == Cout, "non-causal residual needs in_channels == out_channels"
    HW = H * W
    LANE = 128
    Cip = _round_up(Cin, LANE)
    Cop = _round_up(Cout, LANE)
    bf16 = jnp.bfloat16

    # Row-halo sizes (top halos rounded to a sublane multiple so the per-step
    # data stores stay 8-row aligned).
    HV = _round_up(P, 8)            # vstack-input scratch top halo (+P bottom)
    HH = _round_up(Ph, 8)           # hstack-input scratch top halo
    HI = _round_up((P + 1) * W, 8)  # inter (vertical conv) scratch top halo

    # NCHW -> flattened NHWC (B, H*W, C), bf16 to halve layout-churn traffic.
    v2d = jnp.transpose(vstack_nchw, (0, 2, 3, 1)).reshape(B, HW, Cin).astype(bf16)
    h2d = jnp.transpose(hstack_nchw, (0, 2, 3, 1)).reshape(B, HW, Cin).astype(bf16)

    p32 = {k: v.astype(jnp.float32) for k, v in params.items()}
    wa, ba, wb, bb, w1, wc, bc, wd, bd = _prep_weights(
        p32, Cin, Cout, Cip, Cop, K, Kh)

    kernel = _make_kernel(H, W, Cin, Cout, Cip, Cop, K, Kh, P, Ph, is_causal,
                          HV, HH, HI)

    def full_spec(a):
        nd = a.ndim
        return pl.BlockSpec(a.shape, lambda b, nd=nd: (0,) * nd)

    in_specs = ([pl.BlockSpec((1, HW, Cin), lambda b: (b, 0, 0)),
                 pl.BlockSpec((1, HW, Cin), lambda b: (b, 0, 0))]
                + [full_spec(a) for a in (wa, ba, wb, bb, w1, wc, bc, wd, bd)])
    out_specs = pl.BlockSpec((1, 3, HW, Cout), lambda b: (b, 0, 0, 0))
    out_shape = jax.ShapeDtypeStruct((B, 3, HW, Cout), jnp.float32)

    scratch_shapes = [
        pltpu.VMEM((HV + HW + P, Cip), bf16),   # halo'd vstack input
        pltpu.VMEM((HH + HW, Cip), bf16),       # halo'd hstack input
        pltpu.VMEM((HI + HW, Cop), bf16),       # halo'd inter (1xK output)
    ]

    flops = 2 * B * HW * (K * Cip * Cop
                          + Kh * Cop * 4 * Cop
                          + Cip * 2 * Cop
                          + Kh * Cip * 2 * Cop
                          + Cop * 2 * Cop)
    transcendentals = 4 * B * HW * Cop          # tanh+sigmoid for the two gates
    bytes_accessed = (2 * B * HW * Cin * 2 + B * HW * 3 * Cout * 4
                      + sum(int(a.size) * a.dtype.itemsize
                            for a in (wa, ba, wb, bb, w1, wc, bc, wd, bd)))

    packed = pl.pallas_call(
        kernel,
        grid=(B,),
        in_specs=in_specs,
        out_specs=out_specs,
        out_shape=out_shape,
        scratch_shapes=scratch_shapes,
        compiler_params=pltpu.CompilerParams(
            dimension_semantics=("parallel",),
            vmem_limit_bytes=_vmem_limit_bytes()),
        cost_estimate=pl.CostEstimate(flops=flops,
                                      transcendentals=transcendentals,
                                      bytes_accessed=bytes_accessed),
    )(v2d, h2d, wa, ba, wb, bb, w1, wc, bc, wd, bd)

    def to_nchw(x):
        return jnp.transpose(x.reshape(B, H, W, Cout), (0, 3, 1, 2))

    return (to_nchw(packed[:, 0]), to_nchw(packed[:, 1]), to_nchw(packed[:, 2]))


# ---------------- pure-JAX reference (for correctness check only) ------------


def _conv_nhwc(x, w_hwio, b, pad_h, pad_w):
    y = jax.lax.conv_general_dilated(
        x, w_hwio, window_strides=(1, 1),
        padding=((pad_h, pad_h), (pad_w, pad_w)),
        dimension_numbers=("NHWC", "HWIO", "NHWC"))
    return y + b.reshape(1, 1, 1, -1)


def _gated(x):
    c = x.shape[-1] // 2
    return jnp.tanh(x[..., :c]) * jax.nn.sigmoid(x[..., c:])


def gated_pixelcnn_layer_reference(vstack_nchw, hstack_nchw, params,
                                   kernel_size=3, is_causal=False):
    K = kernel_size
    P = (K - 1) // 2
    v = jnp.transpose(vstack_nchw, (0, 2, 3, 1)).astype(jnp.float32)
    h = jnp.transpose(hstack_nchw, (0, 2, 3, 1)).astype(jnp.float32)
    _, H, W, _ = v.shape
    p = params

    inter = _conv_nhwc(v, p["w_v1xn"][None], p["b_v1xn"], 0, P)
    vstack = _conv_nhwc(inter, p["w_vnx1"][:, None], p["b_vnx1"], P + 1, 0)[:, :H]
    link = _conv_nhwc(vstack, p["w_link"][None, None], p["b_link"], 0, 0)
    vstack = vstack + _conv_nhwc(v, p["w_v1x1"][None, None], p["b_v1x1"], 0, 0)
    vstack = _gated(vstack)
    hstack = link + _conv_nhwc(h, p["w_h1xn"][None], p["b_h1xn"], 0,
                               P + int(is_causal))[:, :, :W]
    hstack = _gated(hstack)
    skip = _conv_nhwc(hstack, p["w_hskip"][None, None], p["b_hskip"], 0, 0)
    hstack = _conv_nhwc(hstack, p["w_hres"][None, None], p["b_hres"], 0, 0)
    if not is_causal:
        hstack = hstack + h
    to_nchw = lambda x: jnp.transpose(x, (0, 3, 1, 2))
    return to_nchw(vstack), to_nchw(hstack), to_nchw(skip)


if __name__ == "__main__":
    # in_channels == out_channels so the non-causal residual add is well-defined.
    B, C, Hdim, Wdim, K = 2, 8, 16, 16, 3
    key = jax.random.PRNGKey(0)
    k_v, k_h, k_p = jax.random.split(key, 3)
    vstack_input = jax.random.normal(k_v, (B, C, Hdim, Wdim), jnp.float32)
    hstack_input = jax.random.normal(k_h, (B, C, Hdim, Wdim), jnp.float32)
    params = make_params(k_p, C, C, K)

    for causal in (False, True):
        outs = gated_pixelcnn_layer(vstack_input, hstack_input, params,
                                    kernel_size=K, is_causal=causal)
        outs = jax.block_until_ready(outs)
        refs = gated_pixelcnn_layer_reference(vstack_input, hstack_input, params,
                                              kernel_size=K, is_causal=causal)
        for o, r in zip(outs, refs):
            assert o.shape == r.shape, (o.shape, r.shape)
            err = float(jnp.max(jnp.abs(o - r)))
            # bf16 matmuls / gating (f32 accumulation) -> loosened tolerance.
            assert jnp.allclose(o, r, atol=5e-2, rtol=5e-2), (causal, err)

    print("KERNEL_OK")
</pallas_src>

<mosaic_0001>
module attributes {stable_mosaic.version = 11 : i64} {
  func.func @kernel(%arg0: i32, %arg1: memref<1x256x8xbf16, #tpu.memory_space<vmem>>, %arg2: memref<1x256x8xbf16, #tpu.memory_space<vmem>>, %arg3: memref<3x128x128xbf16, #tpu.memory_space<vmem>>, %arg4: memref<1x128xf32, #tpu.memory_space<vmem>>, %arg5: memref<2x128x512xbf16, #tpu.memory_space<vmem>>, %arg6: memref<1x512xf32, #tpu.memory_space<vmem>>, %arg7: memref<128x256xbf16, #tpu.memory_space<vmem>>, %arg8: memref<2x128x256xbf16, #tpu.memory_space<vmem>>, %arg9: memref<1x256xf32, #tpu.memory_space<vmem>>, %arg10: memref<128x256xbf16, #tpu.memory_space<vmem>>, %arg11: memref<1x256xf32, #tpu.memory_space<vmem>>, %arg12: memref<1x3x256x8xf32, #tpu.memory_space<vmem>>, %arg13: memref<265x128xbf16, #tpu.memory_space<vmem>>, %arg14: memref<264x128xbf16, #tpu.memory_space<vmem>>, %arg15: memref<288x128xbf16, #tpu.memory_space<vmem>>) attributes {dimension_semantics = [#tpu.dimension_semantics<parallel>], iteration_bounds = array<i64: 2>, scalar_prefetch = 0 : i64, scratch_operands = 3 : i64, tpu.core_type = #tpu.core_type<tc>, window_params = [{transform_indices = @transform_0, window_bounds = array<i64: 1, 256, 8>}, {transform_indices = @transform_1, window_bounds = array<i64: 1, 256, 8>}, {pipeline_mode = #tpu.pipeline_mode<synchronous>, transform_indices = @transform_2, window_bounds = array<i64: 3, 128, 128>}, {pipeline_mode = #tpu.pipeline_mode<synchronous>, transform_indices = @transform_3, window_bounds = array<i64: 1, 128>}, {pipeline_mode = #tpu.pipeline_mode<synchronous>, transform_indices = @transform_4, window_bounds = array<i64: 2, 128, 512>}, {pipeline_mode = #tpu.pipeline_mode<synchronous>, transform_indices = @transform_5, window_bounds = array<i64: 1, 512>}, {pipeline_mode = #tpu.pipeline_mode<synchronous>, transform_indices = @transform_6, window_bounds = array<i64: 128, 256>}, {pipeline_mode = #tpu.pipeline_mode<synchronous>, transform_indices = @transform_7, window_bounds = array<i64: 2, 128, 256>}, {pipeline_mode = #tpu.pipeline_mode<synchronous>, transform_indices = @transform_8, window_bounds = array<i64: 1, 256>}, {pipeline_mode = #tpu.pipeline_mode<synchronous>, transform_indices = @transform_9, window_bounds = array<i64: 128, 256>}, {pipeline_mode = #tpu.pipeline_mode<synchronous>, transform_indices = @transform_10, window_bounds = array<i64: 1, 256>}, {transform_indices = @transform_11, window_bounds = array<i64: 1, 3, 256, 8>}]} {
    %0 = tpu.iota {dimensions = array<i32: 0>} : vector<256x1xi32>
    %c16_i32 = arith.constant 16 : i32
    %c0_i32 = arith.constant 0 : i32
    %1 = arith.cmpi eq, %c16_i32, %c0_i32 : i32
    %c1_i32 = arith.constant 1 : i32
    %2 = arith.select %1, %c1_i32, %c16_i32 : i32
    %3 = vector.broadcast %2 : i32 to vector<256x1xi32>
    %4 = arith.remsi %0, %3 : vector<256x1xi32>
    %c0_i32_0 = arith.constant 0 : i32
    %5 = vector.broadcast %c0_i32_0 : i32 to vector<256x1xi32>
    %6 = arith.cmpi ne, %4, %5 : vector<256x1xi32>
    %c0_i32_1 = arith.constant 0 : i32
    %7 = vector.broadcast %c0_i32_1 : i32 to vector<256x1xi32>
    %8 = arith.cmpi slt, %4, %7 : vector<256x1xi32>
    %c0_i32_2 = arith.constant 0 : i32
    %9 = arith.cmpi slt, %2, %c0_i32_2 : i32
    %10 = vector.broadcast %9 : i1 to vector<256x1xi1>
    %11 = vector.broadcast %10 : vector<256x1xi1> to vector<256x1xi1>
    %12 = arith.xori %8, %11 : vector<256x1xi1>
    %13 = arith.andi %12, %6 : vector<256x1xi1>
    %14 = vector.broadcast %2 : i32 to vector<256x1xi32>
    %15 = arith.addi %4, %14 : vector<256x1xi32>
    %16 = arith.select %13, %15, %4 : vector<256x1xi1>, vector<256x1xi32>
    %c0 = arith.constant 0 : index
    %c0_3 = arith.constant 0 : index
    %c0_4 = arith.constant 0 : index
    %17 = vector.load %arg1[%c0, %c0_3, %c0_4] : memref<1x256x8xbf16, #tpu.memory_space<vmem>>, vector<1x256x8xbf16>
    %18 = vector.shape_cast %17 : vector<1x256x8xbf16> to vector<256x8xbf16>
    %c8 = arith.constant 8 : index
    %c0_5 = arith.constant 0 : index
    %19 = vector.load %arg13[%c8, %c0_5] : memref<265x128xbf16, #tpu.memory_space<vmem>>, vector<256x8xbf16>
    tpu.vector_store %arg13[%c8, %c0_5], %18 {strides = array<i32>} : memref<265x128xbf16, #tpu.memory_space<vmem>>, vector<256x8xbf16>,
    %c0_6 = arith.constant 0 : index
    %c0_7 = arith.constant 0 : index
    %c0_8 = arith.constant 0 : index
    %20 = vector.load %arg2[%c0_6, %c0_7, %c0_8] : memref<1x256x8xbf16, #tpu.memory_space<vmem>>, vector<1x256x8xbf16>
    %21 = vector.shape_cast %20 : vector<1x256x8xbf16> to vector<256x8xbf16>
    %c8_9 = arith.constant 8 : index
    %c0_10 = arith.constant 0 : index
    %22 = vector.load %arg14[%c8_9, %c0_10] : memref<264x128xbf16, #tpu.memory_space<vmem>>, vector<256x8xbf16>
    tpu.vector_store %arg14[%c8_9, %c0_10], %21 {strides = array<i32>} : memref<264x128xbf16, #tpu.memory_space<vmem>>, vector<256x8xbf16>,
    %cst = arith.constant 0.000000e+00 : bf16
    %23 = vector.broadcast %cst : bf16 to vector<256x120xbf16>
    %c8_11 = arith.constant 8 : index
    %c8_12 = arith.constant 8 : index
    %24 = vector.load %arg13[%c8_11, %c8_12] : memref<265x128xbf16, #tpu.memory_space<vmem>>, vector<256x120xbf16>
    tpu.vector_store %arg13[%c8_11, %c8_12], %23 {strides = array<i32>} : memref<265x128xbf16, #tpu.memory_space<vmem>>, vector<256x120xbf16>,
    %c8_13 = arith.constant 8 : index
    %c8_14 = arith.constant 8 : index
    %25 = vector.load %arg14[%c8_13, %c8_14] : memref<264x128xbf16, #tpu.memory_space<vmem>>, vector<256x120xbf16>
    tpu.vector_store %arg14[%c8_13, %c8_14], %23 {strides = array<i32>} : memref<264x128xbf16, #tpu.memory_space<vmem>>, vector<256x120xbf16>,
    %c7 = arith.constant 7 : index
    %c0_15 = arith.constant 0 : index
    %26 = vector.load %arg13[%c7, %c0_15] : memref<265x128xbf16, #tpu.memory_space<vmem>>, vector<256x128xbf16>
    %c1_i32_16 = arith.constant 1 : i32
    %27 = vector.broadcast %c1_i32_16 : i32 to vector<256x1xi32>
    %28 = arith.cmpi sge, %16, %27 : vector<256x1xi32>
    %cst_17 = arith.constant 0.000000e+00 : bf16
    %29 = vector.broadcast %cst_17 : bf16 to vector<256x128xbf16>
    %30 = vector.shape_cast %28 : vector<256x1xi1> to vector<256x1xi1>
    %31 = vector.broadcast %30 : vector<256x1xi1> to vector<256x128xi1>
    %32 = arith.select %31, %26, %29 : vector<256x128xi1>, vector<256x128xbf16>
    %c0_18 = arith.constant 0 : index
    %c0_19 = arith.constant 0 : index
    %c0_20 = arith.constant 0 : index
    %33 = vector.load %arg3[%c0_18, %c0_19, %c0_20] : memref<3x128x128xbf16, #tpu.memory_space<vmem>>, vector<1x128x128xbf16>
    %34 = vector.shape_cast %33 : vector<1x128x128xbf16> to vector<128x128xbf16>
    %cst_21 = arith.constant dense<0.000000e+00> : vector<256x128xf32>
    %35 = tpu.matmul %32, %34, %cst_21 {dimension_numbers = #tpu.dot_dimension_numbers<[1], [0], [0], [1], [0, 0, 1, 1], [], []>} : vector<256x128xbf16>, vector<128x128xbf16>, vector<256x128xf32> -> vector<256x128xf32>
    %c8_22 = arith.constant 8 : index
    %c0_23 = arith.constant 0 : index
    %36 = vector.load %arg13[%c8_22, %c0_23] : memref<265x128xbf16, #tpu.memory_space<vmem>>, vector<256x128xbf16>
    %c1 = arith.constant 1 : index
    %c0_24 = arith.constant 0 : index
    %c0_25 = arith.constant 0 : index
    %37 = vector.load %arg3[%c1, %c0_24, %c0_25] : memref<3x128x128xbf16, #tpu.memory_space<vmem>>, vector<1x128x128xbf16>
    %38 = vector.shape_cast %37 : vector<1x128x128xbf16> to vector<128x128xbf16>
    %cst_26 = arith.constant dense<0.000000e+00> : vector<256x128xf32>
    %39 = tpu.matmul %36, %38, %cst_26 {dimension_numbers = #tpu.dot_dimension_numbers<[1], [0], [0], [1], [0, 0, 1, 1], [], []>} : vector<256x128xbf16>, vector<128x128xbf16>, vector<256x128xf32> -> vector<256x128xf32>
    %40 = arith.addf %35, %39 : vector<256x128xf32>
    %c9 = arith.constant 9 : index
    %c0_27 = arith.constant 0 : index
    %41 = vector.load %arg13[%c9, %c0_27] : memref<265x128xbf16, #tpu.memory_space<vmem>>, vector<256x128xbf16>
    %c15_i32 = arith.constant 15 : i32
    %42 = vector.broadcast %c15_i32 : i32 to vector<256x1xi32>
    %43 = arith.cmpi slt, %16, %42 : vector<256x1xi32>
    %cst_28 = arith.constant 0.000000e+00 : bf16
    %44 = vector.broadcast %cst_28 : bf16 to vector<256x128xbf16>
    %45 = vector.shape_cast %43 : vector<256x1xi1> to vector<256x1xi1>
    %46 = vector.broadcast %45 : vector<256x1xi1> to vector<256x128xi1>
    %47 = arith.select %46, %41, %44 : vector<256x128xi1>, vector<256x128xbf16>
    %c2 = arith.constant 2 : index
    %c0_29 = arith.constant 0 : index
    %c0_30 = arith.constant 0 : index
    %48 = vector.load %arg3[%c2, %c0_29, %c0_30] : memref<3x128x128xbf16, #tpu.memory_space<vmem>>, vector<1x128x128xbf16>
    %49 = vector.shape_cast %48 : vector<1x128x128xbf16> to vector<128x128xbf16>
    %cst_31 = arith.constant dense<0.000000e+00> : vector<256x128xf32>
    %50 = tpu.matmul %47, %49, %cst_31 {dimension_numbers = #tpu.dot_dimension_numbers<[1], [0], [0], [1], [0, 0, 1, 1], [], []>} : vector<256x128xbf16>, vector<128x128xbf16>, vector<256x128xf32> -> vector<256x128xf32>
    %51 = arith.addf %40, %50 : vector<256x128xf32>
    %c0_32 = arith.constant 0 : index
    %c0_33 = arith.constant 0 : index
    %52 = vector.load %arg4[%c0_32, %c0_33] : memref<1x128xf32, #tpu.memory_space<vmem>>, vector<1x128xf32>
    %53 = vector.broadcast %52 : vector<1x128xf32> to vector<256x128xf32>
    %54 = arith.addf %51, %53 : vector<256x128xf32>
    %cst_34 = arith.constant 0.000000e+00 : bf16
    %55 = vector.broadcast %cst_34 : bf16 to vector<32x128xbf16>
    %c0_35 = arith.constant 0 : index
    %c0_36 = arith.constant 0 : index
    %56 = vector.load %arg15[%c0_35, %c0_36] : memref<288x128xbf16, #tpu.memory_space<vmem>>, vector<32x128xbf16>
    tpu.vector_store %arg15[%c0_35, %c0_36], %55 {strides = array<i32>} : memref<288x128xbf16, #tpu.memory_space<vmem>>, vector<32x128xbf16>,
    %57 = arith.truncf %54 : vector<256x128xf32> to vector<256x128xbf16>
    %c32 = arith.constant 32 : index
    %c0_37 = arith.constant 0 : index
    %58 = vector.load %arg15[%c32, %c0_37] : memref<288x128xbf16, #tpu.memory_space<vmem>>, vector<256x128xbf16>
    tpu.vector_store %arg15[%c32, %c0_37], %57 {strides = array<i32>} : memref<288x128xbf16, #tpu.memory_space<vmem>>, vector<256x128xbf16>,
    %c0_38 = arith.constant 0 : index
    %c0_39 = arith.constant 0 : index
    %59 = vector.load %arg15[%c0_38, %c0_39] : memref<288x128xbf16, #tpu.memory_space<vmem>>, vector<256x128xbf16>
    %c0_40 = arith.constant 0 : index
    %c0_41 = arith.constant 0 : index
    %c0_42 = arith.constant 0 : index
    %60 = vector.load %arg5[%c0_40, %c0_41, %c0_42] : memref<2x128x512xbf16, #tpu.memory_space<vmem>>, vector<1x128x512xbf16>
    %61 = vector.shape_cast %60 : vector<1x128x512xbf16> to vector<128x512xbf16>
    %cst_43 = arith.constant dense<0.000000e+00> : vector<256x512xf32>
    %62 = tpu.matmul %59, %61, %cst_43 {dimension_numbers = #tpu.dot_dimension_numbers<[1], [0], [0], [1], [0, 0, 1, 1], [], []>} : vector<256x128xbf16>, vector<128x512xbf16>, vector<256x512xf32> -> vector<256x512xf32>
    %c16 = arith.constant 16 : index
    %c0_44 = arith.constant 0 : index
    %63 = vector.load %arg15[%c16, %c0_44] : memref<288x128xbf16, #tpu.memory_space<vmem>>, vector<256x128xbf16>
    %c1_45 = arith.constant 1 : index
    %c0_46 = arith.constant 0 : index
    %c0_47 = arith.constant 0 : index
    %64 = vector.load %arg5[%c1_45, %c0_46, %c0_47] : memref<2x128x512xbf16, #tpu.memory_space<vmem>>, vector<1x128x512xbf16>
    %65 = vector.shape_cast %64 : vector<1x128x512xbf16> to vector<128x512xbf16>
    %cst_48 = arith.constant dense<0.000000e+00> : vector<256x512xf32>
    %66 = tpu.matmul %63, %65, %cst_48 {dimension_numbers = #tpu.dot_dimension_numbers<[1], [0], [0], [1], [0, 0, 1, 1], [], []>} : vector<256x128xbf16>, vector<128x512xbf16>, vector<256x512xf32> -> vector<256x512xf32>
    %67 = arith.addf %62, %66 : vector<256x512xf32>
    %c0_49 = arith.constant 0 : index
    %c0_50 = arith.constant 0 : index
    %68 = vector.load %arg6[%c0_49, %c0_50] : memref<1x512xf32, #tpu.memory_space<vmem>>, vector<1x512xf32>
    %69 = vector.broadcast %68 : vector<1x512xf32> to vector<256x512xf32>
    %70 = arith.addf %67, %69 : vector<256x512xf32>
    %c8_51 = arith.constant 8 : index
    %c0_52 = arith.constant 0 : index
    %71 = vector.load %arg13[%c8_51, %c0_52] : memref<265x128xbf16, #tpu.memory_space<vmem>>, vector<256x128xbf16>
    %72 = vector.extract_strided_slice %70 {offsets = [0, 0], sizes = [256, 256], strides = [1, 1]} : vector<256x512xf32> to vector<256x256xf32>
    %c0_53 = arith.constant 0 : index
    %c0_54 = arith.constant 0 : index
    %73 = vector.load %arg7[%c0_53, %c0_54] : memref<128x256xbf16, #tpu.memory_space<vmem>>, vector<128x256xbf16>
    %cst_55 = arith.constant dense<0.000000e+00> : vector<256x256xf32>
    %74 = tpu.matmul %71, %73, %cst_55 {dimension_numbers = #tpu.dot_dimension_numbers<[1], [0], [0], [1], [0, 0, 1, 1], [], []>} : vector<256x128xbf16>, vector<128x256xbf16>, vector<256x256xf32> -> vector<256x256xf32>
    %75 = arith.addf %72, %74 : vector<256x256xf32>
    %76 = vector.extract_strided_slice %75 {offsets = [0, 0], sizes = [256, 128], strides = [1, 1]} : vector<256x256xf32> to vector<256x128xf32>
    %77 = arith.truncf %76 : vector<256x128xf32> to vector<256x128xbf16>
    %78 = math.tanh %77 : vector<256x128xbf16>
    %79 = vector.extract_strided_slice %75 {offsets = [0, 128], sizes = [256, 128], strides = [1, 1]} : vector<256x256xf32> to vector<256x128xf32>
    %80 = arith.truncf %79 : vector<256x128xf32> to vector<256x128xbf16>
    %81 = arith.negf %80 : vector<256x128xbf16>
    %82 = math.exp %81 : vector<256x128xbf16>
    %cst_56 = arith.constant 1.000000e+00 : bf16
    %83 = vector.broadcast %cst_56 : bf16 to vector<256x128xbf16>
    %84 = arith.addf %83, %82 : vector<256x128xbf16>
    %85 = arith.divf %83, %84 : vector<256x128xbf16>
    %86 = arith.mulf %78, %85 : vector<256x128xbf16>
    %87 = vector.extract_strided_slice %70 {offsets = [0, 256], sizes = [256, 128], strides = [1, 1]} : vector<256x512xf32> to vector<256x128xf32>
    %88 = vector.extract_strided_slice %70 {offsets = [0, 384], sizes = [256, 128], strides = [1, 1]} : vector<256x512xf32> to vector<256x128xf32>
    %c7_57 = arith.constant 7 : index
    %c0_58 = arith.constant 0 : index
    %89 = vector.load %arg14[%c7_57, %c0_58] : memref<264x128xbf16, #tpu.memory_space<vmem>>, vector<256x128xbf16>
    %c1_i32_59 = arith.constant 1 : i32
    %90 = vector.broadcast %c1_i32_59 : i32 to vector<256x1xi32>
    %91 = arith.cmpi sge, %16, %90 : vector<256x1xi32>
    %cst_60 = arith.constant 0.000000e+00 : bf16
    %92 = vector.broadcast %cst_60 : bf16 to vector<256x128xbf16>
    %93 = vector.shape_cast %91 : vector<256x1xi1> to vector<256x1xi1>
    %94 = vector.broadcast %93 : vector<256x1xi1> to vector<256x128xi1>
    %95 = arith.select %94, %89, %92 : vector<256x128xi1>, vector<256x128xbf16>
    %c0_61 = arith.constant 0 : index
    %c0_62 = arith.constant 0 : index
    %c0_63 = arith.constant 0 : index
    %96 = vector.load %arg8[%c0_61, %c0_62, %c0_63] : memref<2x128x256xbf16, #tpu.memory_space<vmem>>, vector<1x128x256xbf16>
    %97 = vector.shape_cast %96 : vector<1x128x256xbf16> to vector<128x256xbf16>
    %cst_64 = arith.constant dense<0.000000e+00> : vector<256x256xf32>
    %98 = tpu.matmul %95, %97, %cst_64 {dimension_numbers = #tpu.dot_dimension_numbers<[1], [0], [0], [1], [0, 0, 1, 1], [], []>} : vector<256x128xbf16>, vector<128x256xbf16>, vector<256x256xf32> -> vector<256x256xf32>
    %c8_65 = arith.constant 8 : index
    %c0_66 = arith.constant 0 : index
    %99 = vector.load %arg14[%c8_65, %c0_66] : memref<264x128xbf16, #tpu.memory_space<vmem>>, vector<256x128xbf16>
    %c1_67 = arith.constant 1 : index
    %c0_68 = arith.constant 0 : index
    %c0_69 = arith.constant 0 : index
    %100 = vector.load %arg8[%c1_67, %c0_68, %c0_69] : memref<2x128x256xbf16, #tpu.memory_space<vmem>>, vector<1x128x256xbf16>
    %101 = vector.shape_cast %100 : vector<1x128x256xbf16> to vector<128x256xbf16>
    %cst_70 = arith.constant dense<0.000000e+00> : vector<256x256xf32>
    %102 = tpu.matmul %99, %101, %cst_70 {dimension_numbers = #tpu.dot_dimension_numbers<[1], [0], [0], [1], [0, 0, 1, 1], [], []>} : vector<256x128xbf16>, vector<128x256xbf16>, vector<256x256xf32> -> vector<256x256xf32>
    %103 = arith.addf %98, %102 : vector<256x256xf32>
    %c0_71 = arith.constant 0 : index
    %c0_72 = arith.constant 0 : index
    %104 = vector.load %arg9[%c0_71, %c0_72] : memref<1x256xf32, #tpu.memory_space<vmem>>, vector<1x256xf32>
    %105 = vector.broadcast %104 : vector<1x256xf32> to vector<256x256xf32>
    %106 = arith.addf %103, %105 : vector<256x256xf32>
    %107 = vector.extract_strided_slice %106 {offsets = [0, 0], sizes = [256, 128], strides = [1, 1]} : vector<256x256xf32> to vector<256x128xf32>
    %108 = arith.addf %107, %87 : vector<256x128xf32>
    %109 = arith.truncf %108 : vector<256x128xf32> to vector<256x128xbf16>
    %110 = vector.extract_strided_slice %106 {offsets = [0, 128], sizes = [256, 128], strides = [1, 1]} : vector<256x256xf32> to vector<256x128xf32>
    %111 = arith.addf %110, %88 : vector<256x128xf32>
    %112 = arith.truncf %111 : vector<256x128xf32> to vector<256x128xbf16>
    %113 = math.tanh %109 : vector<256x128xbf16>
    %114 = arith.negf %112 : vector<256x128xbf16>
    %115 = math.exp %114 : vector<256x128xbf16>
    %cst_73 = arith.constant 1.000000e+00 : bf16
    %116 = vector.broadcast %cst_73 : bf16 to vector<256x128xbf16>
    %117 = arith.addf %116, %115 : vector<256x128xbf16>
    %118 = arith.divf %116, %117 : vector<256x128xbf16>
    %119 = arith.mulf %113, %118 : vector<256x128xbf16>
    %c0_74 = arith.constant 0 : index
    %c0_75 = arith.constant 0 : index
    %120 = vector.load %arg10[%c0_74, %c0_75] : memref<128x256xbf16, #tpu.memory_space<vmem>>, vector<128x256xbf16>
    %cst_76 = arith.constant dense<0.000000e+00> : vector<256x256xf32>
    %121 = tpu.matmul %119, %120, %cst_76 {dimension_numbers = #tpu.dot_dimension_numbers<[1], [0], [0], [1], [0, 0, 1, 1], [], []>} : vector<256x128xbf16>, vector<128x256xbf16>, vector<256x256xf32> -> vector<256x256xf32>
    %c0_77 = arith.constant 0 : index
    %c0_78 = arith.constant 0 : index
    %122 = vector.load %arg11[%c0_77, %c0_78] : memref<1x256xf32, #tpu.memory_space<vmem>>, vector<1x256xf32>
    %123 = vector.broadcast %122 : vector<1x256xf32> to vector<256x256xf32>
    %124 = arith.addf %121, %123 : vector<256x256xf32>
    %125 = vector.extract_strided_slice %124 {offsets = [0, 0], sizes = [256, 8], strides = [1, 1]} : vector<256x256xf32> to vector<256x8xf32>
    %126 = vector.extract_strided_slice %124 {offsets = [0, 128], sizes = [256, 8], strides = [1, 1]} : vector<256x256xf32> to vector<256x8xf32>
    %c0_79 = arith.constant 0 : index
    %c0_80 = arith.constant 0 : index
    %c0_81 = arith.constant 0 : index
    %127 = vector.load %arg2[%c0_79, %c0_80, %c0_81] : memref<1x256x8xbf16, #tpu.memory_space<vmem>>, vector<1x256x8xbf16>
    %128 = vector.shape_cast %127 : vector<1x256x8xbf16> to vector<256x8xbf16>
    %129 = arith.extf %128 : vector<256x8xbf16> to vector<256x8xf32>
    %130 = arith.addf %125, %129 : vector<256x8xf32>
    %131 = vector.extract_strided_slice %86 {offsets = [0, 0], sizes = [256, 8], strides = [1, 1]} : vector<256x128xbf16> to vector<256x8xbf16>
    %132 = arith.extf %131 : vector<256x8xbf16> to vector<256x8xf32>
    %c0_82 = arith.constant 0 : index
    %c0_83 = arith.constant 0 : index
    %c0_84 = arith.constant 0 : index
    %c0_85 = arith.constant 0 : index
    %133 = vector.load %arg12[%c0_82, %c0_83, %c0_84, %c0_85] : memref<1x3x256x8xf32, #tpu.memory_space<vmem>>, vector<1x1x256x8xf32>
    %134 = vector.shape_cast %133 : vector<1x1x256x8xf32> to vector<256x8xf32>
    %135 = vector.shape_cast %132 : vector<256x8xf32> to vector<1x1x256x8xf32>
    tpu.vector_store %arg12[%c0_82, %c0_83, %c0_84, %c0_85], %135 {strides = array<i32>} : memref<1x3x256x8xf32, #tpu.memory_space<vmem>>, vector<1x1x256x8xf32>,
    %c0_86 = arith.constant 0 : index
    %c1_87 = arith.constant 1 : index
    %c0_88 = arith.constant 0 : index
    %c0_89 = arith.constant 0 : index
    %136 = vector.load %arg12[%c0_86, %c1_87, %c0_88, %c0_89] : memref<1x3x256x8xf32, #tpu.memory_space<vmem>>, vector<1x1x256x8xf32>
    %137 = vector.shape_cast %136 : vector<1x1x256x8xf32> to vector<256x8xf32>
    %138 = vector.shape_cast %130 : vector<256x8xf32> to vector<1x1x256x8xf32>
    tpu.vector_store %arg12[%c0_86, %c1_87, %c0_88, %c0_89], %138 {strides = array<i32>} : memref<1x3x256x8xf32, #tpu.memory_space<vmem>>, vector<1x1x256x8xf32>,
    %c0_90 = arith.constant 0 : index
    %c2_91 = arith.constant 2 : index
    %c0_92 = arith.constant 0 : index
    %c0_93 = arith.constant 0 : index
    %139 = vector.load %arg12[%c0_90, %c2_91, %c0_92, %c0_93] : memref<1x3x256x8xf32, #tpu.memory_space<vmem>>, vector<1x1x256x8xf32>
    %140 = vector.shape_cast %139 : vector<1x1x256x8xf32> to vector<256x8xf32>
    %141 = vector.shape_cast %126 : vector<256x8xf32> to vector<1x1x256x8xf32>
    tpu.vector_store %arg12[%c0_90, %c2_91, %c0_92, %c0_93], %141 {strides = array<i32>} : memref<1x3x256x8xf32, #tpu.memory_space<vmem>>, vector<1x1x256x8xf32>,
    return
  }
  func.func @transform_0(%arg0: i32) -> (i32, i32, i32) {
    %c0_i32 = arith.constant 0 : i32
    %c0_i32_0 = arith.constant 0 : i32
    %c0_i32_1 = arith.constant 0 : i32
    return %arg0, %c0_i32, %c0_i32_0 : i32, i32, i32
  }
  func.func @transform_1(%arg0: i32) -> (i32, i32, i32) {
    %c0_i32 = arith.constant 0 : i32
    %c0_i32_0 = arith.constant 0 : i32
    %c0_i32_1 = arith.constant 0 : i32
    return %arg0, %c0_i32, %c0_i32_0 : i32, i32, i32
  }
  func.func @transform_2(%arg0: i32) -> (i32, i32, i32) {
    %c0_i32 = arith.constant 0 : i32
    %c0_i32_0 = arith.constant 0 : i32
    %c0_i32_1 = arith.constant 0 : i32
    %c0_i32_2 = arith.constant 0 : i32
    return %c0_i32, %c0_i32_0, %c0_i32_1 : i32, i32, i32
  }
  func.func @transform_3(%arg0: i32) -> (i32, i32) {
    %c0_i32 = arith.constant 0 : i32
    %c0_i32_0 = arith.constant 0 : i32
    %c0_i32_1 = arith.constant 0 : i32
    return %c0_i32, %c0_i32_0 : i32, i32
  }
  func.func @transform_4(%arg0: i32) -> (i32, i32, i32) {
    %c0_i32 = arith.constant 0 : i32
    %c0_i32_0 = arith.constant 0 : i32
    %c0_i32_1 = arith.constant 0 : i32
    %c0_i32_2 = arith.constant 0 : i32
    return %c0_i32, %c0_i32_0, %c0_i32_1 : i32, i32, i32
  }
  func.func @transform_5(%arg0: i32) -> (i32, i32) {
    %c0_i32 = arith.constant 0 : i32
    %c0_i32_0 = arith.constant 0 : i32
    %c0_i32_1 = arith.constant 0 : i32
    return %c0_i32, %c0_i32_0 : i32, i32
  }
  func.func @transform_6(%arg0: i32) -> (i32, i32) {
    %c0_i32 = arith.constant 0 : i32
    %c0_i32_0 = arith.constant 0 : i32
    %c0_i32_1 = arith.constant 0 : i32
    return %c0_i32, %c0_i32_0 : i32, i32
  }
  func.func @transform_7(%arg0: i32) -> (i32, i32, i32) {
    %c0_i32 = arith.constant 0 : i32
    %c0_i32_0 = arith.constant 0 : i32
    %c0_i32_1 = arith.constant 0 : i32
    %c0_i32_2 = arith.constant 0 : i32
    return %c0_i32, %c0_i32_0, %c0_i32_1 : i32, i32, i32
  }
  func.func @transform_8(%arg0: i32) -> (i32, i32) {
    %c0_i32 = arith.constant 0 : i32
    %c0_i32_0 = arith.constant 0 : i32
    %c0_i32_1 = arith.constant 0 : i32
    return %c0_i32, %c0_i32_0 : i32, i32
  }
  func.func @transform_9(%arg0: i32) -> (i32, i32) {
    %c0_i32 = arith.constant 0 : i32
    %c0_i32_0 = arith.constant 0 : i32
    %c0_i32_1 = arith.constant 0 : i32
    return %c0_i32, %c0_i32_0 : i32, i32
  }
  func.func @transform_10(%arg0: i32) -> (i32, i32) {
    %c0_i32 = arith.constant 0 : i32
    %c0_i32_0 = arith.constant 0 : i32
    %c0_i32_1 = arith.constant 0 : i32
    return %c0_i32, %c0_i32_0 : i32, i32
  }
  func.func @transform_11(%arg0: i32) -> (i32, i32, i32, i32) {
    %c0_i32 = arith.constant 0 : i32
    %c0_i32_0 = arith.constant 0 : i32
    %c0_i32_1 = arith.constant 0 : i32
    %c0_i32_2 = arith.constant 0 : i32
    return %arg0, %c0_i32, %c0_i32_0, %c0_i32_1 : i32, i32, i32, i32
  }
}

</mosaic_0001>

<bundles_post_ra>
// kernel: gated_pixelcnn_layer.1
= control target key start
LH: loop header
LB: loop body
LE: loop exit
PB: predicated region body
PF: predicated region fallthrough
CT: control target
= control target key end

     0   :  { %s9258_s17 = smov 0   ;;  %s12700_s0 = inlined_call_operand.vmem [shape: bf16[2,256,8], index: 0, kind: input, shape index: {}]   ;;  %s12701_s1 = inlined_call_operand.vmem [shape: bf16[2,256,8], index: 1, kind: input, shape index: {}]   ;;  %s12702_s2 = inlined_call_operand.vmem [shape: bf16[3,128,128], index: 2, kind: input, shape index: {}]   ;;  %s12703_s3 = inlined_call_operand.vmem [shape: f32[1,128], index: 3, kind: input, shape index: {}]   ;;  %s12704_s4 = inlined_call_operand.vmem [shape: bf16[2,128,512], index: 4, kind: input, shape index: {}]   ;;  %s12705_s5 = inlined_call_operand.vmem [shape: f32[1,512], index: 5, kind: input, shape index: {}]   ;;  %s12706_s6 = inlined_call_operand.vmem [shape: bf16[128,256], index: 6, kind: input, shape index: {}]   ;;  %s12707_s7 = inlined_call_operand.vmem [shape: bf16[2,128,256], index: 7, kind: input, shape index: {}]   ;;  %s12708_s8 = inlined_call_operand.vmem [shape: f32[1,256], index: 8, kind: input, shape index: {}]   ;;  %s12709_s9 = inlined_call_operand.vmem [shape: bf16[128,256], index: 9, kind: input, shape index: {}]   ;;  %s12710_s10 = inlined_call_operand.vmem [shape: f32[1,256], index: 10, kind: input, shape index: {}]   ;;  %s12711_s11 = inlined_call_operand.vmem [shape: f32[2,3,256,8], index: 11, kind: output, shape index: {}]  }
   0x1 LB: > { %s7398_s18 = sadd.s32 4294967295, %s9194_s17   ;;  %p7402_p0 = scmp.ge.s32.totalorder %s9194_s17, 1  ;;  %s9194_s17 = sphi %s9258_s17, %s21_s17  }
   0x2   : > { %p347_p1 = scmp.lt.s32.totalorder %s9194_s17, 3 }
   0x4   : > { %p348_p2 = pnand %p7402_p0, %p347_p1 }
   0x6   : > { %351 = sbr.rel (%p348_p2) target bundleno = 1489 (0x5d1), region = 64 }
   0xd   : > { %v8730_v0 = vld [vmem:[%s12702_s2 + $0x40] sm:$0xff]   ;;  %p392_p3 = scmp.lt.s32.totalorder %s7398_s18, 1  ;;  %v411_v1 = vlaneseq  ;;  %v8731_v2 = vld [vmem:[%s12702_s2 + $0x48] sm:$0xff]   ;;  %v8732_v4 = vld [vmem:[%s12702_s2 + $0x50] sm:$0xff]   ;;  %vm12713_vm0 = vcmask 60416   ;;  %vm12715_vm1 = vcmask 1043520  }
   0xe   : > { %7991 = vmatprep.subr.bf16.mxu0 %v8730_v0  ;;  %v8733_v7 = vld [vmem:[%s12702_s2 + $0x58] sm:$0xff]   ;;  %v12722_v17 = vmov 0   ;;  %vm1215_vm5 = vsmask.f32 3328  ;;  %v8734_v19 = vld [vmem:[%s12702_s2 + $0x60] sm:$0xff]   ;;  %vm9197_vm6 = vmmov 1  }
   0xf   : > { %s13182_s18 = smov (!%p392_p3, %s7398_s18), 1  ;;  %7992 = vmatpush3.bf16.msra.mxu0 %v8730_v0  ;;  %v9274_v3 = vshrl.u32 %v411_v1, 7  ;;  %4374 = vmatprep.mubr.bf16.mxu1 %v12722_v17  ;;  %vm1152_vm7 = vmpackc.low %vm9197_vm6, %vm9197_vm6  ;;  %vm1216_vm8 = vsmask.f32 7440  ;;  %v1022_v29 = vld [vmem:[#allocation2] sm:$0x8] }
  0x10   : > { %7993 = vmatprep.subr.bf16.mxu0 %v8731_v2  ;;  %s7838_s25 = sshll.u32 %s13182_s18, 7  ;;  %v9341_v22 = vsel %vm1152_vm7, 65537, %v12722_v17  ;;  %v8735_v35 = vld [vmem:[%s12702_s2 + $0x68] sm:$0xff]   ;;  %vm9374_vm13 = vmor %vm1215_vm5, %vm1216_vm8  ;;  %v8736_v53 = vld [vmem:[%s12702_s2 + $0x70] sm:$0xff]   ;;  %s8719_s30 = smul.u32 768, %s13182_s18 }
  0x11   : > { %12750 = vst [vmem:[#allocation5_spill] sm:$0xff] %v9274_v3  ;;  %s9283_s28 = scalar_lea.vmem %s12700_s0, %s7838_s25  ;;  %v414_v5 = vadd.s32 16, %v9274_v3  ;;  %s9289_s12 = scalar_lea.vmem %s12701_s1, %s7838_s25  ;;  %v448_v6 = vand.u32 15, %v9274_v3  ;;  %v416_v18 = vadd.s32 32, %v9274_v3  ;;  %v12714_v27 = vshll.u32 %v9341_v22, 16 }
  0x12   : > { %v828_v9 = vld [vmem:[%s9283_s28] sm:$0xf]  ;;  %v829_v10 = vld [vmem:[%s9283_s28 + $0x4] sm:$0xf]  ;;  %v830_v11 = vld [vmem:[%s9283_s28 + $0x8] sm:$0xf]  ;;  %s11855_s14 = scalar_lea.vmem %s12711_s11, %s8719_s30 }
  0x13   : > { %7994 = vmatpush3.bf16.msra.mxu0 %v8731_v2  ;;  %v462_v8 = vand.u32 15, %v414_v5  ;;  %861 = vst.msk [vmem:[#allocation2 + $0x4] sm:$0xf] %vm12713_vm0, %v828_v9  ;;  %862 = vst.msk [vmem:[#allocation2 + $0x8] sm:$0xf] %vm12713_vm0, %v829_v10  ;;  %vm9307_vm2 = vcmp.ge.s32.totalorder %v448_v6, 1 }
  0x14   : > { %7995 = vmatprep.subr.bf16.mxu0 %v8732_v4  ;;  %863 = vst.msk [vmem:[#allocation2 + $0xc] sm:$0xf] %vm12713_vm0, %v830_v11  ;;  %v893_v12 = vld [vmem:[%s9289_s12] sm:$0xf]  ;;  %v894_v13 = vld [vmem:[%s9289_s12 + $0x4] sm:$0xf]  ;;  %vm1151_vm4 = vmpackc.low %vm9307_vm2, %vm9307_vm2 }
  0x15   : > { %v895_v14 = vld [vmem:[%s9289_s12 + $0x8] sm:$0xf]  ;;  %925 = vst.msk [vmem:[#allocation3 + $0x4] sm:$0xf] %vm12713_vm0, %v893_v12  ;;  %926 = vst.msk [vmem:[#allocation3 + $0x8] sm:$0xf] %vm12713_vm0, %v894_v13 }
  0x16   : > { %927 = vst.msk [vmem:[#allocation3 + $0xc] sm:$0xf] %vm12713_vm0, %v895_v14  ;;  %vm9311_vm3 = vcmp.ge.s32.totalorder %v462_v8, 1  ;;  %v1183_v20 = vsel %vm1151_vm4, 65537, %v12722_v17  ;;  %v831_v21 = vld [vmem:[%s9283_s28 + $0xc] sm:$0xf] }
  0x17   : > { %7996 = vmatpush3.bf16.msra.mxu0 %v8732_v4  ;;  %958 = vst.msk [vmem:[#allocation2 + $0x4] sm:$0xf] %vm12715_vm1, %v12722_v17  ;;  %959 = vst.msk [vmem:[#allocation2 + $0x8] sm:$0xf] %vm12715_vm1, %v12722_v17  ;;  %v1219_v23 = vshll.u32 %v1183_v20, 16  ;;  %v1222_v24 = vshrl.u32 %v1183_v20, 16 }
  0x18   : > { %960 = vst.msk [vmem:[#allocation2 + $0xc] sm:$0xf] %vm12715_vm1, %v12722_v17  ;;  %990 = vst.msk [vmem:[#allocation3 + $0x4] sm:$0xf] %vm12715_vm1, %v12722_v17  ;;  %7997 = vmatprep.subr.bf16.mxu0 %v8733_v7  ;;  %v476_v25 = vand.u32 15, %v416_v18  ;;  %v1232_v28 = vshrl.u32 %v9341_v22, 16 }
  0x19   : > { %991 = vst.msk [vmem:[#allocation3 + $0x8] sm:$0xf] %vm12715_vm1, %v12722_v17  ;;  %992 = vst.msk [vmem:[#allocation3 + $0xc] sm:$0xf] %vm12715_vm1, %v12722_v17  ;;  %v1221_v30 = vrot.slane %v1219_v23, 5  ;;  %v1224_v31 = vrot.slane %v1222_v24, 4 }
  0x1a   : > { %vm1153_vm9 = vmpackc.low %vm9311_vm3, %vm9311_vm3  ;;  %864 = vst.msk [vmem:[#allocation2 + $0x10] sm:$0xf] %vm12713_vm0, %v831_v21  ;;  %v832_v34 = vld [vmem:[%s9283_s28 + $0x10] sm:$0xf]  ;;  %v9355_v36 = vrot.slane %v12714_v27, 5  ;;  %v1234_v37 = vrot.slane %v1232_v28, 4 }
  0x1b   : > { %v1185_v26 = vsel %vm1153_vm9, 65537, %v12722_v17  ;;  %961 = vst.msk [vmem:[#allocation2 + $0x10] sm:$0xf] %vm12715_vm1, %v12722_v17  ;;  %7998 = vmatpush3.bf16.msra.mxu0 %v8733_v7  ;;  %v5495_v38 = vld [vmem:[#allocation3] sm:$0x8]  ;;  %vm9359_vm10 = vcmp.ge.s32.totalorder %v476_v25, 1  ;;  %v1225_v41 = vor.u32 %v1224_v31, %v1221_v30 }
  0x1c   : > { %v1238_v32 = vshll.u32 %v1185_v26, 16  ;;  %v1242_v33 = vshrl.u32 %v1185_v26, 16  ;;  %7999 = vmatprep.subr.bf16.mxu0 %v8734_v19  ;;  %v833_v40 = vld [vmem:[%s9283_s28 + $0x14] sm:$0xf]  ;;  %865 = vst.msk [vmem:[#allocation2 + $0x14] sm:$0xf] %vm12713_vm0, %v832_v34  ;;  %vm1155_vm12 = vmpackc.low %vm9359_vm10, %vm9359_vm10  ;;  %v1235_v48 = vor.u32 %v1234_v37, %v9355_v36 }
  0x1d   : > { %vm1537_vm11 = vcmp.ne.s16.totalorder %v1221_v30, 0  ;;  %866 = vst.msk [vmem:[#allocation2 + $0x18] sm:$0xf] %vm12713_vm0, %v833_v40  ;;  %v834_v44 = vld [vmem:[%s9283_s28 + $0x18] sm:$0xf]  ;;  %v418_v49 = vadd.s32 48, %v9274_v3 }
  0x1e   : > { %v1240_v42 = vrot.slane %v1238_v32, 5  ;;  %v1244_v43 = vrot.slane %v1242_v33, 4  ;;  %962 = vst.msk [vmem:[#allocation2 + $0x14] sm:$0xf] %vm12715_vm1, %v12722_v17  ;;  %v1023_v45 = vld [vmem:[#allocation2 + $0x4] sm:$0xf] }
  0x1f   : > { %v1024_v46 = vld [vmem:[#allocation2 + $0x8] sm:$0xf]  ;;  %963 = vst.msk [vmem:[#allocation2 + $0x18] sm:$0xf] %vm12715_vm1, %v12722_v17  ;;  %8000 = vmatpush3.bf16.msra.mxu0 %v8734_v19  ;;  %v1226_v50 = vrot.slane %v1225_v41, 4  ;;  %v9388_v54 = vrot.slane %v1235_v48, 4 }
  0x20   : > { %867 = vst.msk [vmem:[#allocation2 + $0x1c] sm:$0xf] %vm12713_vm0, %v834_v44  ;;  %v1245_v51 = vor.u32 %v1244_v43, %v1240_v42  ;;  %v7424_v52 = vcombine.low %v1023_v45, %v1024_v46  ;;  %8001 = vmatprep.subr.bf16.mxu0 %v8735_v35  ;;  %v1570_v55 = vsel %vm1537_vm11, %v1022_v29, 0  ;;  %v5496_v56 = vld [vmem:[#allocation3 + $0x4] sm:$0xf]  ;;  %v9397_v57 = vsel %vm1155_vm12, 65537, %v12722_v17 }
  0x21   : > { %964 = vst.msk [vmem:[#allocation2 + $0x1c] sm:$0xf] %vm12715_vm1, %v12722_v17  ;;  %12759 = vst [vmem:[#allocation6_spill] sm:$0xff] %v9388_v54  ;;  %v1231_v58 = vsel %vm9374_vm13, %v1226_v50, %v9355_v36  ;;  %v5497_v60 = vld [vmem:[#allocation3 + $0x8] sm:$0xf]  ;;  %v5528_v61 = vsel %vm1537_vm11, %v5495_v38, 0  ;;  %v1241_v0 = vsel %vm9374_vm13, %v9388_v54, %v1240_v42 }
  0x22   : > { %v1246_v59 = vrot.slane %v1245_v51, 4  ;;  %8007 = vmatprep.mubr.bf16.mxu0 %v7424_v52  ;;  %v1258_v62 = vshll.u32 %v9397_v57, 16  ;;  %v9404_v63 = vld [vmem:[#allocation2 + $0xc] sm:$0xf]  ;;  %vm9409_vm14 = vcmp.ne.s16.totalorder %v1231_v58, 0  ;;  %v490_v2 = vand.u32 15, %v418_v49 }
  0x23   : > { %v835_v4 = vld [vmem:[%s9283_s28 + $0x1c] sm:$0xf]  ;;  %8002 = vmatpush3.bf16.msra.mxu0 %v8735_v35  ;;  %vm9417_vm15 = vcmp.ne.s16.totalorder %v1241_v0, 0  ;;  %v1571_v7 = vsel %vm9409_vm14, %v1023_v45, 0  ;;  %v5529_v8 = vsel %vm9409_vm14, %v5496_v56, 0  ;;  %v9438_v15 = vrot.slane %v1232_v28, 7 }
  0x24   : > { %v1251_v5 = vsel %vm9374_vm13, %v1246_v59, %v9355_v36  ;;  %868 = vst.msk [vmem:[#allocation2 + $0x20] sm:$0xf] %vm12713_vm0, %v835_v4  ;;  %8003 = vmatprep.subr.bf16.mxu0 %v8736_v53  ;;  %v8737_v9 = vld [vmem:[%s12702_s2 + $0x78] sm:$0xff]   ;;  %v1572_v10 = vsel %vm9417_vm15, %v1024_v46, 0  ;;  %v7448_v11 = vcombine.low %v1570_v55, %v1571_v7  ;;  %v5498_v12 = vld [vmem:[#allocation3 + $0xc] sm:$0xf]  ;;  %v9440_v18 = vcombine.low %v5528_v61, %v5529_v8 }
  0x25   : > { %vm1540_vm2 = vcmp.ne.s16.totalorder %v1251_v5, 0  ;;  %v5530_v13 = vsel %vm9417_vm15, %v5497_v60, 0  ;;  %965 = vst.msk [vmem:[#allocation2 + $0x20] sm:$0xf] %vm12715_vm1, %v12722_v17  ;;  %v9444_v23 = vrot.slane %v1258_v62, 5  ;;  %vm9449_vm3 = vcmp.ge.s32.totalorder %v490_v2, 1 }
  0x26   : > { %v1573_v14 = vsel %vm1540_vm2, %v9404_v63, 0  ;;  %v5531_v16 = vsel %vm1540_vm2, %v5498_v12, 0  ;;  %12764 = vst [vmem:[#allocation7_spill] sm:$0xff] %v9440_v18  ;;  %v2026_v20 = vshrl.u32 %v7448_v11, 16  ;;  %v836_v24 = vld [vmem:[%s9283_s28 + $0x20] sm:$0xf]  ;;  %vm1157_vm4 = vmpackc.low %vm9449_vm3, %vm9449_vm3 }
  0x27   : > { %v7449_v19 = vcombine.low %v1572_v10, %v1573_v14  ;;  %v9442_v21 = vcombine.low %v5530_v13, %v5531_v16  ;;  %8004 = vmatpush3.bf16.msra.mxu0 %v8736_v53  ;;  %v2029_v25 = vshll.u32 %v7448_v11, 16  ;;  %v9447_v26 = vld [vmem:[#allocation2 + $0x10] sm:$0xf]  ;;  %v837_v28 = vld [vmem:[%s9283_s28 + $0x24] sm:$0xf]  ;;  %v1261_v32 = vsel %vm9374_vm13, %v9388_v54, %v9444_v23  ;;  %v8743_v55 = vld [vmem:[%s12702_s2 + $0x8] sm:$0xff]  }
  0x28   : > { %869 = vst.msk [vmem:[#allocation2 + $0x24] sm:$0xf] %vm12713_vm0, %v836_v24  ;;  %8005 = vmatprep.subr.bf16.mxu0 %v8737_v9  ;;  %v1262_v33 = vshrl.u32 %v9397_v57, 16  ;;  %v8740_v34 = vld [vmem:[%s12702_s2] sm:$0xff]   ;;  %870 = vst.msk [vmem:[#allocation2 + $0x28] sm:$0xf] %vm12713_vm0, %v837_v28  ;;  %v7425_v41 = vcombine.low %v9404_v63, %v9447_v26 }
  0x29   : > { %12765 = vst [vmem:[#allocation8_spill] sm:$0xff] %v9442_v21  ;;  %v2034_v30 = vshrl.u32 %v7449_v19, 16  ;;  %v2037_v31 = vshll.u32 %v7449_v19, 16  ;;  %966 = vst.msk [vmem:[#allocation2 + $0x24] sm:$0xf] %vm12715_vm1, %v12722_v17  ;;  %v9478_v40 = vrot.slane %v2026_v20, 3 }
  0x2a   : > { %v838_v35 = vld [vmem:[%s9283_s28 + $0x28] sm:$0xf]  ;;  %v9470_v37 = vld [vmem:[#allocation2 + $0x14] sm:$0xf]  ;;  %v9472_v38 = vld [vmem:[#allocation2 + $0x18] sm:$0xf] }
  0x2b   : > { %967 = vst.msk [vmem:[#allocation2 + $0x28] sm:$0xf] %vm12715_vm1, %v12722_v17  ;;  %v839_v39 = vld [vmem:[%s9283_s28 + $0x2c] sm:$0xf]  ;;  %v1189_v42 = vsel %vm1157_vm4, 65537, %v12722_v17  ;;  %8006 = vmatpush3.bf16.msra.mxu0 %v8737_v9  ;;  %v9488_v44 = vrot.slane %v2029_v25, 4  ;;  %v7426_v53 = vcombine.low %v9470_v37, %v9472_v38 }
  0x2c   : > { %871 = vst.msk [vmem:[#allocation2 + $0x2c] sm:$0xf] %vm12713_vm0, %v838_v35  ;;  %v9483_v43 = vld [vmem:[#allocation2 + $0x1c] sm:$0xf]  ;;  %872 = vst.msk [vmem:[#allocation2 + $0x30] sm:$0xf] %vm12713_vm0, %v839_v39  ;;  %8039 = vmatprep.subr.bf16.mxu0 %v8740_v34 }
  0x2d   : > { %968 = vst.msk [vmem:[#allocation2 + $0x2c] sm:$0xf] %vm12715_vm1, %v12722_v17  ;;  %v9490_v45 = vrot.slane %v2034_v30, 3  ;;  %v9492_v46 = vrot.slane %v2037_v31, 4  ;;  %vm9494_vm5 = vcmp.ne.s16.totalorder %v1261_v32, 0  ;;  %v1264_v50 = vrot.slane %v1262_v33, 4 }
  0x2e   : > { %v9498_v49 = vld [vmem:[#allocation2 + $0x20] sm:$0xf]  ;;  %969 = vst.msk [vmem:[#allocation2 + $0x30] sm:$0xf] %vm12715_vm1, %v12722_v17  ;;  %v1278_v51 = vshll.u32 %v1189_v42, 16  ;;  %v1282_v52 = vshrl.u32 %v1189_v42, 16  ;;  %8008 = vmatmul.mubr.bf16.vlgmr.msra.gmra.mrb[0].mxu0 %v7425_v41 }
  0x2f   : > { %v420_v56 = vadd.s32 64, %v9274_v3  ;;  %v422_v57 = vadd.s32 80, %v9274_v3  ;;  %v840_v58 = vld [vmem:[%s9283_s28 + $0x30] sm:$0xf]  ;;  %v841_v59 = vld [vmem:[%s9283_s28 + $0x34] sm:$0xf]  ;;  %v1265_v60 = vor.u32 %v1264_v50, %v9444_v23  ;;  %8040 = vmatpush3.bf16.msra.mxu0 %v8740_v34  ;;  %8011 = vmatprep.mubr.bf16.mxu0 %v7426_v53  ;;  %v7427_v4 = vcombine.low %v9483_v43, %v9498_v49 }
  0x30   : > { %v1280_v61 = vrot.slane %v1278_v51, 5  ;;  %v1284_v62 = vrot.slane %v1282_v52, 4  ;;  %v424_v63 = vadd.s32 96, %v9274_v3  ;;  %873 = vst.msk [vmem:[#allocation2 + $0x34] sm:$0xf] %vm12713_vm0, %v840_v58  ;;  %v1574_v1 = vsel %vm9494_vm5, %v9447_v26, 0  ;;  %8041 = vmatprep.subr.bf16.mxu0 %v8743_v55 }
  0x31   : > { %874 = vst.msk [vmem:[#allocation2 + $0x38] sm:$0xf] %vm12713_vm0, %v841_v59  ;;  %v842_v0 = vld [vmem:[%s9283_s28 + $0x38] sm:$0xf]  ;;  %v504_v2 = vand.u32 15, %v420_v56  ;;  %v518_v5 = vand.u32 15, %v422_v57 }
  0x32   : > { %v9521_v6 = vld [vmem:[#allocation2 + $0x24] sm:$0xf]  ;;  %v8746_v7 = vld [vmem:[%s12702_s2 + $0x10] sm:$0xff]   ;;  %970 = vst.msk [vmem:[#allocation2 + $0x34] sm:$0xf] %vm12715_vm1, %v12722_v17  ;;  %v1266_v8 = vrot.slane %v1265_v60, 4  ;;  %v1281_v9 = vsel %vm9374_vm13, %v9388_v54, %v1280_v61  ;;  %v1285_v10 = vor.u32 %v1284_v62, %v1280_v61 }
  0x33   : > { %971 = vst.msk [vmem:[#allocation2 + $0x38] sm:$0xf] %vm12715_vm1, %v12722_v17  ;;  %v9534_v11 = vld [vmem:[#allocation2 + $0x28] sm:$0xf]  ;;  %v532_v12 = vand.u32 15, %v424_v63  ;;  %vm9539_vm6 = vcmp.ne.s16.totalorder %v1281_v9, 0  ;;  %8042 = vmatpush3.bf16.msra.mxu0 %v8743_v55 }
  0x34   : > { %875 = vst.msk [vmem:[#allocation2 + $0x3c] sm:$0xf] %vm12713_vm0, %v842_v0  ;;  %v843_v13 = vld [vmem:[%s9283_s28 + $0x3c] sm:$0xf]  ;;  %vm1063_vm7 = vcmp.ge.s32.totalorder %v504_v2, 1  ;;  %vm9543_vm8 = vcmp.ge.s32.totalorder %v518_v5, 1  ;;  %v1271_v20 = vsel %vm9374_vm13, %v1266_v8, %v9355_v36  ;;  %v7428_v30 = vcombine.low %v9521_v6, %v9534_v11  ;;  %8043 = vmatprep.subr.bf16.mxu0 %v8746_v7 }
  0x35   : > { %972 = vst.msk [vmem:[#allocation2 + $0x3c] sm:$0xf] %vm12715_vm1, %v12722_v17  ;;  %v9548_v19 = vadd.s32 112, %v9274_v3  ;;  %vm1159_vm9 = vmpackc.low %vm1063_vm7, %vm1063_vm7  ;;  %v1286_v23 = vrot.slane %v1285_v10, 4  ;;  %vm9554_vm10 = vcmp.ge.s32.totalorder %v532_v12, 1  ;;  %v9559_v25 = vadd.s32 128, %v9274_v3 }
  0x36   : > { %876 = vst.msk [vmem:[#allocation2 + $0x40] sm:$0xf] %vm12713_vm0, %v843_v13  ;;  %vm9563_vm11 = vcmp.ne.s16.totalorder %v1271_v20, 0  ;;  %v1576_v29 = vsel %vm9539_vm6, %v9472_v38, 0  ;;  %v1191_v28 = vsel %vm1159_vm9, 65537, %v12722_v17  ;;  %vm1161_vm12 = vmpackc.low %vm9543_vm8, %vm9543_vm8  ;;  %v8749_v39 = vld [vmem:[%s12702_s2 + $0x18] sm:$0xff]   ;;  %8012 = vmatmul.mubr.bf16.gmra.mrb[4].mxu0 %v7427_v4 }
  0x37   : > { %973 = vst.msk [vmem:[#allocation2 + $0x40] sm:$0xf] %vm12715_vm1, %v12722_v17  ;;  %v1575_v31 = vsel %vm9563_vm11, %v9470_v37, 0  ;;  %v1291_v32 = vsel %vm9374_vm13, %v1286_v23, %v9355_v36  ;;  %v1298_v33 = vshll.u32 %v1191_v28, 16  ;;  %v1302_v34 = vshrl.u32 %v1191_v28, 16  ;;  %vm1163_vm14 = vmpackc.low %vm9554_vm10, %vm9554_vm10  ;;  %8015 = vmatprep.mubr.bf16.mxu0 %v7428_v30  ;;  %8044 = vmatpush3.bf16.msra.mxu0 %v8746_v7  ;;  %v8752_v4 = vld [vmem:[%s12702_s2 + $0x20] sm:$0xff]  }
  0x38   : > { %v9582_v35 = vld [vmem:[#allocation2 + $0x2c] sm:$0xf]  ;;  %v7450_v41 = vcombine.low %v1574_v1, %v1575_v31  ;;  %vm9590_vm15 = vcmp.ne.s16.totalorder %v1291_v32, 0  ;;  %v12778_v37 = vmov 0  ;;  %v1193_v42 = vsel %vm1161_vm12, 65537, %v12722_v17  ;;  %8045 = vmatprep.subr.bf16.mxu0 %v8749_v39  ;;  %v9783_v38 = vld [vmem:[%s12702_s2 + $0x80] sm:$0xff]  }
  0x39   : > { %v12779_v37 = vsel %vm9590_vm15, 4294967295, %v12778_v37  ;;  %v1195_v50 = vsel %vm1163_vm14, 65537, %v12722_v17  ;;  %v844_v51 = vld [vmem:[%s9283_s28 + $0x40] sm:$0xf]  ;;  %v1300_v52 = vrot.slane %v1298_v33, 5  ;;  %v1304_v53 = vrot.slane %v1302_v34, 4 }
  0x3a   : > { %v1318_v55 = vshll.u32 %v1193_v42, 16  ;;  %v9597_v56 = vld [vmem:[#allocation2 + $0x30] sm:$0xf]  ;;  %v546_v57 = vand.u32 15, %v9548_v19  ;;  %877 = vst.msk [vmem:[#allocation2 + $0x44] sm:$0xf] %vm12713_vm0, %v844_v51 }
  0x3b   : > { %v2043_v58 = vshrl.u32 %v7450_v41, 16  ;;  %v2046_v59 = vshll.u32 %v7450_v41, 16  ;;  %v1577_v60 = vsel %vm9590_vm15, %v9483_v43, 0  ;;  %v1322_v61 = vshrl.u32 %v1193_v42, 16  ;;  %974 = vst.msk [vmem:[#allocation2 + $0x44] sm:$0xf] %vm12715_vm1, %v12722_v17  ;;  %8046 = vmatpush3.bf16.msra.mxu0 %v8749_v39 }
  0x3c   : > { %v1301_v62 = vsel %vm9374_vm13, %v9388_v54, %v1300_v52  ;;  %v1305_v63 = vor.u32 %v1304_v53, %v1300_v52  ;;  %v1320_v0 = vrot.slane %v1318_v55, 5  ;;  %v1338_v1 = vshll.u32 %v1195_v50, 16  ;;  %v845_v2 = vld [vmem:[%s9283_s28 + $0x44] sm:$0xf]  ;;  %v9617_v9 = vld [vmem:[#allocation2 + $0x34] sm:$0xf]  ;;  %8047 = vmatprep.subr.bf16.mxu0 %v8752_v4 }
  0x3d   : > { %v9613_v5 = vrot.slane %v2043_v58, 3  ;;  %v1324_v7 = vrot.slane %v1322_v61, 4  ;;  %v7429_v8 = vcombine.low %v9582_v35, %v9597_v56  ;;  %v9619_v10 = vld [vmem:[#allocation2 + $0x38] sm:$0xf]  ;;  %878 = vst.msk [vmem:[#allocation2 + $0x48] sm:$0xf] %vm12713_vm0, %v845_v2 }
  0x3e   : > { %vm9622_vm2 = vcmp.ne.s16.totalorder %v1301_v62, 0  ;;  %v12780_v12 = vmov 0  ;;  %v1306_v13 = vrot.slane %v1305_v63, 4  ;;  %v1321_v16 = vsel %vm9374_vm13, %v9388_v54, %v1320_v0  ;;  %975 = vst.msk [vmem:[#allocation2 + $0x48] sm:$0xf] %vm12715_vm1, %v12722_v17  ;;  %v9635_v23 = vld [vmem:[%s12702_s2 + $0x28] sm:$0xff]  }
  0x3f   : > { %v12781_v12 = vsel %vm9622_vm2, 4294967295, %v12780_v12  ;;  %v1340_v19 = vrot.slane %v1338_v1, 5  ;;  %v846_v20 = vld [vmem:[%s9283_s28 + $0x48] sm:$0xf]  ;;  %vm9637_vm3 = vcmp.ne.s16.totalorder %v1321_v16, 0  ;;  %v12782_v24 = vmov 0  ;;  %8016 = vmatmul.mubr.bf16.gmra.mrb[8].mxu0 %v7429_v8 }
  0x40   : > { %v12783_v24 = vsel %vm9637_vm3, 4294967295, %v12782_v24  ;;  %v1325_v28 = vor.u32 %v1324_v7, %v1320_v0  ;;  %v1342_v30 = vshrl.u32 %v1195_v50, 16  ;;  %vm9641_vm4 = vcmp.ge.s32.totalorder %v546_v57, 1  ;;  %v847_v32 = vld [vmem:[%s9283_s28 + $0x4c] sm:$0xf]  ;;  %v9691_v0 = vld [vmem:[%s12702_s2 + $0x30] sm:$0xff]   ;;  %8048 = vmatpush3.bf16.msra.mxu0 %v8752_v4 }
  0x41   : > { %879 = vst.msk [vmem:[#allocation2 + $0x4c] sm:$0xf] %vm12713_vm0, %v846_v20  ;;  %v9647_v33 = vrot.slane %v2046_v59, 4  ;;  %v1311_v34 = vsel %vm9374_vm13, %v1306_v13, %v9355_v36  ;;  %v1341_v41 = vsel %vm9374_vm13, %v9388_v54, %v1340_v19  ;;  %vm1165_vm7 = vmpackc.low %vm9641_vm4, %vm9641_vm4  ;;  %v7430_v39 = vcombine.low %v9617_v9, %v9619_v10  ;;  %v9671_v53 = vld [vmem:[#allocation2 + $0x3c] sm:$0xf]  ;;  %8049 = vmatprep.subr.bf16.mxu0 %v9635_v23 }
  0x42   : > { %880 = vst.msk [vmem:[#allocation2 + $0x50] sm:$0xf] %vm12713_vm0, %v847_v32  ;;  %v1578_v42 = vsel %vm9622_vm2, %v9498_v49, 0  ;;  %vm9666_vm8 = vcmp.ne.s16.totalorder %v1311_v34, 0  ;;  %v12786_v50 = vmov 0  ;;  %v1326_v51 = vrot.slane %v1325_v28, 4 }
  0x43   : > { %976 = vst.msk [vmem:[#allocation2 + $0x4c] sm:$0xf] %vm12715_vm1, %v12722_v17  ;;  %v12787_v50 = vsel %vm9666_vm8, 4294967295, %v12786_v50  ;;  %v1197_v52 = vsel %vm1165_vm7, 65537, %v12722_v17  ;;  %v9673_v55 = vld [vmem:[#allocation2 + $0x40] sm:$0xf]  ;;  %8019 = vmatprep.mubr.bf16.mxu0 %v7430_v39 }
  0x44   : > { %977 = vst.msk [vmem:[#allocation2 + $0x50] sm:$0xf] %vm12715_vm1, %v12722_v17  ;;  %v848_v57 = vld [vmem:[%s9283_s28 + $0x50] sm:$0xf]  ;;  %vm9681_vm9 = vcmp.ne.s16.totalorder %v1341_v41, 0  ;;  %v1344_v61 = vrot.slane %v1342_v30, 4  ;;  %v1331_v1 = vsel %vm9374_vm13, %v1326_v51, %v9355_v36  ;;  %v7431_v41 = vcombine.low %v9671_v53, %v9673_v55  ;;  %8050 = vmatpush3.bf16.msra.mxu0 %v9635_v23 }
  0x45   : > { %v1358_v62 = vshll.u32 %v1197_v52, 16  ;;  %v9685_v63 = vld [vmem:[#allocation2 + $0x44] sm:$0xf]  ;;  %881 = vst.msk [vmem:[#allocation2 + $0x54] sm:$0xf] %vm12713_vm0, %v848_v57  ;;  %v1362_v2 = vshrl.u32 %v1197_v52, 16  ;;  %8051 = vmatprep.subr.bf16.mxu0 %v9691_v0 }
  0x46   : > { %v560_v7 = vand.u32 15, %v9559_v25  ;;  %v849_v8 = vld [vmem:[%s9283_s28 + $0x54] sm:$0xf]  ;;  %978 = vst.msk [vmem:[#allocation2 + $0x54] sm:$0xf] %vm12715_vm1, %v12722_v17  ;;  %v1579_v16 = vsel %vm9666_vm8, %v9521_v6, 0  ;;  %v1345_v20 = vor.u32 %v1344_v61, %v1340_v19 }
  0x47   : > { %v850_v13 = vld [vmem:[%s9283_s28 + $0x58] sm:$0xf]  ;;  %v1360_v28 = vrot.slane %v1358_v62, 5  ;;  %882 = vst.msk [vmem:[#allocation2 + $0x58] sm:$0xf] %vm12713_vm0, %v849_v8  ;;  %vm9708_vm10 = vcmp.ne.s16.totalorder %v1331_v1, 0  ;;  %8020 = vmatmul.mubr.bf16.gmra.mrb[12].mxu0 %v7431_v41 }
  0x48   : > { %v851_v30 = vld [vmem:[%s9283_s28 + $0x5c] sm:$0xf]  ;;  %883 = vst.msk [vmem:[#allocation2 + $0x5c] sm:$0xf] %vm12713_vm0, %v850_v13  ;;  %v12790_v25 = vmov 0  ;;  %vm1071_vm12 = vcmp.ge.s32.totalorder %v560_v7, 1  ;;  %8052 = vmatpush3.bf16.msra.mxu0 %v9691_v0 }
  0x49   : > { %v12791_v25 = vsel %vm9708_vm10, 4294967295, %v12790_v25  ;;  %v1364_v4 = vrot.slane %v1362_v2, 4  ;;  %v430_v31 = vadd.s32 144, %v9274_v3  ;;  %v9713_v32 = vld [vmem:[#allocation2 + $0x48] sm:$0xf]  ;;  %v1346_v19 = vrot.slane %v1345_v20, 4  ;;  %vm1167_vm14 = vmpackc.low %vm1071_vm12, %vm1071_vm12 }
  0x4a   : > { %979 = vst.msk [vmem:[#allocation2 + $0x58] sm:$0xf] %vm12715_vm1, %v12722_v17  ;;  %980 = vst.msk [vmem:[#allocation2 + $0x5c] sm:$0xf] %vm12715_vm1, %v12722_v17  ;;  %v1361_v34 = vsel %vm9374_vm13, %v9388_v54, %v1360_v28  ;;  %v852_v39 = vld [vmem:[%s9283_s28 + $0x60] sm:$0xf]  ;;  %v7432_v61 = vcombine.low %v9685_v63, %v9713_v32 }
  0x4b   : > { %884 = vst.msk [vmem:[#allocation2 + $0x60] sm:$0xf] %vm12713_vm0, %v851_v30  ;;  %v1199_v51 = vsel %vm1167_vm14, 65537, %v12722_v17  ;;  %v1365_v52 = vor.u32 %v1364_v4, %v1360_v28  ;;  %v574_v57 = vand.u32 15, %v430_v31  ;;  %885 = vst.msk [vmem:[#allocation2 + $0x64] sm:$0xf] %vm12713_vm0, %v852_v39  ;;  %v1351_v1 = vsel %vm9374_vm13, %v1346_v19, %v9355_v36 }
  0x4c   : > { %981 = vst.msk [vmem:[#allocation2 + $0x60] sm:$0xf] %vm12715_vm1, %v12722_v17  ;;  %v1581_v62 = vsel %vm9708_vm10, %v9582_v35, 0  ;;  %v1378_v2 = vshll.u32 %v1199_v51, 16  ;;  %v1382_v7 = vshrl.u32 %v1199_v51, 16  ;;  %v8761_v23 = vld [vmem:[%s12702_s2 + $0x38] sm:$0xff]   ;;  %v9768_v31 = vcombine.low %v1576_v29, %v1577_v60  ;;  %8023 = vmatprep.mubr.bf16.mxu0 %v7432_v61 }
  0x4d   : > { %982 = vst.msk [vmem:[#allocation2 + $0x64] sm:$0xf] %vm12715_vm1, %v12722_v17  ;;  %vm9748_vm4 = vcmp.ne.s16.totalorder %v1361_v34, 0  ;;  %v1366_v13 = vrot.slane %v1365_v52, 4  ;;  %vm9752_vm7 = vcmp.ge.s32.totalorder %v574_v57, 1  ;;  %v432_v28 = vadd.s32 160, %v9274_v3  ;;  %8053 = vmatprep.subr.bf16.mxu0 %v8761_v23 }
  0x4e   : > { %v9757_v30 = vld [vmem:[#allocation2 + $0x4c] sm:$0xf]  ;;  %v853_v4 = vld [vmem:[%s9283_s28 + $0x64] sm:$0xf]  ;;  %vm9770_vm12 = vcmp.ne.s16.totalorder %v1351_v1, 0  ;;  %v1380_v34 = vrot.slane %v1378_v2, 5  ;;  %vm1169_vm14 = vmpackc.low %vm9752_vm7, %vm9752_vm7  ;;  %v9789_v29 = vcombine.low %v1578_v42, %v1579_v16  ;;  %8054 = vmatpush3.bf16.msra.mxu0 %v8761_v23 }
  0x4f   : > { %v1384_v39 = vrot.slane %v1382_v7, 4  ;;  %v9777_v43 = vld [vmem:[#allocation2 + $0x50] sm:$0xf]  ;;  %886 = vst.msk [vmem:[#allocation2 + $0x68] sm:$0xf] %vm12713_vm0, %v853_v4  ;;  %v1371_v60 = vsel %vm9374_vm13, %v1366_v13, %v9355_v36  ;;  %v1201_v41 = vsel %vm1169_vm14, 65537, %v12722_v17  ;;  %8087 = vmatprep.subr.bf16.mxu0 %v9783_v38 }
  0x50   : > { %v588_v51 = vand.u32 15, %v432_v28  ;;  %983 = vst.msk [vmem:[#allocation2 + $0x68] sm:$0xf] %vm12715_vm1, %v12722_v17  ;;  %v854_v52 = vld [vmem:[%s9283_s28 + $0x68] sm:$0xf]  ;;  %v1381_v42 = vsel %vm9374_vm13, %v9388_v54, %v1380_v34  ;;  %v1398_v1 = vshll.u32 %v1201_v41, 16 }
  0x51   : > { %v855_v57 = vld [vmem:[%s9283_s28 + $0x6c] sm:$0xf]  ;;  %v1385_v16 = vor.u32 %v1384_v39, %v1380_v34  ;;  %v9806_v2 = vld [vmem:[#allocation2 + $0x54] sm:$0xf]  ;;  %v9808_v61 = vld [vmem:[#allocation2 + $0x58] sm:$0xf]  ;;  %v7433_v34 = vcombine.low %v9757_v30, %v9777_v43 }
  0x52   : > { %887 = vst.msk [vmem:[#allocation2 + $0x6c] sm:$0xf] %vm12713_vm0, %v854_v52  ;;  %888 = vst.msk [vmem:[#allocation2 + $0x70] sm:$0xf] %vm12713_vm0, %v855_v57  ;;  %vm9815_vm7 = vcmp.ne.s16.totalorder %v1371_v60, 0  ;;  %v12798_v7 = vmov 0 }
  0x53   : > { %v12799_v7 = vsel %vm9815_vm7, 4294967295, %v12798_v7  ;;  %v1402_v13 = vshrl.u32 %v1201_v41, 16  ;;  %vm1075_vm14 = vcmp.ge.s32.totalorder %v588_v51, 1  ;;  %984 = vst.msk [vmem:[#allocation2 + $0x6c] sm:$0xf] %vm12715_vm1, %v12722_v17  ;;  %vm9823_vm8 = vcmp.ne.s16.totalorder %v1381_v42, 0  ;;  %8024 = vmatmul.mubr.bf16.gmra.mrb[16].mxu0 %v7433_v34 }
  0x54   : > { %12800 = vst [vmem:[#allocation9_spill] sm:$0xff] %v12799_v7  ;;  %985 = vst.msk [vmem:[#allocation2 + $0x70] sm:$0xf] %vm12715_vm1, %v12722_v17  ;;  %v1386_v28 = vrot.slane %v1385_v16, 4  ;;  %v1400_v4 = vrot.slane %v1398_v1, 5  ;;  %v434_v41 = vadd.s32 176, %v9274_v3  ;;  %v7434_v51 = vcombine.low %v9806_v2, %v9808_v61 }
  0x55   : > { %vm1171_vm0 = vmpackc.low %vm1075_vm14, %vm1075_vm14  ;;  %v1404_v60 = vrot.slane %v1402_v13, 4  ;;  %v856_v1 = vld [vmem:[%s9283_s28 + $0x70] sm:$0xf]  ;;  %v12803_v27 = vmov 0  ;;  %v857_v6 = vld [vmem:[%s9283_s28 + $0x74] sm:$0xf] }
  0x56   : > { %v1203_v39 = vsel %vm1171_vm0, 65537, %v12722_v17  ;;  %v1391_v52 = vsel %vm9374_vm13, %v1386_v28, %v9355_v36  ;;  %v1401_v57 = vsel %vm9374_vm13, %v9388_v54, %v1400_v4  ;;  %v602_v49 = vand.u32 15, %v434_v41  ;;  %v9848_v28 = vld [vmem:[#allocation2 + $0x5c] sm:$0xf]  ;;  %v9859_v58 = vld [vmem:[#allocation2 + $0x60] sm:$0xf]  ;;  %8027 = vmatprep.mubr.bf16.mxu0 %v7434_v51 }
  0x57   : > { %v1418_v42 = vshll.u32 %v1203_v39, 16  ;;  %v1422_v16 = vshrl.u32 %v1203_v39, 16  ;;  %vm9844_vm0 = vcmp.ne.s16.totalorder %v1391_v52, 0  ;;  %v1405_v23 = vor.u32 %v1404_v60, %v1400_v4  ;;  %v9892_v51 = vld [vmem:[#allocation2 + $0x64] sm:$0xf] }
  0x58   : > { %v12804_v27 = vsel %vm9844_vm0, 4294967295, %v12803_v27  ;;  %vm12805_vm14 = vcmask 60416   ;;  %vm9855_vm1 = vcmp.ne.s16.totalorder %v1401_v57, 0  ;;  %v12806_v0 = vmov 0  ;;  %v858_v57 = vld [vmem:[%s9283_s28 + $0x78] sm:$0xf] }
  0x59   : > { %889 = vst.msk [vmem:[#allocation2 + $0x74] sm:$0xf] %vm12805_vm14, %v856_v1  ;;  %v12807_v0 = vsel %vm9855_vm1, 4294967295, %v12806_v0  ;;  %v1420_v52 = vrot.slane %v1418_v42, 5  ;;  %v1424_v13 = vrot.slane %v1422_v16, 4  ;;  %vm12809_vm2 = vmmov %vm12805_vm14  ;;  %vm12810_vm15 = vcmask 1043520  }
  0x5a   : > { %12808 = vst [vmem:[#allocation10_spill] sm:$0xff] %v12807_v0  ;;  %890 = vst.msk [vmem:[#allocation2 + $0x78] sm:$0xf] %vm12809_vm2, %v857_v6  ;;  %v12811_v4 = vsel %vm9637_vm3, %v9534_v11, 0  ;;  %v1406_v41 = vrot.slane %v1405_v23, 4  ;;  %vm9874_vm14 = vcmp.ge.s32.totalorder %v602_v49, 1 }
  0x5b   : > { %986 = vst.msk [vmem:[#allocation2 + $0x74] sm:$0xf] %vm12810_vm15, %v12722_v17  ;;  %v9872_v60 = vcombine.low %v12811_v4, %v1581_v62  ;;  %v436_v6 = vadd.s32 192, %v9274_v3  ;;  %987 = vst.msk [vmem:[#allocation2 + $0x78] sm:$0xf] %vm12810_vm15, %v12722_v17  ;;  %v1421_v11 = vsel %vm9374_vm13, %v9388_v54, %v1420_v52  ;;  %v1425_v62 = vor.u32 %v1424_v13, %v1420_v52 }
  0x5c   : > { %vm1173_vm2 = vmpackc.low %vm9874_vm14, %vm9874_vm14  ;;  %v438_v49 = vadd.s32 208, %v9274_v3  ;;  %v9894_v42 = vld [vmem:[#allocation2 + $0x68] sm:$0xf]  ;;  %vm12814_vm15 = vcmask 60416   ;;  %v1411_v16 = vsel %vm9374_vm13, %v1406_v41, %v9355_v36  ;;  %vm9900_vm10 = vcmp.ne.s16.totalorder %v1421_v11, 0 }
  0x5d   : > { %891 = vst.msk [vmem:[#allocation2 + $0x7c] sm:$0xf] %vm12814_vm15, %v858_v57  ;;  %v12815_v1 = vmov 0  ;;  %v1205_v23 = vsel %vm1173_vm2, 65537, %v12722_v17  ;;  %v616_v4 = vand.u32 15, %v436_v6  ;;  %vm12818_vm14 = vcmask 1043520  }
  0x5e   : > { %v12816_v1 = vsel %vm9900_vm10, 4294967295, %v12815_v1  ;;  %v859_v13 = vld [vmem:[%s9283_s28 + $0x7c] sm:$0xf]  ;;  %988 = vst.msk [vmem:[#allocation2 + $0x7c] sm:$0xf] %vm12818_vm14, %v12722_v17  ;;  %v1588_v52 = vsel %vm9855_vm1, %v9713_v32, 0  ;;  %v7435_v41 = vcombine.low %v9848_v28, %v9859_v58 }
  0x5f   : > { %12817 = vst [vmem:[#allocation11_spill] sm:$0xff] %v12816_v1  ;;  %v1426_v34 = vrot.slane %v1425_v62, 4  ;;  %v1438_v57 = vshll.u32 %v1205_v23, 16  ;;  %892 = vst.msk [vmem:[#allocation2 + $0x80] sm:$0xf] %vm12814_vm15, %v859_v13  ;;  %vm9914_vm3 = vcmp.ne.s16.totalorder %v1411_v16, 0  ;;  %v7436_v16 = vcombine.low %v9892_v51, %v9894_v42 }
  0x60   : > { %v12819_v11 = vmov 0  ;;  %v1442_v6 = vshrl.u32 %v1205_v23, 16  ;;  %vm1079_vm2 = vcmp.ge.s32.totalorder %v616_v4, 1  ;;  %v630_v39 = vand.u32 15, %v438_v49  ;;  %989 = vst.msk [vmem:[#allocation2 + $0x80] sm:$0xf] %vm12818_vm14, %v12722_v17  ;;  %8028 = vmatmul.mubr.bf16.gmra.mrb[20].mxu0 %v7435_v41 }
  0x61   : > { %v12820_v11 = vsel %vm9914_vm3, 4294967295, %v12819_v11  ;;  %v1590_v32 = vsel %vm9900_vm10, %v9777_v43, 0  ;;  %v1431_v62 = vsel %vm9374_vm13, %v1426_v34, %v9355_v36  ;;  %v1440_v35 = vrot.slane %v1438_v57, 5  ;;  %vm1175_vm15 = vmpackc.low %vm1079_vm2, %vm1079_vm2  ;;  %v9933_v13 = vld [vmem:[#allocation2 + $0x6c] sm:$0xf]  ;;  %8031 = vmatprep.mubr.bf16.mxu0 %v7436_v16 }
  0x62   : > { %12821 = vst [vmem:[#allocation12_spill] sm:$0xff] %v12820_v11  ;;  %vm9928_vm1 = vcmp.ne.s16.totalorder %v1431_v62, 0  ;;  %v12822_v23 = vmov 0  ;;  %v1207_v49 = vsel %vm1175_vm15, 65537, %v12722_v17  ;;  %v1444_v4 = vrot.slane %v1442_v6, 4 }
  0x63   : > { %v12823_v23 = vsel %vm9928_vm1, 4294967295, %v12822_v23  ;;  %vm1081_vm14 = vcmp.ge.s32.totalorder %v630_v39, 1  ;;  %v1589_v43 = vsel %vm9914_vm3, %v9757_v30, 0  ;;  %v1441_v34 = vsel %vm9374_vm13, %v9388_v54, %v1440_v35  ;;  %v9941_v62 = vld [vmem:[#allocation2 + $0x70] sm:$0xf] }
  0x64   : > { %12824 = vst [vmem:[#allocation13_spill] sm:$0xff] %v12823_v23  ;;  %v1458_v57 = vshll.u32 %v1207_v49, 16  ;;  %v1462_v21 = vshrl.u32 %v1207_v49, 16  ;;  %vm1177_vm2 = vmpackc.low %vm1081_vm14, %vm1081_vm14  ;;  %v12825_v39 = vsel %vm9770_vm12, %v9617_v9, 0  ;;  %v12826_v6 = vsel %vm9681_vm9, %v9597_v56, 0 }
  0x65   : > { %v9951_v17 = vcombine.low %v12826_v6, %v12825_v39  ;;  %v1591_v30 = vsel %vm9928_vm1, %v9806_v2, 0  ;;  %v1445_v18 = vor.u32 %v1444_v4, %v1440_v35  ;;  %v12827_v49 = vmov 0   ;;  %v9975_v23 = vld [vmem:[#allocation2 + $0x74] sm:$0xf]  ;;  %v8923_v26 = vld [vmem:[%s12707_s7 + $0xe4] ss:$8 sps:$4 sm:$0xff]  }
  0x66   : > { %v1209_v41 = vsel %vm1177_vm2, 65537, %v12827_v49  ;;  %vm9957_vm15 = vcmp.ne.s16.totalorder %v1441_v34, 0  ;;  %v12828_v1 = vmov 0  ;;  %v1460_v11 = vrot.slane %v1458_v57, 5  ;;  %v8918_v48 = vld [vmem:[%s12707_s7 + $0xd4] ss:$8 sps:$4 sm:$0xff]  }
  0x67   : > { %v12829_v1 = vsel %vm9957_vm15, 4294967295, %v12828_v1  ;;  %v1464_v9 = vrot.slane %v1462_v21, 4  ;;  %v1478_v0 = vshll.u32 %v1209_v41, 16  ;;  %v12830_v56 = vsel %vm9815_vm7, %v9671_v53, 0  ;;  %v9977_v53 = vld [vmem:[#allocation2 + $0x78] sm:$0xf] }
  0x68   : > { %v12831_v39 = vsel %vm9748_vm4, %v9619_v10, 0  ;;  %v1446_v35 = vrot.slane %v1445_v18, 4  ;;  %v1482_v4 = vshrl.u32 %v1209_v41, 16  ;;  %v440_v16 = vadd.s32 224, %v9274_v3  ;;  %v8928_v14 = vld [vmem:[%s12707_s7 + $0xf4] ss:$8 sps:$4 sm:$0xff]  }
  0x69   : > { %v9969_v2 = vcombine.low %v12831_v39, %v12830_v56  ;;  %v1465_v34 = vor.u32 %v1464_v9, %v1460_v11  ;;  %v1480_v6 = vrot.slane %v1478_v0, 5  ;;  %v7437_v21 = vcombine.low %v9933_v13, %v9941_v62 }
  0x6a   : > { %v442_v57 = vadd.s32 240, %v9274_v3  ;;  %v1451_v10 = vsel %vm9374_vm13, %v1446_v35, %v9355_v36  ;;  %v1461_v18 = vsel %vm9374_vm13, %v9388_v54, %v1460_v11  ;;  %v644_v41 = vand.u32 15, %v440_v16 }
  0x6b   : > { %v1484_v9 = vrot.slane %v1482_v4, 4  ;;  %v12832_v0 = vsel %vm9844_vm0, %v9685_v63, 0  ;;  %v12833_v56 = vsel %vm9823_vm8, %v9673_v55, 0  ;;  %v1592_v35 = vsel %vm9957_vm15, %v9808_v61, 0  ;;  %v10002_v4 = vld [vmem:[#allocation2 + $0x7c] sm:$0xf]  ;;  %8032 = vmatmul.mubr.bf16.gmra.mrb[24].mxu0 %v7437_v21 }
  0x6c   : > { %v9993_v39 = vcombine.low %v12833_v56, %v12832_v0  ;;  %vm9998_vm14 = vcmp.ne.s16.totalorder %v1451_v10, 0  ;;  %v12834_v7 = vmov 0  ;;  %v1466_v11 = vrot.slane %v1465_v34, 4  ;;  %v1054_v0 = vld [vmem:[#allocation2 + $0x80] sm:$0xf] }
  0x6d   : > { %v12835_v7 = vsel %vm9998_vm14, 4294967295, %v12834_v7  ;;  %v10004_v16 = vcombine.low %v1588_v52, %v1589_v43  ;;  %v1481_v63 = vsel %vm9374_vm13, %v9388_v54, %v1480_v6  ;;  %vm1083_vm2 = vcmp.ge.s32.totalorder %v644_v41, 1 }
  0x6e   : > { %v1485_v55 = vor.u32 %v1484_v9, %v1480_v6  ;;  %v10009_v56 = vcombine.low %v1590_v32, %v1591_v30  ;;  %vm10011_vm1 = vcmp.ne.s16.totalorder %v1461_v18, 0  ;;  %v1471_v34 = vsel %vm9374_vm13, %v1466_v11, %v9355_v36  ;;  %vm1179_vm15 = vmpackc.low %vm1083_vm2, %vm1083_vm2 }
  0x6f   : > { %v658_v52 = vand.u32 15, %v442_v57  ;;  %v1593_v43 = vsel %vm9998_vm14, %v9848_v28, 0  ;;  %v1211_v6 = vsel %vm1179_vm15, 65537, %v12827_v49  ;;  %v7438_v32 = vcombine.low %v9975_v23, %v9977_v53 }
  0x70   : > { %v1486_v10 = vrot.slane %v1485_v55, 4  ;;  %vm10024_vm10 = vcmp.ne.s16.totalorder %v1481_v63, 0  ;;  %v12838_v30 = vmov 0  ;;  %v1498_v18 = vshll.u32 %v1211_v6, 16 }
  0x71   : > { %v12839_v30 = vsel %vm10024_vm10, 4294967295, %v12838_v30  ;;  %v1502_v41 = vshrl.u32 %v1211_v6, 16  ;;  %vm1085_vm3 = vcmp.ge.s32.totalorder %v658_v52, 1  ;;  %vm10028_vm2 = vcmp.ne.s16.totalorder %v1471_v34, 0  ;;  %8035 = vmatprep.mubr.bf16.mxu0 %v7438_v32 }
  0x72   : > { %12840 = vst [vmem:[#allocation14_spill] sm:$0xff] %v12839_v30  ;;  %v12841_v21 = vmov 0  ;;  %v1491_v28 = vsel %vm9374_vm13, %v1486_v10, %v9355_v36  ;;  %vm1181_vm15 = vmpackc.low %vm1085_vm3, %vm1085_vm3  ;;  %vm12737_vm14 = vcmp.ne.s16.totalorder %v9388_v54, 0  ;;  %v7439_v57 = vcombine.low %v10002_v4, %v1054_v0 }
  0x73   : > { %v12842_v21 = vsel %vm10028_vm2, 4294967295, %v12841_v21  ;;  %v1500_v9 = vrot.slane %v1498_v18, 5  ;;  %vm10037_vm0 = vcmp.ne.s16.totalorder %v1491_v28, 0  ;;  %v12843_v11 = vmov 0 }
  0x74   : > { %v12844_v11 = vsel %vm10037_vm0, 4294967295, %v12843_v11  ;;  %v1213_v63 = vsel %vm1181_vm15, 65537, %v12827_v49  ;;  %v1504_v55 = vrot.slane %v1502_v41, 4  ;;  %v1594_v34 = vsel %vm10011_vm1, %v9859_v58, 0  ;;  %8036 = vmatmul.mubr.bf16.gmra.mrb[28].mxu0 %v7439_v57 }
  0x75   : > { %v1518_v52 = vshll.u32 %v1213_v63, 16  ;;  %v1522_v6 = vshrl.u32 %v1213_v63, 16  ;;  %v1602_v10 = vsel %vm12737_vm14, %v1054_v0, 0  ;;  %v10047_v32 = vcombine.low %v1592_v35, %v1593_v43 }
  0x76   : > { %v1596_v18 = vsel %vm10024_vm10, %v9894_v42, 0  ;;  %v1501_v28 = vsel %vm9374_vm13, %v9388_v54, %v1500_v9  ;;  %v1505_v41 = vor.u32 %v1504_v55, %v1500_v9  ;;  %v1595_v58 = vsel %vm10028_vm2, %v9892_v51, 0 }
  0x77   : > { %v1597_v63 = vsel %vm10037_vm0, %v9933_v13, 0  ;;  %v1520_v0 = vrot.slane %v1518_v52, 5  ;;  %v1524_v35 = vrot.slane %v1522_v6, 4  ;;  %vm10061_vm3 = vcmp.ne.s16.totalorder %v1501_v28, 0 }
  0x78   : > { %v12845_v43 = vmov 0  ;;  %v1506_v42 = vrot.slane %v1505_v41, 4  ;;  %v10065_v30 = vcombine.low %v1602_v10, %v1602_v10  ;;  %vm12743_vm15 = vsmask.f32 4352 }
  0x79   : > { %v12846_v43 = vsel %vm10061_vm3, 4294967295, %v12845_v43  ;;  %v1521_v9 = vsel %vm9374_vm13, %v9388_v54, %v1520_v0  ;;  %v1525_v51 = vor.u32 %v1524_v35, %v1520_v0  ;;  %v2032_v55 = vor.u32 %v9488_v44, %v9478_v40  ;;  %v8763_v35 = vld [vmem:[%s12702_s2 + $0x88] sm:$0xff]  }
  0x7a   : > { %v2040_v13 = vor.u32 %v9492_v46, %v9490_v45  ;;  %v10074_v52 = vcombine.low %v1594_v34, %v1595_v58  ;;  %v10076_v6 = vcombine.low %v1596_v18, %v1597_v63  ;;  %v2049_v57 = vor.u32 %v9647_v33, %v9613_v5 }
  0x7b   : > { %v2052_v10 = vshrl.u32 %v9768_v31, 16  ;;  %v1598_v28 = vsel %vm10061_vm3, %v9941_v62, 0  ;;  %v1511_v40 = vsel %vm9374_vm13, %v1506_v42, %v9355_v36  ;;  %v1526_v44 = vrot.slane %v1525_v51, 4 }
  0x7c   : > { %v2041_v45 = vsel %vm12743_vm15, %v2032_v55, %v2040_v13  ;;  %vm10088_vm14 = vcmp.ne.s16.totalorder %v1521_v9, 0  ;;  %v12847_v46 = vmov 0  ;;  %v2055_v33 = vshll.u32 %v9768_v31, 16 }
  0x7d   : > { %v12848_v46 = vsel %vm10088_vm14, 4294967295, %v12847_v46  ;;  %8055 = vmatprep.mubr.bf16.mxu0 %v2041_v45  ;;  %v2054_v5 = vrot.slane %v2052_v10, 3  ;;  %v1531_v62 = vsel %vm9374_vm13, %v1526_v44, %v9355_v36  ;;  %v2050_v18 = vsel %vm12743_vm15, %v2040_v13, %v2049_v57 }
  0x7e   : > { %v2061_v41 = vshrl.u32 %v9789_v29, 16  ;;  %v2064_v58 = vshll.u32 %v9789_v29, 16  ;;  %vm10100_vm3 = vcmp.ne.s16.totalorder %v1511_v40, 0  ;;  %v12849_v63 = vmov 0  ;;  %8056 = vmatmul.mubr.bf16.vlgmr.msra.gmra.mrb[0].mxu0 %v2050_v18 }
  0x7f   : > { %v12850_v63 = vsel %vm10100_vm3, 4294967295, %v12849_v63  ;;  %v2057_v0 = vrot.slane %v2055_v33, 4  ;;  %v2070_v31 = vshrl.u32 %v9872_v60, 16  ;;  %v2073_v47 = vshll.u32 %v9872_v60, 16  ;;  %8088 = vmatpush3.bf16.msra.mxu0 %v9783_v38 }
  0x80   : > { %v1600_v36 = vsel %vm10088_vm14, %v9977_v53, 0  ;;  %v2063_v42 = vrot.slane %v2061_v41, 3  ;;  %v2066_v9 = vrot.slane %v2064_v58, 4  ;;  %v2079_v29 = vshrl.u32 %v9951_v17, 16  ;;  %8089 = vmatprep.subr.bf16.mxu0 %v8763_v35 }
  0x81   : > { %vm10113_vm13 = vcmp.ne.s16.totalorder %v1531_v62, 0  ;;  %v12851_v51 = vmov 0  ;;  %v2058_v55 = vor.u32 %v2057_v0, %v2054_v5  ;;  %v2072_v13 = vrot.slane %v2070_v31, 3  ;;  %v8764_v5 = vld [vmem:[%s12702_s2 + $0x90] sm:$0xff]  }
  0x82   : > { %v12852_v51 = vsel %vm10113_vm13, 4294967295, %v12851_v51  ;;  %v2075_v10 = vrot.slane %v2073_v47, 4  ;;  %v1599_v60 = vsel %vm10100_vm3, %v9975_v23, 0  ;;  %v2067_v40 = vor.u32 %v2066_v9, %v2063_v42 }
  0x83   : > { %12853 = vst [vmem:[#allocation15_spill] sm:$0xff] %v12852_v51  ;;  %v2082_v53 = vshll.u32 %v9951_v17, 16  ;;  %v2088_v44 = vshrl.u32 %v9969_v2, 16  ;;  %v2059_v45 = vsel %vm12743_vm15, %v2049_v57, %v2058_v55  ;;  %v2091_v62 = vshll.u32 %v9969_v2, 16  ;;  %8090 = vmatpush3.bf16.msra.mxu0 %v8763_v35 }
  0x84   : > { %v2076_v33 = vor.u32 %v2075_v10, %v2072_v13  ;;  %v2097_v18 = vshrl.u32 %v9993_v39, 16  ;;  %v1601_v38 = vsel %vm10113_vm13, %v10002_v4, 0  ;;  %8059 = vmatprep.mubr.bf16.mxu0 %v2059_v45  ;;  %v2081_v17 = vrot.slane %v2079_v29, 3  ;;  %8091 = vmatprep.subr.bf16.mxu0 %v8764_v5 }
  0x85   : > { %v2084_v23 = vrot.slane %v2082_v53, 4  ;;  %v2100_v41 = vshll.u32 %v9993_v39, 16  ;;  %v2068_v57 = vsel %vm12743_vm15, %v2058_v55, %v2067_v40  ;;  %v2090_v58 = vrot.slane %v2088_v44, 3  ;;  %v8765_v39 = vld [vmem:[%s12702_s2 + $0x98] sm:$0xff]  }
  0x86   : > { %v2093_v0 = vrot.slane %v2091_v62, 4  ;;  %v2106_v31 = vshrl.u32 %v10004_v16, 16  ;;  %v2099_v47 = vrot.slane %v2097_v18, 3  ;;  %v2109_v42 = vshll.u32 %v10004_v16, 16  ;;  %8060 = vmatmul.mubr.bf16.gmra.mrb[4].mxu0 %v2068_v57 }
  0x87   : > { %v2102_v2 = vrot.slane %v2100_v41, 4  ;;  %v2115_v9 = vshrl.u32 %v10009_v56, 16  ;;  %v2077_v4 = vsel %vm12743_vm15, %v2067_v40, %v2076_v33  ;;  %v2118_v55 = vshll.u32 %v10009_v56, 16  ;;  %8092 = vmatpush3.bf16.msra.mxu0 %v8764_v5 }
  0x88   : > { %v2108_v29 = vrot.slane %v2106_v31, 3  ;;  %v2124_v13 = vshrl.u32 %v10047_v32, 16  ;;  %v7462_v10 = vcombine.low %v1598_v28, %v1599_v60  ;;  %v7463_v35 = vcombine.low %v1600_v36, %v1601_v38  ;;  %8063 = vmatprep.mubr.bf16.mxu0 %v2077_v4  ;;  %8093 = vmatprep.subr.bf16.mxu0 %v8765_v39  ;;  %v8766_v28 = vld [vmem:[%s12702_s2 + $0xa0] sm:$0xff]  }
  0x89   : > { %v2085_v53 = vor.u32 %v2084_v23, %v2081_v17  ;;  %v2111_v44 = vrot.slane %v2109_v42, 4  ;;  %v2094_v16 = vor.u32 %v2093_v0, %v2090_v58  ;;  %v2117_v45 = vrot.slane %v2115_v9, 3 }
  0x8a   : > { %v2120_v62 = vrot.slane %v2118_v55, 4  ;;  %v2127_v40 = vshll.u32 %v10047_v32, 16  ;;  %v2103_v18 = vor.u32 %v2102_v2, %v2099_v47  ;;  %v2126_v41 = vrot.slane %v2124_v13, 3 }
  0x8b   : > { %v2133_v31 = vshrl.u32 %v10074_v52, 16  ;;  %v2136_v56 = vshll.u32 %v10074_v52, 16  ;;  %v2112_v34 = vor.u32 %v2111_v44, %v2108_v29  ;;  %v2142_v60 = vshrl.u32 %v10076_v6, 16  ;;  %v8767_v52 = vld [vmem:[%s12702_s2 + $0xa8] sm:$0xff]   ;;  %8094 = vmatpush3.bf16.msra.mxu0 %v8765_v39 }
  0x8c   : > { %v2129_v36 = vrot.slane %v2127_v40, 4  ;;  %v2145_v38 = vshll.u32 %v10076_v6, 16  ;;  %v2172_v32 = vshll.u32 %v10065_v30, 16  ;;  %v2151_v23 = vshrl.u32 %v7462_v10, 16  ;;  %8095 = vmatprep.subr.bf16.mxu0 %v8766_v28 }
  0x8d   : > { %v2135_v5 = vrot.slane %v2133_v31, 3  ;;  %v2138_v17 = vrot.slane %v2136_v56, 4  ;;  %v2086_v57 = vsel %vm12743_vm15, %v2076_v33, %v2085_v53  ;;  %v2121_v58 = vor.u32 %v2120_v62, %v2117_v45  ;;  %v2402_v56 = vld [vmem:[#allocation2 + $0x4] sm:$0xf] }
  0x8e   : > { %v2144_v0 = vrot.slane %v2142_v60, 3  ;;  %v2147_v47 = vrot.slane %v2145_v38, 4  ;;  %v2130_v2 = vor.u32 %v2129_v36, %v2126_v41  ;;  %v2154_v9 = vshll.u32 %v7462_v10, 16  ;;  %8064 = vmatmul.mubr.bf16.gmra.mrb[8].mxu0 %v2086_v57  ;;  %v8768_v10 = vld [vmem:[%s12702_s2 + $0xb0] sm:$0xff]  }
  0x8f   : > { %v2139_v42 = vor.u32 %v2138_v17, %v2135_v5  ;;  %v2160_v4 = vshrl.u32 %v7463_v35, 16  ;;  %v2095_v6 = vsel %vm12743_vm15, %v2085_v53, %v2094_v16  ;;  %v2104_v29 = vsel %vm12743_vm15, %v2094_v16, %v2103_v18  ;;  %8096 = vmatpush3.bf16.msra.mxu0 %v8766_v28 }
  0x90   : > { %v2113_v55 = vsel %vm12743_vm15, %v2103_v18, %v2112_v34  ;;  %v2163_v33 = vshll.u32 %v7463_v35, 16  ;;  %v10159_v13 = vor.u32 %v2147_v47, %v2144_v0  ;;  %v2153_v44 = vrot.slane %v2151_v23, 3  ;;  %8067 = vmatprep.mubr.bf16.mxu0 %v2095_v6  ;;  %8097 = vmatprep.subr.bf16.mxu0 %v8767_v52  ;;  %v8769_v23 = vld [vmem:[%s12702_s2 + $0xb8] sm:$0xff]  }
  0x91   : > { %v2156_v45 = vrot.slane %v2154_v9, 4  ;;  %v2162_v62 = vrot.slane %v2160_v4, 3  ;;  %v10162_v39 = vsel %vm12743_vm15, %v2112_v34, %v2121_v58  ;;  %v413_v16 = vadd.s32 8, %v9274_v3 }
  0x92   : > { %v2165_v53 = vrot.slane %v2163_v33, 4  ;;  %v415_v40 = vadd.s32 24, %v9274_v3  ;;  %v10170_v35 = vsel %vm12743_vm15, %v2121_v58, %v2130_v2  ;;  %v10173_v18 = vsel %vm12743_vm15, %v2130_v2, %v2139_v42 }
  0x93   : > { %v12854_v34 = vshrl.u32 %v10065_v30, 16  ;;  %v10179_v31 = vrot.slane %v2172_v32, 4  ;;  %v455_v36 = vand.u32 15, %v413_v16  ;;  %v12855_v38 = vshll.u32 %v9341_v22, 16  ;;  %8098 = vmatpush3.bf16.msra.mxu0 %v8767_v52 }
  0x94   : > { %v469_v60 = vand.u32 15, %v415_v40  ;;  %v10188_v5 = vsel %vm12743_vm15, %v2139_v42, %v10159_v13  ;;  %v10190_v17 = vor.u32 %v2156_v45, %v2153_v44  ;;  %v417_v30 = vadd.s32 40, %v9274_v3  ;;  %8099 = vmatprep.subr.bf16.mxu0 %v8768_v10 }
  0x95   : > { %v10177_v41 = vrot.slane %v12854_v34, 3  ;;  %v10184_v28 = vor.u32 %v9438_v15, %v12855_v38  ;;  %v10193_v32 = vor.u32 %v2165_v53, %v2162_v62  ;;  %vm2436_vm13 = vcmp.lt.s32.totalorder %v455_v36, 15  ;;  %v2403_v34 = vld [vmem:[#allocation2 + $0x8] sm:$0xf] }
  0x96   : > { %vm2438_vm3 = vcmp.lt.s32.totalorder %v469_v60, 15  ;;  %v10199_v22 = vrot.slane %v9438_v15, 4  ;;  %vm2532_vm0 = vmpackc.low %vm2436_vm13, %vm2436_vm13  ;;  %v483_v57 = vand.u32 15, %v417_v30  ;;  %v419_v58 = vadd.s32 56, %v9274_v3  ;;  %8068 = vmatmul.mubr.bf16.gmra.mrb[12].mxu0 %v2104_v29 }
  0x97   : > { %vm2885_vm15 = vcmp.ne.s16.totalorder %v10184_v28, 0  ;;  %v421_v0 = vadd.s32 72, %v9274_v3  ;;  %vm2534_vm14 = vmpackc.low %vm2438_vm3, %vm2438_vm3  ;;  %v2564_v47 = vsel %vm2532_vm0, 65537, %v12827_v49  ;;  %v423_v42 = vadd.s32 88, %v9274_v3  ;;  %8071 = vmatprep.mubr.bf16.mxu0 %v2113_v55  ;;  %8100 = vmatpush3.bf16.msra.mxu0 %v8768_v10  ;;  %v2405_v55 = vld [vmem:[#allocation2 + $0x10] sm:$0xf] }
  0x98   : > { %v2918_v2 = vsel %vm2885_vm15, %v2402_v56, 0  ;;  %v10207_v9 = vadd.s32 104, %v9274_v3  ;;  %v2566_v15 = vsel %vm2534_vm14, 65537, %v12827_v49  ;;  %v2607_v52 = vshrl.u32 %v2564_v47, 16  ;;  %8101 = vmatprep.subr.bf16.mxu0 %v8769_v23  ;;  %v2404_v56 = vld [vmem:[#allocation2 + $0xc] sm:$0xf] }
  0x99   : > { %v2610_v4 = vshll.u32 %v2564_v47, 16  ;;  %vm2440_vm13 = vcmp.lt.s32.totalorder %v483_v57, 15  ;;  %v2625_v6 = vshrl.u32 %v2566_v15, 16  ;;  %v2628_v33 = vshll.u32 %v2566_v15, 16  ;;  %v2406_v47 = vld [vmem:[#allocation2 + $0x14] sm:$0xf] }
  0x9a   : > { %vm2536_vm10 = vmpackc.low %vm2440_vm13, %vm2440_vm13  ;;  %v497_v44 = vand.u32 15, %v419_v58  ;;  %v511_v45 = vand.u32 15, %v421_v0  ;;  %v2609_v62 = vrot.slane %v2607_v52, 7  ;;  %v525_v16 = vand.u32 15, %v423_v42 }
  0x9b   : > { %v2568_v53 = vsel %vm2536_vm10, 65537, %v12827_v49  ;;  %v539_v40 = vand.u32 15, %v10207_v9  ;;  %vm12856_vm0 = vsmask.f32 4368  ;;  %vm12857_vm14 = vsmask.f32 256  ;;  %8102 = vmatpush3.bf16.msra.mxu0 %v8769_v23 }
  0x9c   : > { %vm10214_vm3 = vmor %vm12857_vm14, %vm12856_vm0  ;;  %v2627_v36 = vrot.slane %v2625_v6, 7  ;;  %v2643_v60 = vshrl.u32 %v2568_v53, 16  ;;  %v2646_v38 = vshll.u32 %v2568_v53, 16  ;;  %vm2442_vm15 = vcmp.lt.s32.totalorder %v497_v44, 15  ;;  %v2407_v23 = vld [vmem:[#allocation2 + $0x18] sm:$0xf] }
  0x9d   : > { %v2612_v10 = vor.u32 %v2610_v4, %v2609_v62  ;;  %v2614_v30 = vrot.slane %v2609_v62, 4  ;;  %vm2538_vm10 = vmpackc.low %vm2442_vm15, %vm2442_vm15  ;;  %vm10218_vm13 = vcmp.lt.s32.totalorder %v511_v45, 15  ;;  %vm10222_vm2 = vcmp.lt.s32.totalorder %v525_v16, 15 }
  0x9e   : > { %v2630_v0 = vor.u32 %v2628_v33, %v2627_v36  ;;  %v2632_v42 = vrot.slane %v2627_v36, 4  ;;  %v2645_v15 = vrot.slane %v2643_v60, 7  ;;  %v2570_v52 = vsel %vm2538_vm10, 65537, %v12827_v49  ;;  %8072 = vmatmul.mubr.bf16.gmra.mrb[16].mxu0 %v10162_v39 }
  0x9f   : > { %v2613_v4 = vsel %vm10214_vm3, %v10199_v22, %v2612_v10  ;;  %v2622_v6 = vsel %vm10214_vm3, %v2614_v30, %v10184_v28  ;;  %v2661_v44 = vshrl.u32 %v2570_v52, 16  ;;  %v2664_v45 = vshll.u32 %v2570_v52, 16  ;;  %v2408_v30 = vld [vmem:[#allocation2 + $0x1c] sm:$0xf]  ;;  %8075 = vmatprep.mubr.bf16.mxu0 %v10170_v35 }
  0xa0   : > { %v2631_v33 = vsel %vm10214_vm3, %v10199_v22, %v2630_v0  ;;  %vm2886_vm14 = vcmp.ne.s16.totalorder %v2613_v4, 0  ;;  %vm2887_vm15 = vcmp.ne.s16.totalorder %v2622_v6, 0  ;;  %v2640_v62 = vsel %vm10214_vm3, %v2632_v42, %v10184_v28 }
  0xa1   : > { %vm2888_vm10 = vcmp.ne.s16.totalorder %v2631_v33, 0  ;;  %v2919_v53 = vsel %vm2886_vm14, %v2403_v34, 0  ;;  %v2920_v16 = vsel %vm2887_vm15, %v2404_v56, 0  ;;  %v2648_v36 = vor.u32 %v2646_v38, %v2645_v15  ;;  %v2409_v38 = vld [vmem:[#allocation2 + $0x20] sm:$0xf] }
  0xa2   : > { %v2921_v60 = vsel %vm2888_vm10, %v2405_v55, 0  ;;  %v7489_v10 = vcombine.low %v2918_v2, %v2919_v53  ;;  %vm2889_vm0 = vcmp.ne.s16.totalorder %v2640_v62, 0  ;;  %v2650_v52 = vrot.slane %v2645_v15, 4  ;;  %vm12864_vm10 = vmpackc.low %vm10218_vm13, %vm10218_vm13 }
  0xa3   : > { %v10244_v0 = vcombine.low %v2920_v16, %v2921_v60  ;;  %v2649_v4 = vsel %vm10214_vm3, %v10199_v22, %v2648_v36  ;;  %v2922_v42 = vsel %vm2889_vm0, %v2406_v47, 0  ;;  %v2663_v6 = vrot.slane %v2661_v44, 7  ;;  %v2410_v36 = vld [vmem:[#allocation2 + $0x24] sm:$0xf]  ;;  %vm2542_vm13 = vmpackc.low %vm10222_vm2, %vm10222_vm2 }
  0xa4   : > { %v3053_v34 = vshrl.u32 %v7489_v10, 16  ;;  %v3055_v56 = vshll.u32 %v7489_v10, 16  ;;  %vm2890_vm14 = vcmp.ne.s16.totalorder %v2649_v4, 0  ;;  %v2658_v39 = vsel %vm10214_vm3, %v2650_v52, %v10184_v28 }
  0xa5   : > { %vm3051_vm15 = vsmask.f32 7424  ;;  %v3060_v2 = vshll.u32 %v10244_v0, 16  ;;  %v3064_v35 = vshrl.u32 %v10244_v0, 16  ;;  %v2923_v55 = vsel %vm2890_vm14, %v2407_v23, 0 }
  0xa6   : > { %v2666_v15 = vor.u32 %v2664_v45, %v2663_v6  ;;  %v3057_v33 = vrot.slane %v3055_v56, 1  ;;  %v10254_v62 = vcombine.low %v2922_v42, %v2923_v55  ;;  %vm2891_vm0 = vcmp.ne.s16.totalorder %v2658_v39, 0  ;;  %8076 = vmatmul.mubr.bf16.gmra.mrb[20].mxu0 %v10173_v18  ;;  %v2411_v56 = vld [vmem:[#allocation2 + $0x28] sm:$0xf]  ;;  %v2412_v39 = vld [vmem:[#allocation2 + $0x2c] sm:$0xf] }
  0xa7   : > { %v2572_v47 = vsel %vm12864_vm10, 65537, %v12827_v49  ;;  %v3062_v44 = vrot.slane %v3060_v2, 1  ;;  %v2924_v16 = vsel %vm2891_vm0, %v2408_v30, 0  ;;  %v2668_v23 = vrot.slane %v2663_v6, 4  ;;  %8079 = vmatprep.mubr.bf16.mxu0 %v10188_v5 }
  0xa8   : > { %v2667_v53 = vsel %vm10214_vm3, %v10199_v22, %v2666_v15  ;;  %v2175_v45 = vor.u32 %v10179_v31, %v10177_v41  ;;  %v3068_v60 = vshll.u32 %v10254_v62, 16  ;;  %v3072_v10 = vshrl.u32 %v10254_v62, 16 }
  0xa9   : > { %vm2892_vm14 = vcmp.ne.s16.totalorder %v2667_v53, 0  ;;  %vm12865_vm10 = vsmask.f32 4352  ;;  %v2676_v30 = vsel %vm10214_vm3, %v2668_v23, %v10184_v28  ;;  %v2679_v0 = vshrl.u32 %v2572_v47, 16 }
  0xaa   : > { %v2158_v57 = vsel %vm12865_vm10, %v10159_v13, %v10190_v17  ;;  %v2925_v52 = vsel %vm2892_vm14, %v2409_v38, 0  ;;  %vm12866_vm0 = vmmov %vm12865_vm10  ;;  %v10282_v31 = vrot.slane %v3068_v60, 1  ;;  %v2682_v4 = vshll.u32 %v2572_v47, 16 }
  0xab   : > { %v2167_v41 = vsel %vm12866_vm0, %v10190_v17, %v10193_v32  ;;  %v10284_v58 = vcombine.low %v2924_v16, %v2925_v52  ;;  %v2681_v13 = vrot.slane %v2679_v0, 7  ;;  %vm2893_vm2 = vcmp.ne.s16.totalorder %v2676_v30, 0  ;;  %vm12867_vm10 = vmmov %vm12866_vm0  ;;  %v2414_v0 = vld [vmem:[#allocation2 + $0x34] sm:$0xf] }
  0xac   : > { %v2574_v42 = vsel %vm2542_vm13, 65537, %v12827_v49  ;;  %vm2448_vm14 = vcmp.lt.s32.totalorder %v539_v40, 15  ;;  %v10292_v18 = vsel %vm12867_vm10, %v10193_v32, %v2175_v45  ;;  %v3058_v6 = vor.u32 %v3057_v33, %v3053_v34  ;;  %v2413_v45 = vld [vmem:[#allocation2 + $0x30] sm:$0xf] }
  0xad   : > { %v3076_v17 = vshll.u32 %v10284_v58, 16  ;;  %v2926_v38 = vsel %vm2893_vm2, %v2410_v36, 0  ;;  %vm2544_vm0 = vmpackc.low %vm2448_vm14, %vm2448_vm14  ;;  %v2684_v2 = vor.u32 %v2682_v4, %v2681_v13  ;;  %v3080_v5 = vshrl.u32 %v10284_v58, 16 }
  0xae   : > { %v2686_v55 = vrot.slane %v2681_v13, 4  ;;  %v2697_v15 = vshrl.u32 %v2574_v42, 16  ;;  %v2700_v9 = vshll.u32 %v2574_v42, 16  ;;  %v2576_v40 = vsel %vm2544_vm0, 65537, %v12827_v49  ;;  %8080 = vmatmul.mubr.bf16.gmra.mrb[24].mxu0 %v2158_v57 }
  0xaf   : > { %v10296_v47 = vrot.slane %v3076_v17, 1  ;;  %v427_v32 = vadd.s32 120, %v9274_v3  ;;  %v2685_v34 = vsel %vm10214_vm3, %v10199_v22, %v2684_v2  ;;  %v2715_v16 = vshrl.u32 %v2576_v40, 16  ;;  %8083 = vmatprep.mubr.bf16.mxu0 %v2167_v41 }
  0xb0   : > { %v2694_v33 = vsel %vm10214_vm3, %v2686_v55, %v10184_v28  ;;  %v2699_v53 = vrot.slane %v2697_v15, 7  ;;  %v3063_v36 = vsel %vm3051_vm15, %v3058_v6, %v3062_v44  ;;  %v3066_v23 = vor.u32 %v3064_v35, %v3062_v44  ;;  %v2415_v6 = vld [vmem:[#allocation2 + $0x38] sm:$0xf] }
  0xb1   : > { %vm2894_vm13 = vcmp.ne.s16.totalorder %v2685_v34, 0  ;;  %vm2895_vm2 = vcmp.ne.s16.totalorder %v2694_v33, 0  ;;  %v2717_v13 = vrot.slane %v2715_v16, 7  ;;  %v2718_v42 = vshll.u32 %v2576_v40, 16 }
  0xb2   : > { %v2927_v60 = vsel %vm2894_vm13, %v2411_v56, 0  ;;  %v2702_v52 = vor.u32 %v2700_v9, %v2699_v53  ;;  %v2928_v30 = vsel %vm2895_vm2, %v2412_v39, 0  ;;  %v2704_v58 = vrot.slane %v2699_v53, 4 }
  0xb3   : > { %v7493_v4 = vcombine.low %v2926_v38, %v2927_v60  ;;  %v553_v17 = vand.u32 15, %v427_v32  ;;  %v429_v44 = vadd.s32 136, %v9274_v3  ;;  %v431_v56 = vadd.s32 152, %v9274_v3 }
  0xb4   : > { %v2703_v2 = vsel %vm10214_vm3, %v10199_v22, %v2702_v52  ;;  %v2712_v35 = vsel %vm10214_vm3, %v2704_v58, %v10184_v28  ;;  %v2720_v38 = vor.u32 %v2718_v42, %v2717_v13  ;;  %v2722_v41 = vrot.slane %v2717_v13, 4 }
  0xb5   : > { %v3084_v39 = vshll.u32 %v7493_v4, 16  ;;  %vm2896_vm14 = vcmp.ne.s16.totalorder %v2703_v2, 0  ;;  %v3088_v57 = vshrl.u32 %v7493_v4, 16  ;;  %vm2897_vm10 = vcmp.ne.s16.totalorder %v2712_v35, 0 }
  0xb6   : > { %v2929_v55 = vsel %vm2896_vm14, %v2413_v45, 0  ;;  %vm2450_vm0 = vcmp.lt.s32.totalorder %v553_v17, 15  ;;  %v2721_v40 = vsel %vm10214_vm3, %v10199_v22, %v2720_v38  ;;  %v2930_v32 = vsel %vm2897_vm10, %v2414_v0, 0  ;;  %8084 = vmatmul.mubr.bf16.gmra.mrb[32].mxu0 %v10292_v18 }
  0xb7   : > { %v3086_v15 = vrot.slane %v3084_v39, 1  ;;  %v10315_v9 = vcombine.low %v2928_v30, %v2929_v55  ;;  %vm2546_vm13 = vmpackc.low %vm2450_vm0, %vm2450_vm0  ;;  %vm2898_vm2 = vcmp.ne.s16.totalorder %v2721_v40, 0  ;;  %v2730_v33 = vsel %vm10214_vm3, %v2722_v41, %v10184_v28  ;;  %v2416_v30 = vld [vmem:[#allocation2 + $0x3c] sm:$0xf]  ;;  %8103 = vmatprep.mubr.bf16.mxu0 %v3063_v36 }
  0xb8   : > { %v2578_v34 = vsel %vm2546_vm13, 65537, %v12827_v49  ;;  %v567_v53 = vand.u32 15, %v429_v44  ;;  %v3074_v16 = vor.u32 %v3072_v10, %v10282_v31  ;;  %v3082_v45 = vor.u32 %v3080_v5, %v10296_v47 }
  0xb9   : > { %v3092_v60 = vshll.u32 %v10315_v9, 16  ;;  %v2931_v52 = vsel %vm2898_vm2, %v2415_v6, 0  ;;  %v3071_v0 = vsel %vm3051_vm15, %v3066_v23, %v10282_v31  ;;  %v2733_v4 = vshrl.u32 %v2578_v34, 16  ;;  %v2417_v23 = vld [vmem:[#allocation2 + $0x40] sm:$0xf] }
  0xba   : > { %v7495_v58 = vcombine.low %v2930_v32, %v2931_v52  ;;  %v2736_v13 = vshll.u32 %v2578_v34, 16  ;;  %v3090_v42 = vor.u32 %v3088_v57, %v3086_v15  ;;  %vm2899_vm14 = vcmp.ne.s16.totalorder %v2730_v33, 0  ;;  %v2418_v57 = vld [vmem:[#allocation2 + $0x44] sm:$0xf] }
  0xbb   : > { %vm2452_vm10 = vcmp.lt.s32.totalorder %v567_v53, 15  ;;  %v581_v17 = vand.u32 15, %v431_v56  ;;  %v3094_v62 = vrot.slane %v3092_v60, 1  ;;  %v3096_v10 = vshrl.u32 %v10315_v9, 16 }
  0xbc   : > { %v3100_v5 = vshll.u32 %v7495_v58, 16  ;;  %v2735_v2 = vrot.slane %v2733_v4, 7  ;;  %vm2548_vm0 = vmpackc.low %vm2452_vm10, %vm2452_vm10  ;;  %v3079_v6 = vsel %vm3051_vm15, %v3074_v16, %v10296_v47  ;;  %v10336_v31 = vsel %vm3051_vm15, %v3082_v45, %v3086_v15  ;;  %v2419_v16 = vld [vmem:[#allocation2 + $0x48] sm:$0xf] }
  0xbd   : > { %v2580_v18 = vsel %vm2548_vm0, 65537, %v12827_v49  ;;  %vm2454_vm13 = vcmp.lt.s32.totalorder %v581_v17, 15  ;;  %v2932_v44 = vsel %vm2899_vm14, %v2416_v30, 0  ;;  %v3104_v39 = vshrl.u32 %v7495_v58, 16 }
  0xbe   : > { %v2738_v35 = vor.u32 %v2736_v13, %v2735_v2  ;;  %v2740_v56 = vrot.slane %v2735_v2, 4  ;;  %v2751_v36 = vshrl.u32 %v2580_v18, 16  ;;  %vm2550_vm2 = vmpackc.low %vm2454_vm13, %vm2454_vm13  ;;  %v2754_v38 = vshll.u32 %v2580_v18, 16  ;;  %8104 = vmatmul.mubr.bf16.vlgmr.msra.gmra.mrb[0].mxu0 %v3071_v0  ;;  %v2420_v2 = vld [vmem:[#allocation2 + $0x4c] sm:$0xf] }
  0xbf   : > { %v2582_v55 = vsel %vm2550_vm2, 65537, %v12827_v49  ;;  %v433_v41 = vadd.s32 168, %v9274_v3  ;;  %v3095_v47 = vsel %vm3051_vm15, %v3090_v42, %v3094_v62  ;;  %v435_v40 = vadd.s32 184, %v9274_v3  ;;  %8107 = vmatprep.mubr.bf16.mxu0 %v3079_v6 }
  0xc0   : > { %v2739_v15 = vsel %vm10214_vm3, %v10199_v22, %v2738_v35  ;;  %v2748_v9 = vsel %vm10214_vm3, %v2740_v56, %v10184_v28  ;;  %v2753_v32 = vrot.slane %v2751_v36, 7  ;;  %v2769_v34 = vshrl.u32 %v2582_v55, 16 }
  0xc1   : > { %vm2900_vm14 = vcmp.ne.s16.totalorder %v2739_v15, 0  ;;  %vm2901_vm10 = vcmp.ne.s16.totalorder %v2748_v9, 0  ;;  %v10349_v33 = vrot.slane %v3100_v5, 1  ;;  %v2772_v45 = vshll.u32 %v2582_v55, 16 }
  0xc2   : > { %v2933_v53 = vsel %vm2900_vm14, %v2417_v23, 0  ;;  %v595_v60 = vand.u32 15, %v433_v41  ;;  %v2756_v30 = vor.u32 %v2754_v38, %v2753_v32  ;;  %v2758_v58 = vrot.slane %v2753_v32, 4  ;;  %v2421_v23 = vld [vmem:[#allocation2 + $0x50] sm:$0xf] }
  0xc3   : > { %v7496_v52 = vcombine.low %v2932_v44, %v2933_v53  ;;  %v2771_v4 = vrot.slane %v2769_v34, 7  ;;  %v3098_v13 = vor.u32 %v3096_v10, %v3094_v62  ;;  %v3106_v42 = vor.u32 %v3104_v39, %v10349_v33 }
  0xc4   : > { %v2934_v17 = vsel %vm2901_vm10, %v2418_v57, 0  ;;  %vm2456_vm0 = vcmp.lt.s32.totalorder %v595_v60, 15  ;;  %v2757_v5 = vsel %vm10214_vm3, %v10199_v22, %v2756_v30  ;;  %v2766_v0 = vsel %vm10214_vm3, %v2758_v58, %v10184_v28 }
  0xc5   : > { %v3108_v18 = vshll.u32 %v7496_v52, 16  ;;  %vm2552_vm13 = vmpackc.low %vm2456_vm0, %vm2456_vm0  ;;  %v609_v35 = vand.u32 15, %v435_v40  ;;  %vm2902_vm2 = vcmp.ne.s16.totalorder %v2757_v5, 0  ;;  %v2774_v6 = vor.u32 %v2772_v45, %v2771_v4  ;;  %v2422_v45 = vld [vmem:[#allocation2 + $0x54] sm:$0xf] }
  0xc6   : > { %vm2903_vm14 = vcmp.ne.s16.totalorder %v2766_v0, 0  ;;  %v2584_v62 = vsel %vm2552_vm13, 65537, %v12827_v49  ;;  %v2935_v10 = vsel %vm2902_vm2, %v2419_v16, 0  ;;  %v2776_v56 = vrot.slane %v2771_v4, 4  ;;  %8108 = vmatmul.mubr.bf16.gmra.mrb[4].mxu0 %v10336_v31 }
  0xc7   : > { %v2936_v44 = vsel %vm2903_vm14, %v2420_v2, 0  ;;  %v437_v36 = vadd.s32 200, %v9274_v3  ;;  %v7497_v39 = vcombine.low %v2934_v17, %v2935_v10  ;;  %v2775_v57 = vsel %vm10214_vm3, %v10199_v22, %v2774_v6  ;;  %8111 = vmatprep.mubr.bf16.mxu0 %v3095_v47 }
  0xc8   : > { %v2787_v38 = vshrl.u32 %v2584_v62, 16  ;;  %v2790_v55 = vshll.u32 %v2584_v62, 16  ;;  %v3110_v41 = vrot.slane %v3108_v18, 1  ;;  %v3112_v15 = vshrl.u32 %v7496_v52, 16  ;;  %v2423_v18 = vld [vmem:[#allocation2 + $0x58] sm:$0xf] }
  0xc9   : > { %vm2904_vm10 = vcmp.ne.s16.totalorder %v2775_v57, 0  ;;  %v2784_v9 = vsel %vm10214_vm3, %v2776_v56, %v10184_v28  ;;  %v3116_v40 = vshll.u32 %v7497_v39, 16  ;;  %v3120_v34 = vshrl.u32 %v7497_v39, 16  ;;  %v2424_v56 = vld [vmem:[#allocation2 + $0x5c] sm:$0xf] }
  0xca   : > { %v2937_v32 = vsel %vm2904_vm10, %v2421_v23, 0  ;;  %v2789_v53 = vrot.slane %v2787_v38, 7  ;;  %vm2905_vm0 = vcmp.ne.s16.totalorder %v2784_v9, 0  ;;  %vm2458_vm13 = vcmp.lt.s32.totalorder %v609_v35, 15  ;;  %v8772_v9 = vld [vmem:[%s12704_s4 + $0x104] ss:$16 sps:$4 sm:$0xff]  }
  0xcb   : > { %v10367_v16 = vcombine.low %v2936_v44, %v2937_v32  ;;  %v623_v60 = vand.u32 15, %v437_v36  ;;  %v3118_v30 = vrot.slane %v3116_v40, 1  ;;  %vm2554_vm2 = vmpackc.low %vm2458_vm13, %vm2458_vm13  ;;  %v439_v4 = vadd.s32 216, %v9274_v3  ;;  %3756 = vmatprep.subr.bf16.mxu0 %v8772_v9 }
  0xcc   : > { %v2792_v52 = vor.u32 %v2790_v55, %v2789_v53  ;;  %v2794_v58 = vrot.slane %v2789_v53, 4  ;;  %v3114_v17 = vor.u32 %v3112_v15, %v3110_v41  ;;  %v2586_v5 = vsel %vm2554_vm2, 65537, %v12827_v49  ;;  %v8770_v15 = vld [vmem:[%s12704_s4 + $0x100] ss:$16 sps:$4 sm:$0xff]   ;;  %v2426_v53 = vld [vmem:[#allocation2 + $0x64] sm:$0xf] }
  0xcd   : > { %v3124_v2 = vshll.u32 %v10367_v16, 16  ;;  %vm2460_vm14 = vcmp.lt.s32.totalorder %v623_v60, 15  ;;  %v3122_v31 = vor.u32 %v3120_v34, %v3118_v30  ;;  %v2938_v47 = vsel %vm2905_vm0, %v2422_v45, 0  ;;  %v8775_v60 = vld [vmem:[%s12704_s4 + $0x124] ss:$16 sps:$4 sm:$0xff]   ;;  %3757 = vmatpush1.bf16.msra.mxu0 %v8770_v15 }
  0xce   : > { %v2793_v23 = vsel %vm10214_vm3, %v10199_v22, %v2792_v52  ;;  %v2802_v0 = vsel %vm10214_vm3, %v2794_v58, %v10184_v28  ;;  %vm2556_vm10 = vmpackc.low %vm2460_vm14, %vm2460_vm14  ;;  %v2805_v6 = vshrl.u32 %v2586_v5, 16  ;;  %v2808_v62 = vshll.u32 %v2586_v5, 16  ;;  %3758 = vmatprep.subr.bf16.mxu0 %v8775_v60  ;;  %v10434_v15 = vld [vmem:[%s12704_s4] ss:$16 sps:$4 sm:$0xff]   ;;  %v2428_v60 = vld [vmem:[#allocation2 + $0x6c] sm:$0xf] }
  0xcf   : > { %v3126_v35 = vrot.slane %v3124_v2, 1  ;;  %vm2906_vm13 = vcmp.ne.s16.totalorder %v2793_v23, 0  ;;  %v3103_v10 = vsel %vm3051_vm15, %v3098_v13, %v10349_v33  ;;  %v2588_v36 = vsel %vm2556_vm10, 65537, %v12827_v49  ;;  %v2425_v13 = vld [vmem:[#allocation2 + $0x60] sm:$0xf] }
  0xd0   : > { %v2939_v44 = vsel %vm2906_vm13, %v2423_v18, 0  ;;  %v637_v39 = vand.u32 15, %v439_v4  ;;  %v3111_v57 = vsel %vm3051_vm15, %v3106_v42, %v3110_v41  ;;  %v2807_v55 = vrot.slane %v2805_v6, 7  ;;  %8112 = vmatmul.mubr.bf16.gmra.mrb[8].mxu0 %v3103_v10  ;;  %v2427_v23 = vld [vmem:[#allocation2 + $0x68] sm:$0xf] }
  0xd1   : > { %v10383_v38 = vcombine.low %v2938_v47, %v2939_v44  ;;  %vm2907_vm0 = vcmp.ne.s16.totalorder %v2802_v0, 0  ;;  %v3128_v33 = vshrl.u32 %v10367_v16, 16  ;;  %v2823_v40 = vshrl.u32 %v2588_v36, 16  ;;  %8115 = vmatprep.mubr.bf16.mxu0 %v3111_v57 }
  0xd2   : > { %v2826_v32 = vshll.u32 %v2588_v36, 16  ;;  %vm2462_vm2 = vcmp.lt.s32.totalorder %v637_v39, 15  ;;  %v3119_v42 = vsel %vm3051_vm15, %v3114_v17, %v3118_v30  ;;  %v3127_v41 = vsel %vm3051_vm15, %v3122_v31, %v3126_v35  ;;  %v8773_v30 = vld [vmem:[%s12704_s4 + $0x120] ss:$16 sps:$4 sm:$0xff]   ;;  %v8778_v31 = vld [vmem:[%s12704_s4 + $0x144] ss:$16 sps:$4 sm:$0xff]  }
  0xd3   : > { %v2810_v34 = vor.u32 %v2808_v62, %v2807_v55  ;;  %v2812_v45 = vrot.slane %v2807_v55, 4  ;;  %vm2558_vm14 = vmpackc.low %vm2462_vm2, %vm2462_vm2  ;;  %v3132_v16 = vshll.u32 %v10383_v38, 16  ;;  %v2940_v52 = vsel %vm2907_vm0, %v2424_v56, 0  ;;  %v8776_v56 = vld [vmem:[%s12704_s4 + $0x140] ss:$16 sps:$4 sm:$0xff]   ;;  %3759 = vmatpush1.bf16.msra.mxu0 %v8773_v30 }
  0xd4   : > { %v2825_v58 = vrot.slane %v2823_v40, 7  ;;  %v2590_v4 = vsel %vm2558_vm14, 65537, %v12827_v49  ;;  %v441_v5 = vadd.s32 232, %v9274_v3  ;;  %v3136_v62 = vshrl.u32 %v10383_v38, 16  ;;  %v10429_v38 = vld [vmem:[%s12704_s4 + $0x4] ss:$16 sps:$4 sm:$0xff]   ;;  %3760 = vmatprep.subr.bf16.mxu0 %v8778_v31 }
  0xd5   : > { %v2811_v17 = vsel %vm10214_vm3, %v10199_v22, %v2810_v34  ;;  %v2820_v2 = vsel %vm10214_vm3, %v2812_v45, %v10184_v28  ;;  %v2841_v18 = vshrl.u32 %v2590_v4, 16  ;;  %v443_v44 = vadd.s32 248, %v9274_v3  ;;  %8135 = vmatprep.subr.bf16.mxu1 %v10429_v38  ;;  %v2429_v30 = vld [vmem:[#allocation2 + $0x70] sm:$0xf] }
  0xd6   : > { %vm2908_vm10 = vcmp.ne.s16.totalorder %v2811_v17, 0  ;;  %v2828_v47 = vor.u32 %v2826_v32, %v2825_v58  ;;  %vm2909_vm13 = vcmp.ne.s16.totalorder %v2820_v2, 0  ;;  %v2830_v0 = vrot.slane %v2825_v58, 4  ;;  %v8781_v32 = vld [vmem:[%s12704_s4 + $0x164] ss:$16 sps:$4 sm:$0xff]   ;;  %8143 = vmatpush1.bf16.msra.mxu1 %v10434_v15 }
  0xd7   : > { %v2941_v6 = vsel %vm2908_vm10, %v2425_v13, 0  ;;  %v2942_v10 = vsel %vm2909_vm13, %v2426_v53, 0  ;;  %v2843_v55 = vrot.slane %v2841_v18, 7  ;;  %v3130_v9 = vor.u32 %v3128_v33, %v3126_v35  ;;  %3761 = vmatpush1.bf16.msra.mxu0 %v8776_v56  ;;  %v8779_v2 = vld [vmem:[%s12704_s4 + $0x160] ss:$16 sps:$4 sm:$0xff]  }
  0xd8   : > { %v10418_v36 = vcombine.low %v2940_v52, %v2941_v6  ;;  %v2829_v39 = vsel %vm10214_vm3, %v10199_v22, %v2828_v47  ;;  %v2838_v57 = vsel %vm10214_vm3, %v2830_v0, %v10184_v28  ;;  %v2844_v13 = vshll.u32 %v2590_v4, 16  ;;  %8116 = vmatmul.mubr.bf16.gmra.mrb[12].mxu0 %v3119_v42  ;;  %v10454_v4 = vld [vmem:[%s12704_s4 + $0x20] ss:$16 sps:$4 sm:$0xff]   ;;  %3762 = vmatprep.subr.bf16.mxu0 %v8781_v32 }
  0xd9   : > { %vm2910_vm0 = vcmp.ne.s16.totalorder %v2829_v39, 0  ;;  %v651_v40 = vand.u32 15, %v441_v5  ;;  %v3134_v34 = vrot.slane %v3132_v16, 1  ;;  %vm2911_vm2 = vcmp.ne.s16.totalorder %v2838_v57, 0  ;;  %v10449_v16 = vld [vmem:[%s12704_s4 + $0x24] ss:$16 sps:$4 sm:$0xff]   ;;  %8119 = vmatprep.mubr.bf16.mxu0 %v3127_v41 }
  0xda   : > { %v3140_v53 = vshll.u32 %v10418_v36, 16  ;;  %v2943_v45 = vsel %vm2910_vm0, %v2427_v23, 0  ;;  %v2846_v58 = vor.u32 %v2844_v13, %v2843_v55  ;;  %v2848_v33 = vrot.slane %v2843_v55, 4  ;;  %v8784_v23 = vld [vmem:[%s12704_s4 + $0x184] ss:$16 sps:$4 sm:$0xff]   ;;  %8136 = vmatprep.subr.bf16.mxu1 %v10449_v16 }
  0xdb   : > { %v7501_v52 = vcombine.low %v2942_v10, %v2943_v45  ;;  %vm10441_vm14 = vcmp.lt.s32.totalorder %v651_v40, 15  ;;  %v3138_v42 = vor.u32 %v3136_v62, %v3134_v34  ;;  %v665_v17 = vand.u32 15, %v443_v44  ;;  %8144 = vmatpush1.bf16.msra.mxu1 %v10454_v4  ;;  %3763 = vmatpush1.bf16.msra.mxu0 %v8779_v2  ;;  %v8782_v55 = vld [vmem:[%s12704_s4 + $0x180] ss:$16 sps:$4 sm:$0xff]   ;;  %v2430_v40 = vld [vmem:[#allocation2 + $0x74] sm:$0xf] }
  0xdc   : > { %vm2560_vm10 = vmpackc.low %vm10441_vm14, %vm10441_vm14  ;;  %v3142_v18 = vrot.slane %v3140_v53, 1  ;;  %v2847_v5 = vsel %vm10214_vm3, %v10199_v22, %v2846_v58  ;;  %v2944_v31 = vsel %vm2911_vm2, %v2428_v60, 0  ;;  %v2856_v0 = vsel %vm10214_vm3, %v2848_v33, %v10184_v28  ;;  %3764 = vmatprep.subr.bf16.mxu0 %v8784_v23 }
  0xdd   : > { %v2592_v41 = vsel %vm2560_vm10, 65537, %v12827_v49  ;;  %v3148_v47 = vshll.u32 %v7501_v52, 16  ;;  %vm2912_vm13 = vcmp.ne.s16.totalorder %v2847_v5, 0  ;;  %v3135_v6 = vsel %vm3051_vm15, %v3130_v9, %v3134_v34  ;;  %v8790_v9 = vld [vmem:[%s12704_s4 + $0x1a4] ss:$16 sps:$4 sm:$0xff]  }
  0xde   : > { %v2945_v62 = vsel %vm2912_vm13, %v2429_v30, 0  ;;  %v2859_v10 = vshrl.u32 %v2592_v41, 16  ;;  %v2862_v44 = vshll.u32 %v2592_v41, 16  ;;  %v3144_v56 = vshrl.u32 %v10418_v36, 16 }
  0xdf   : > { %v7502_v39 = vcombine.low %v2944_v31, %v2945_v62  ;;  %v3152_v57 = vshrl.u32 %v7501_v52, 16  ;;  %vm2466_vm0 = vcmp.lt.s32.totalorder %v665_v17, 15  ;;  %v3143_v13 = vsel %vm3051_vm15, %v3138_v42, %v3142_v18  ;;  %v2431_v42 = vld [vmem:[#allocation2 + $0x78] sm:$0xf]  ;;  %3765 = vmatpush1.bf16.msra.mxu0 %v8782_v55  ;;  %v8788_v17 = vld [vmem:[%s12704_s4 + $0x1a0] ss:$16 sps:$4 sm:$0xff]  }
  0xe0   : > { %v2861_v32 = vrot.slane %v2859_v10, 7  ;;  %vm2913_vm2 = vcmp.ne.s16.totalorder %v2856_v0, 0  ;;  %vm2562_vm14 = vmpackc.low %vm2466_vm0, %vm2466_vm0  ;;  %v3150_v36 = vrot.slane %v3148_v47, 1  ;;  %8120 = vmatmul.mubr.bf16.gmra.mrb[16].mxu0 %v3135_v6  ;;  %v3146_v35 = vor.u32 %v3144_v56, %v3142_v18  ;;  %3766 = vmatprep.subr.bf16.mxu0 %v8790_v9  ;;  %v2432_v18 = vld [vmem:[#allocation2 + $0x7c] sm:$0xf] }
  0xe1   : > { %v3156_v34 = vshll.u32 %v7502_v39, 16  ;;  %v2594_v53 = vsel %vm2562_vm14, 65537, %v12827_v49  ;;  %8123 = vmatprep.mubr.bf16.mxu0 %v3143_v13  ;;  %v2946_v30 = vsel %vm2913_vm2, %v2430_v40, 0  ;;  %v2434_v0 = vld [vmem:[#allocation2 + $0x84] sm:$0x1] }
  0xe2   : > { %v2864_v45 = vor.u32 %v2862_v44, %v2861_v32  ;;  %v2866_v60 = vrot.slane %v2861_v32, 4  ;;  %v2877_v52 = vshrl.u32 %v2594_v53, 16  ;;  %v2880_v58 = vshll.u32 %v2594_v53, 16  ;;  %v2433_v56 = vld [vmem:[#allocation2 + $0x80] sm:$0xf] }
  0xe3   : > { %v3154_v33 = vor.u32 %v3152_v57, %v3150_v36  ;;  %v3158_v2 = vrot.slane %v3156_v34, 1  ;;  %v3151_v62 = vsel %vm3051_vm15, %v3146_v35, %v3150_v36  ;;  %v3160_v44 = vshrl.u32 %v7502_v39, 16  ;;  %3767 = vmatpush1.bf16.msra.mxu0 %v8788_v17  ;;  %v8796_v17 = vld [vmem:[%s12704_s4 + $0x1c4] ss:$16 sps:$4 sm:$0xff]  }
  0xe4   : > { %v2865_v5 = vsel %vm10214_vm3, %v10199_v22, %v2864_v45  ;;  %v2874_v31 = vsel %vm10214_vm3, %v2866_v60, %v10184_v28  ;;  %v2879_v41 = vrot.slane %v2877_v52, 7  ;;  %3768 = vmatprep.subr.bf16.mxu0 %v8796_v17 }
  0xe5   : > { %vm2914_vm10 = vcmp.ne.s16.totalorder %v2865_v5, 0  ;;  %vm2915_vm13 = vcmp.ne.s16.totalorder %v2874_v31, 0  ;;  %v3159_v57 = vsel %vm3051_vm15, %v3154_v33, %v3158_v2  ;;  %v3162_v36 = vor.u32 %v3160_v44, %v3158_v2  ;;  %v10510_v2 = vld [vmem:[%s12704_s4 + $0x44] ss:$16 sps:$4 sm:$0xff]   ;;  %v8794_v5 = vld [vmem:[%s12704_s4 + $0x1c0] ss:$16 sps:$4 sm:$0xff]  }
  0xe6   : > { %v2947_v23 = vsel %vm2914_vm10, %v2431_v42, 0  ;;  %v2882_v47 = vor.u32 %v2880_v58, %v2879_v41  ;;  %v2884_v6 = vrot.slane %v2879_v41, 4  ;;  %v2948_v55 = vsel %vm2915_vm13, %v2432_v18, 0  ;;  %v10518_v31 = vld [vmem:[%s12704_s4 + $0x40] ss:$16 sps:$4 sm:$0xff]   ;;  %8137 = vmatprep.subr.bf16.mxu1 %v10510_v2 }
  0xe7   : > { %v7503_v10 = vcombine.low %v2946_v30, %v2947_v23  ;;  %3769 = vmatpush1.bf16.msra.mxu0 %v8794_v5  ;;  %8145 = vmatpush1.bf16.msra.mxu1 %v10518_v31  ;;  %v8802_v41 = vld [vmem:[%s12704_s4 + $0x1e4] ss:$16 sps:$4 sm:$0xff]   ;;  %v8800_v23 = vld [vmem:[%s12704_s4 + $0x1e0] ss:$16 sps:$4 sm:$0xff]   ;;  %v8868_v5 = vld [vmem:[%s12704_s4 + $0x1ec] ss:$16 sps:$4 sm:$0xff]  }
  0xe8   : > { %v2883_v28 = vsel %vm10214_vm3, %v10199_v22, %v2882_v47  ;;  %vm2917_vm0 = vcmp.ne.s16.totalorder %v2884_v6, 0  ;;  %8124 = vmatmul.mubr.bf16.gmra.mrb[20].mxu0 %v3151_v62  ;;  %v10528_v18 = vld [vmem:[%s12704_s4 + $0x64] ss:$16 sps:$4 sm:$0xff]   ;;  %v10536_v47 = vld [vmem:[%s12704_s4 + $0x60] ss:$16 sps:$4 sm:$0xff]   ;;  %3770 = vmatprep.subr.bf16.mxu0 %v8802_v41  ;;  %vm12870_vm3 = vcmask 60416  }
  0xe9   : > { %v3164_v13 = vshll.u32 %v7503_v10, 16  ;;  %vm2916_vm2 = vcmp.ne.s16.totalorder %v2883_v28, 0  ;;  %v3168_v40 = vshrl.u32 %v7503_v10, 16  ;;  %v2950_v32 = vsel %vm2917_vm0, %v2434_v0, 0  ;;  %8127 = vmatprep.mubr.bf16.mxu0 %v3159_v57  ;;  %8138 = vmatprep.subr.bf16.mxu1 %v10528_v18  ;;  %v10543_v0 = vld [vmem:[%s12704_s4 + $0x84] ss:$16 sps:$4 sm:$0xff]   ;;  %vm12872_vm14 = vmmov %vm12870_vm3 }
  0xea   : > { %v2949_v9 = vsel %vm2916_vm2, %v2433_v56, 0  ;;  %v7505_v53 = vcombine.low %v2950_v32, %v2950_v32  ;;  %v10548_v6 = vld [vmem:[%s12704_s4 + $0x80] ss:$16 sps:$4 sm:$0xff]   ;;  %v10557_v62 = vld [vmem:[%s12704_s4 + $0xa4] ss:$16 sps:$4 sm:$0xff]   ;;  %vm12873_vm10 = vmmov %vm12870_vm3 }
  0xeb   : > { %v3166_v34 = vrot.slane %v3164_v13, 1  ;;  %v7504_v39 = vcombine.low %v2948_v55, %v2949_v9  ;;  %3771 = vmatpush1.bf16.msra.mxu0 %v8800_v23  ;;  %8146 = vmatpush1.bf16.msra.mxu1 %v10536_v47  ;;  %v10562_v10 = vld [vmem:[%s12704_s4 + $0xa0] ss:$16 sps:$4 sm:$0xff]   ;;  %v10569_v44 = vld [vmem:[%s12704_s4 + $0xc4] ss:$16 sps:$4 sm:$0xff]   ;;  %vm12876_vm2 = vmmov %vm12870_vm3 }
  0xec   : > { %v3180_v22 = vshll.u32 %v7505_v53, 16  ;;  %8139 = vmatprep.subr.bf16.mxu1 %v10543_v0  ;;  %v10574_v56 = vld [vmem:[%s12704_s4 + $0xc0] ss:$16 sps:$4 sm:$0xff]   ;;  %v10581_v57 = vld [vmem:[%s12704_s4 + $0xe4] ss:$16 sps:$4 sm:$0xff]  }
  0xed   : > { %v3170_v45 = vor.u32 %v3168_v40, %v3166_v34  ;;  %v3172_v60 = vshll.u32 %v7504_v39, 16  ;;  %v3167_v52 = vsel %vm3051_vm15, %v3162_v36, %v3166_v34  ;;  %v3176_v29 = vshrl.u32 %v7504_v39, 16  ;;  %v10586_v28 = vld [vmem:[%s12704_s4 + $0xe0] ss:$16 sps:$4 sm:$0xff]   ;;  %v8820_v55 = vld [vmem:[%s12704_s4 + $0xc] ss:$16 sps:$4 sm:$0xff]  }
  0xee   : > { %v3182_v42 = vrot.slane %v3180_v22, 1  ;;  %v8841_v36 = vld [vmem:[%s12704_s4 + $0x10c] ss:$16 sps:$4 sm:$0xff]   ;;  %v8839_v34 = vld [vmem:[%s12704_s4 + $0x108] ss:$16 sps:$4 sm:$0xff]  }
  0xef   : > { %v3174_v58 = vrot.slane %v3172_v60, 1  ;;  %8147 = vmatpush1.bf16.msra.mxu1 %v10548_v6  ;;  %3949 = vmatprep.subr.bf16.mxu0 %v8841_v36  ;;  %v8844_v39 = vld [vmem:[%s12704_s4 + $0x12c] ss:$16 sps:$4 sm:$0xff]   ;;  %v8842_v53 = vld [vmem:[%s12704_s4 + $0x128] ss:$16 sps:$4 sm:$0xff]  }
  0xf0   : > { %8128 = vmatmul.mubr.bf16.gmra.mrb[24].mxu0 %v3167_v52  ;;  %8140 = vmatprep.subr.bf16.mxu1 %v10557_v62  ;;  %v8848_v60 = vld [vmem:[%s12704_s4 + $0x148] ss:$16 sps:$4 sm:$0xff]   ;;  %v8853_v52 = vld [vmem:[%s12704_s4 + $0x16c] ss:$16 sps:$4 sm:$0xff]  }
  0xf1   : > { %v3175_v35 = vsel %vm3051_vm15, %v3170_v45, %v3174_v58  ;;  %v3178_v33 = vor.u32 %v3176_v29, %v3174_v58  ;;  %v8850_v45 = vld [vmem:[%s12704_s4 + $0x14c] ss:$16 sps:$4 sm:$0xff]   ;;  %v8851_v58 = vld [vmem:[%s12704_s4 + $0x168] ss:$16 sps:$4 sm:$0xff]  }
  0xf2   : > { %8131 = vmatprep.mubr.bf16.mxu0 %v3175_v35  ;;  %v8856_v29 = vld [vmem:[%s12704_s4 + $0x18c] ss:$16 sps:$4 sm:$0xff]   ;;  %v8854_v22 = vld [vmem:[%s12704_s4 + $0x188] ss:$16 sps:$4 sm:$0xff]  }
  0xf3   : > { %v3183_v30 = vsel %vm3051_vm15, %v3178_v33, %v3182_v42  ;;  %8148 = vmatpush1.bf16.msra.mxu1 %v10562_v10  ;;  %v8860_v35 = vld [vmem:[%s12704_s4 + $0x1a8] ss:$16 sps:$4 sm:$0xff]   ;;  %v8862_v33 = vld [vmem:[%s12704_s4 + $0x1ac] ss:$16 sps:$4 sm:$0xff]   ;;  %vm12871_vm15 = vcmask 1043520  }
  0xf4   : > { %8141 = vmatprep.subr.bf16.mxu1 %v10569_v44  ;;  %v8865_v42 = vld [vmem:[%s12704_s4 + $0x1cc] ss:$16 sps:$4 sm:$0xff]   ;;  %v8866_v23 = vld [vmem:[%s12704_s4 + $0x1e8] ss:$16 sps:$4 sm:$0xff]   ;;  %vm12874_vm13 = vmmov %vm12871_vm15 }
  0xf5   : > { %vm12875_vm0 = vmmov %vm12874_vm13 }
  0xf7   : > { %8149 = vmatpush1.bf16.msra.mxu1 %v10574_v56 }
  0xf8   : > { %8132 = vmatmul.mubr.bf16.gmra.mrb[36].mxu0 %v3183_v30  ;;  %8142 = vmatprep.subr.bf16.mxu1 %v10581_v57  ;;  %v8863_v30 = vld [vmem:[%s12704_s4 + $0x1c8] ss:$16 sps:$4 sm:$0xff]  }
  0xf9   : > { %3788 = vmatprep.mubr.bf16.mxu0 %v12827_v49 }
  0xfb   : > { %8150 = vmatpush1.bf16.msra.mxu1 %v10586_v28 }
  0xfc   : > { %4495 = vmatprep.subr.bf16.mxu1 %v8820_v55 }
 0x100   : > { %3789 = vmatmul.mubr.bf16.vlgmr.msra.gmra.mrb[40].mxu0 %v12827_v49 }
 0x101   : > { %3798 = vmatprep.mubr.bf16.mxu0 %v12827_v49  ;;  %3950 = vmatpush1.bf16.msra.mxu0 %v8839_v34 }
 0x102   : > { %3951 = vmatprep.subr.bf16.mxu0 %v8844_v39  ;;  %v10649_v39 = vld [vmem:[%s12703_s3] ss:$0 sm:$0xff] }
 0x105   : > { %3952 = vmatpush1.bf16.msra.mxu0 %v8842_v53 }
 0x106   : > { %3953 = vmatprep.subr.bf16.mxu0 %v8850_v45 }
 0x109   : > { %3954 = vmatpush1.bf16.msra.mxu0 %v8848_v60 }
 0x10a   : > { %3955 = vmatprep.subr.bf16.mxu0 %v8853_v52 }
 0x10d   : > { %3956 = vmatpush1.bf16.msra.mxu0 %v8851_v58 }
 0x10e   : > { %3957 = vmatprep.subr.bf16.mxu0 %v8856_v29 }
 0x111   : > { %3958 = vmatpush1.bf16.msra.mxu0 %v8854_v22 }
 0x112   : > { %3959 = vmatprep.subr.bf16.mxu0 %v8862_v33 }
 0x115   : > { %3960 = vmatpush1.bf16.msra.mxu0 %v8860_v35 }
 0x116   : > { %3961 = vmatprep.subr.bf16.mxu0 %v8865_v42 }
 0x119   : > { %3962 = vmatpush1.bf16.msra.mxu0 %v8863_v30 }
 0x11a   : > { %3963 = vmatprep.subr.bf16.mxu0 %v8868_v5 }
 0x11d   : > { %3964 = vmatpush1.bf16.msra.mxu0 %v8866_v23 }
 0x11e   : > { %4302 = vmatprep.subr.bf16.mxu0 %v10429_v38 }
 0x147   : > { %v8037_v13 = vpop.f32.mrb[28].mxu0 }
 0x148   : > { %v1926_v40 = vpop.f32.mrb[29].mxu0 }
 0x149   : > { %v8038_v32 = vpop.f32.mrb[30].mxu0 }
 0x14a   : > { %v1929_v9 = vpop.f32.mrb[31].mxu0 }
 0x189   : > { %v8085_v17 = vpop.f32.mrb[32].mxu0 }
 0x18a   : > { %v2387_v41 = vpop.f32.mrb[33].mxu0 }
 0x18b   : > { %v10641_v55 = vadd.f32 %v2387_v41, %v1926_v40  ;;  %v8086_v13 = vpop.f32.mrb[34].mxu0 }
 0x18c   : > { %v2390_v32 = vpop.f32.mrb[35].mxu0  ;;  %v8818_v13 = vld [vmem:[%s12704_s4 + $0x8] ss:$16 sps:$4 sm:$0xff]  }
 0x18d   : > { %v10643_v36 = vadd.f32 %v2390_v32, %v1929_v9 }
 0x191   : > { %v8105_v34 = vpop.f32.mrb[0].mxu0 }
 0x192   : > { %v3282_v53 = vpop.f32.mrb[1].mxu0  ;;  %v3450_v60 = vadd.f32 %v8105_v34, %v10649_v39  ;;  %v8823_v34 = vld [vmem:[%s12704_s4 + $0x2c] ss:$16 sps:$4 sm:$0xff]  }
 0x193   : > { %v8106_v45 = vpop.f32.mrb[2].mxu0  ;;  %v3448_v58 = vadd.f32 %v10649_v39, %v3282_v53 }
 0x194   : > { %v3451_v40 = vadd.f32 %v8106_v45, %v10649_v39  ;;  %v3285_v52 = vpop.f32.mrb[3].mxu0 }
 0x195   : > { %v3449_v9 = vadd.f32 %v10649_v39, %v3285_v52  ;;  %v8826_v52 = vld [vmem:[%s12704_s4 + $0x4c] ss:$16 sps:$4 sm:$0xff]  }
 0x196   : > { %v10655_v29 = vpack.c.bf16 %v3451_v40, %v3450_v60  ;;  %v8821_v60 = vld [vmem:[%s12704_s4 + $0x28] ss:$16 sps:$4 sm:$0xff]  }
 0x197   : > { %v10657_v38 = vpack.c.bf16 %v3449_v9, %v3448_v58 }
 0x199   : > { %v8109_v22 = vpop.f32.mrb[4].mxu0  ;;  %3799 = vmatmul.mubr.bf16.gmra.mrb[44].mxu0 %v10657_v38 }
 0x19a   : > { %v3298_v35 = vpop.f32.mrb[5].mxu0  ;;  %3808 = vmatprep.mubr.bf16.mxu0 %v12827_v49  ;;  %v3454_v42 = vadd.f32 %v8109_v22, %v10649_v39 }
 0x19b   : > { %v8110_v33 = vpop.f32.mrb[6].mxu0  ;;  %v3452_v5 = vadd.f32 %v10649_v39, %v3298_v35 }
 0x19c   : > { %v3455_v30 = vadd.f32 %v8110_v33, %v10649_v39  ;;  %v3301_v17 = vpop.f32.mrb[7].mxu0 }
 0x19d   : > { %v3453_v41 = vadd.f32 %v10649_v39, %v3301_v17  ;;  %v8824_v17 = vld [vmem:[%s12704_s4 + $0x48] ss:$16 sps:$4 sm:$0xff]  }
 0x19e   : > { %v10665_v23 = vpack.c.bf16 %v3455_v30, %v3454_v42 }
 0x19f   : > { %v10670_v32 = vpack.c.bf16 %v3453_v41, %v3452_v5  ;;  %v8829_v5 = vld [vmem:[%s12704_s4 + $0x6c] ss:$16 sps:$4 sm:$0xff]  }
 0x1a1   : > { %3809 = vmatmul.mubr.bf16.gmra.mrb[48].mxu0 %v10655_v29  ;;  %4375 = vmatmul.mubr.bf16.vlgmr.msra.gmra.mrb[0].mxu1 %v10670_v32 }
 0x1a2   : > { %4496 = vmatpush1.bf16.msra.mxu1 %v8818_v13  ;;  %3818 = vmatprep.mubr.bf16.mxu0 %v12827_v49 }
 0x1a3   : > { %v8113_v53 = vpop.f32.mrb[8].mxu0  ;;  %4384 = vmatprep.mubr.bf16.mxu1 %v12827_v49  ;;  %4497 = vmatprep.subr.bf16.mxu1 %v8823_v34 }
 0x1a4   : > { %v3314_v45 = vpop.f32.mrb[9].mxu0  ;;  %v3458_v58 = vadd.f32 %v8113_v53, %v10649_v39  ;;  %v8827_v53 = vld [vmem:[%s12704_s4 + $0x68] ss:$16 sps:$4 sm:$0xff]  }
 0x1a5   : > { %v8114_v40 = vpop.f32.mrb[10].mxu0  ;;  %v3456_v35 = vadd.f32 %v10649_v39, %v3314_v45 }
 0x1a6   : > { %v3459_v9 = vadd.f32 %v8114_v40, %v10649_v39  ;;  %v3317_v22 = vpop.f32.mrb[11].mxu0  ;;  %4498 = vmatpush1.bf16.msra.mxu1 %v8821_v60 }
 0x1a7   : > { %v3457_v33 = vadd.f32 %v10649_v39, %v3317_v22  ;;  %4499 = vmatprep.subr.bf16.mxu1 %v8826_v52  ;;  %v8832_v52 = vld [vmem:[%s12704_s4 + $0x8c] ss:$16 sps:$4 sm:$0xff]  }
 0x1a8   : > { %v10689_v42 = vpack.c.bf16 %v3459_v9, %v3458_v58 }
 0x1a9   : > { %v10691_v30 = vpack.c.bf16 %v3457_v33, %v3456_v35  ;;  %3819 = vmatmul.mubr.bf16.gmra.mrb[52].mxu0 %v10670_v32  ;;  %4385 = vmatmul.mubr.bf16.gmra.mrb[4].mxu1 %v10665_v23  ;;  %v8830_v33 = vld [vmem:[%s12704_s4 + $0x88] ss:$16 sps:$4 sm:$0xff]  }
 0x1aa   : > { %3828 = vmatprep.mubr.bf16.mxu0 %v12827_v49  ;;  %4394 = vmatprep.mubr.bf16.mxu1 %v12827_v49 }
 0x1ab   : > { %v8117_v41 = vpop.f32.mrb[12].mxu0  ;;  %4500 = vmatpush1.bf16.msra.mxu1 %v8824_v17  ;;  %v8835_v17 = vld [vmem:[%s12704_s4 + $0xac] ss:$16 sps:$4 sm:$0xff]  }
 0x1ac   : > { %v3330_v13 = vpop.f32.mrb[13].mxu0  ;;  %v3462_v45 = vadd.f32 %v8117_v41, %v10649_v39  ;;  %4501 = vmatprep.subr.bf16.mxu1 %v8829_v5 }
 0x1ad   : > { %v8118_v34 = vpop.f32.mrb[14].mxu0  ;;  %v3460_v58 = vadd.f32 %v10649_v39, %v3330_v13 }
 0x1ae   : > { %v3463_v60 = vadd.f32 %v8118_v34, %v10649_v39  ;;  %v3333_v40 = vpop.f32.mrb[15].mxu0 }
 0x1af   : > { %v3461_v9 = vadd.f32 %v10649_v39, %v3333_v40  ;;  %4502 = vmatpush1.bf16.msra.mxu1 %v8827_v53  ;;  %v8833_v53 = vld [vmem:[%s12704_s4 + $0xa8] ss:$16 sps:$4 sm:$0xff]   ;;  %v8838_v40 = vld [vmem:[%s12704_s4 + $0xcc] ss:$16 sps:$4 sm:$0xff]  }
 0x1b0   : > { %v10713_v22 = vpack.c.bf16 %v3463_v60, %v3462_v45  ;;  %4503 = vmatprep.subr.bf16.mxu1 %v8832_v52 }
 0x1b1   : > { %v10715_v35 = vpack.c.bf16 %v3461_v9, %v3460_v58  ;;  %3829 = vmatmul.mubr.bf16.gmra.mrb[56].mxu0 %v10665_v23  ;;  %4395 = vmatmul.mubr.bf16.gmra.mrb[8].mxu1 %v10691_v30 }
 0x1b2   : > { %3838 = vmatprep.mubr.bf16.mxu0 %v12827_v49  ;;  %4404 = vmatprep.mubr.bf16.mxu1 %v12827_v49 }
 0x1b3   : > { %v8121_v5 = vpop.f32.mrb[16].mxu0  ;;  %4504 = vmatpush1.bf16.msra.mxu1 %v8830_v33  ;;  %v8836_v33 = vld [vmem:[%s12704_s4 + $0xc8] ss:$16 sps:$4 sm:$0xff]  }
 0x1b4   : > { %v3466_v41 = vadd.f32 %v8121_v5, %v10649_v39  ;;  %v3346_v13 = vpop.f32.mrb[17].mxu0  ;;  %4505 = vmatprep.subr.bf16.mxu1 %v8835_v17  ;;  %v8847_v17 = vld [vmem:[%s12704_s4 + $0xec] ss:$16 sps:$4 sm:$0xff]  }
 0x1b5   : > { %v8122_v34 = vpop.f32.mrb[18].mxu0  ;;  %v3464_v52 = vadd.f32 %v10649_v39, %v3346_v13 }
 0x1b6   : > { %v3467_v45 = vadd.f32 %v8122_v34, %v10649_v39  ;;  %v3349_v60 = vpop.f32.mrb[19].mxu0 }
 0x1b7   : > { %v3465_v58 = vadd.f32 %v10649_v39, %v3349_v60  ;;  %4506 = vmatpush1.bf16.msra.mxu1 %v8833_v53  ;;  %v8845_v60 = vld [vmem:[%s12704_s4 + $0xe8] ss:$16 sps:$4 sm:$0xff]  }
 0x1b8   : > { %v10737_v9 = vpack.c.bf16 %v3467_v45, %v3466_v41  ;;  %4507 = vmatprep.subr.bf16.mxu1 %v8838_v40 }
 0x1b9   : > { %v10739_v5 = vpack.c.bf16 %v3465_v58, %v3464_v52  ;;  %3839 = vmatmul.mubr.bf16.gmra.mrb[60].mxu0 %v10691_v30  ;;  %4405 = vmatmul.mubr.bf16.gmra.mrb[12].mxu1 %v10689_v42  ;;  %v8859_v58 = vld [vmem:[%s12706_s6 + $0x4] ss:$8 sps:$4 sm:$0xff]  }
 0x1ba   : > { %3848 = vmatprep.mubr.bf16.mxu0 %v12827_v49  ;;  %4414 = vmatprep.mubr.bf16.mxu1 %v12827_v49 }
 0x1bb   : > { %v8125_v34 = vpop.f32.mrb[20].mxu0  ;;  %4508 = vmatpush1.bf16.msra.mxu1 %v8836_v33 }
 0x1bc   : > { %v3470_v41 = vadd.f32 %v8125_v34, %v10649_v39  ;;  %v3362_v13 = vpop.f32.mrb[21].mxu0  ;;  %4509 = vmatprep.subr.bf16.mxu1 %v8847_v17 }
 0x1bd   : > { %v3468_v53 = vadd.f32 %v10649_v39, %v3362_v13  ;;  %v8126_v45 = vpop.f32.mrb[22].mxu0 }
 0x1be   : > { %v3471_v40 = vadd.f32 %v8126_v45, %v10649_v39  ;;  %v3365_v52 = vpop.f32.mrb[23].mxu0 }
 0x1bf   : > { %v3469_v34 = vadd.f32 %v10649_v39, %v3365_v52  ;;  %4510 = vmatpush1.bf16.msra.mxu1 %v8845_v60 }
 0x1c0   : > { %v10761_v54 = vpack.c.bf16 %v3471_v40, %v3470_v41  ;;  %5062 = vmatprep.subr.bf16.mxu1 %v8859_v58 }
 0x1c1   : > { %v10763_v3 = vpack.c.bf16 %v3469_v34, %v3468_v53  ;;  %3849 = vmatmul.mubr.bf16.gmra.mrb[64].mxu0 %v10689_v42  ;;  %4415 = vmatmul.mubr.bf16.gmra.mrb[16].mxu1 %v10715_v35 }
 0x1c2   : > { %3858 = vmatprep.mubr.bf16.mxu0 %v12827_v49  ;;  %4424 = vmatprep.mubr.bf16.mxu1 %v12827_v49 }
 0x1c3   : > { %v8129_v33 = vpop.f32.mrb[24].mxu0 }
 0x1c4   : > { %v3474_v13 = vadd.f32 %v8129_v33, %v10649_v39  ;;  %v3378_v17 = vpop.f32.mrb[25].mxu0 }
 0x1c5   : > { %v3472_v45 = vadd.f32 %v10649_v39, %v3378_v17  ;;  %v8130_v41 = vpop.f32.mrb[26].mxu0 }
 0x1c6   : > { %v3475_v53 = vadd.f32 %v8130_v41, %v10649_v39  ;;  %v3381_v40 = vpop.f32.mrb[27].mxu0 }
 0x1c7   : > { %v3473_v60 = vadd.f32 %v10649_v39, %v3381_v40 }
 0x1c8   : > { %v10773_v52 = vpack.c.bf16 %v3475_v53, %v3474_v13 }
 0x1c9   : > { %v10775_v58 = vpack.c.bf16 %v3473_v60, %v3472_v45  ;;  %3859 = vmatmul.mubr.bf16.gmra.mrb[68].mxu0 %v10715_v35  ;;  %4425 = vmatmul.mubr.bf16.gmra.mrb[20].mxu1 %v10713_v22  ;;  %v8872_v60 = vld [vmem:[%s12706_s6 + $0x20] ss:$8 sps:$4 sm:$0xff]  }
 0x1ca   : > { %3868 = vmatprep.mubr.bf16.mxu0 %v12827_v49  ;;  %4434 = vmatprep.mubr.bf16.mxu1 %v12827_v49 }
 0x1cb   : > { %v8133_v34 = vpop.f32.mrb[36].mxu0 }
 0x1cc   : > { %v3394_v33 = vpop.f32.mrb[37].mxu0  ;;  %v8877_v34 = vld [vmem:[%s12706_s6 + $0x34] ss:$8 sps:$4 sm:$0xff]  }
 0x1cd   : > { %v3437_v17 = vadd.f32 %v3394_v33, %v10641_v55  ;;  %v8134_v41 = vpop.f32.mrb[38].mxu0  ;;  %v8871_v55 = vld [vmem:[%s12706_s6 + $0x14] ss:$8 sps:$4 sm:$0xff]   ;;  %v8875_v33 = vld [vmem:[%s12706_s6 + $0x30] ss:$8 sps:$4 sm:$0xff]  }
 0x1ce   : > { %v3397_v51 = vpop.f32.mrb[39].mxu0  ;;  %v8878_v41 = vld [vmem:[%s12706_s6 + $0x40] ss:$8 sps:$4 sm:$0xff]  }
 0x1cf   : > { %v3476_v40 = vadd.f32 %v10649_v39, %v3437_v17  ;;  %v3438_v13 = vadd.f32 %v3397_v51, %v10643_v36  ;;  %v8857_v51 = vld [vmem:[%s12706_s6] ss:$8 sps:$4 sm:$0xff]   ;;  %v8869_v36 = vld [vmem:[%s12706_s6 + $0x10] ss:$8 sps:$4 sm:$0xff]   ;;  %v8880_v17 = vld [vmem:[%s12706_s6 + $0x44] ss:$8 sps:$4 sm:$0xff]  }
 0x1d1   : > { %v3477_v45 = vadd.f32 %v10649_v39, %v3438_v13  ;;  %3869 = vmatmul.mubr.bf16.gmra.mrb[72].mxu0 %v10713_v22  ;;  %4435 = vmatmul.mubr.bf16.gmra.mrb[24].mxu1 %v10739_v5  ;;  %v8874_v39 = vld [vmem:[%s12706_s6 + $0x24] ss:$8 sps:$4 sm:$0xff]   ;;  %v8881_v13 = vld [vmem:[%s12706_s6 + $0x50] ss:$8 sps:$4 sm:$0xff]  }
 0x1d2   : > { %3878 = vmatprep.mubr.bf16.mxu0 %v12827_v49  ;;  %4444 = vmatprep.mubr.bf16.mxu1 %v12827_v49 }
 0x1d3   : > { %v10787_v53 = vpack.c.bf16 %v3477_v45, %v3476_v40  ;;  %v8883_v40 = vld [vmem:[%s12706_s6 + $0x54] ss:$8 sps:$4 sm:$0xff]   ;;  %v8886_v45 = vld [vmem:[%s12706_s6 + $0x64] ss:$8 sps:$4 sm:$0xff]  }
 0x1d9   : > { %3879 = vmatmul.mubr.bf16.gmra.mrb[76].mxu0 %v10739_v5  ;;  %4445 = vmatmul.mubr.bf16.gmra.mrb[28].mxu1 %v10737_v9 }
 0x1da   : > { %3888 = vmatprep.mubr.bf16.mxu0 %v12827_v49  ;;  %4454 = vmatprep.mubr.bf16.mxu1 %v12827_v49 }
 0x1e1   : > { %3889 = vmatmul.mubr.bf16.gmra.mrb[80].mxu0 %v10737_v9  ;;  %4455 = vmatmul.mubr.bf16.gmra.mrb[32].mxu1 %v10763_v3 }
 0x1e2   : > { %3898 = vmatprep.mubr.bf16.mxu0 %v12827_v49  ;;  %4464 = vmatprep.mubr.bf16.mxu1 %v12827_v49 }
 0x1e9   : > { %3899 = vmatmul.mubr.bf16.gmra.mrb[84].mxu0 %v10763_v3  ;;  %4465 = vmatmul.mubr.bf16.gmra.mrb[36].mxu1 %v10761_v54 }
 0x1ea   : > { %3908 = vmatprep.mubr.bf16.mxu0 %v12827_v49  ;;  %4474 = vmatprep.mubr.bf16.mxu1 %v12827_v49 }
 0x1f1   : > { %3909 = vmatmul.mubr.bf16.gmra.mrb[88].mxu0 %v10761_v54  ;;  %4475 = vmatmul.mubr.bf16.gmra.mrb[40].mxu1 %v10775_v58 }
 0x1f2   : > { %3918 = vmatprep.mubr.bf16.mxu0 %v12827_v49  ;;  %4484 = vmatprep.mubr.bf16.mxu1 %v12827_v49 }
 0x1f9   : > { %3919 = vmatmul.mubr.bf16.gmra.mrb[92].mxu0 %v10775_v58  ;;  %4485 = vmatmul.mubr.bf16.gmra.mrb[44].mxu1 %v10773_v52 }
 0x1fa   : > { %3928 = vmatprep.mubr.bf16.mxu0 %v12827_v49  ;;  %4527 = vmatprep.mubr.bf16.mxu1 %v12827_v49 }
 0x201   : > { %3929 = vmatmul.mubr.bf16.gmra.mrb[96].mxu0 %v10773_v52  ;;  %4528 = vmatmul.mubr.bf16.vlgmr.msra.gmra.mrb[48].mxu1 %v12827_v49 }
 0x202   : > { %5063 = vmatpush1.bf16.msra.mxu1 %v8857_v51  ;;  %3938 = vmatprep.mubr.bf16.mxu0 %v12827_v49  ;;  %v8884_v51 = vld [vmem:[%s12706_s6 + $0x60] ss:$8 sps:$4 sm:$0xff]  }
 0x203   : > { %4537 = vmatprep.mubr.bf16.mxu1 %v12827_v49  ;;  %5064 = vmatprep.subr.bf16.mxu1 %v8871_v55  ;;  %v8889_v55 = vld [vmem:[%s12706_s6 + $0x74] ss:$8 sps:$4 sm:$0xff]  }
 0x206   : > { %5065 = vmatpush1.bf16.msra.mxu1 %v8869_v36  ;;  %v8911_v36 = vld [vmem:[%s12707_s7 + $0xc0] ss:$8 sps:$4 sm:$0xff]  }
 0x207   : > { %5066 = vmatprep.subr.bf16.mxu1 %v8874_v39 }
 0x209   : > { %3939 = vmatmul.mubr.bf16.gmra.mrb[100].mxu0 %v10787_v53  ;;  %4538 = vmatmul.mubr.bf16.gmra.mrb[52].mxu1 %v12827_v49 }
 0x20a   : > { %3981 = vmatprep.mubr.bf16.mxu0 %v12827_v49  ;;  %4547 = vmatprep.mubr.bf16.mxu1 %v12827_v49 }
 0x20b   : > { %5067 = vmatpush1.bf16.msra.mxu1 %v8872_v60 }
 0x20c   : > { %5068 = vmatprep.subr.bf16.mxu1 %v8877_v34 }
 0x20f   : > { %5069 = vmatpush1.bf16.msra.mxu1 %v8875_v33  ;;  %v8916_v33 = vld [vmem:[%s12707_s7 + $0xd0] ss:$8 sps:$4 sm:$0xff]  }
 0x210   : > { %5070 = vmatprep.subr.bf16.mxu1 %v8880_v17 }
 0x211   : > { %3982 = vmatmul.mubr.bf16.vlgmr.msra.gmra.mrb[104].mxu0 %v12827_v49  ;;  %4548 = vmatmul.mubr.bf16.gmra.mrb[56].mxu1 %v10657_v38 }
 0x212   : > { %3991 = vmatprep.mubr.bf16.mxu0 %v12827_v49  ;;  %4557 = vmatprep.mubr.bf16.mxu1 %v12827_v49 }
 0x213   : > { %5071 = vmatpush1.bf16.msra.mxu1 %v8878_v41  ;;  %4303 = vmatpush1.bf16.msra.mxu0 %v10434_v15  ;;  %v8887_v15 = vld [vmem:[%s12706_s6 + $0x70] ss:$8 sps:$4 sm:$0xff]  }
 0x214   : > { %5072 = vmatprep.subr.bf16.mxu1 %v8883_v40  ;;  %4304 = vmatprep.subr.bf16.mxu0 %v10449_v16  ;;  %v8893_v16 = vld [vmem:[%s12707_s7 + $0x84] ss:$8 sps:$4 sm:$0xff]  }
 0x217   : > { %5073 = vmatpush1.bf16.msra.mxu1 %v8881_v13  ;;  %4305 = vmatpush1.bf16.msra.mxu0 %v10454_v4  ;;  %v896_v4 = vld [vmem:[%s9289_s12 + $0xc] sm:$0xf]  ;;  %v8899_v13 = vld [vmem:[#allocation2 + $0x1c] sm:$0xff]  }
 0x218   : > { %5074 = vmatprep.subr.bf16.mxu1 %v8886_v45  ;;  %4306 = vmatprep.subr.bf16.mxu0 %v10510_v2  ;;  %928 = vst.msk [vmem:[#allocation3 + $0x10] sm:$0xf] %vm12870_vm3, %v896_v4  ;;  %v8898_v2 = vld [vmem:[%s12707_s7 + $0x94] ss:$8 sps:$4 sm:$0xff]   ;;  %vm12877_vm3 = vmmov %vm12876_vm2  ;;  %v901_v45 = vld [vmem:[%s9289_s12 + $0x20] sm:$0xf] }
 0x219   : > { %3992 = vmatmul.mubr.bf16.gmra.mrb[108].mxu0 %v10657_v38  ;;  %4558 = vmatmul.mubr.bf16.gmra.mrb[60].mxu1 %v10655_v29  ;;  %993 = vst.msk [vmem:[#allocation3 + $0x10] sm:$0xf] %vm12871_vm15, %v12827_v49  ;;  %vm12879_vm15 = vmmov %vm12875_vm0 }
 0x21a   : > { %4001 = vmatprep.mubr.bf16.mxu0 %v12827_v49  ;;  %4567 = vmatprep.mubr.bf16.mxu1 %v12827_v49 }
 0x21b   : > { %5075 = vmatpush1.bf16.msra.mxu1 %v8884_v51  ;;  %4307 = vmatpush1.bf16.msra.mxu0 %v10518_v31  ;;  %v8896_v31 = vld [vmem:[%s12707_s7 + $0x90] ss:$8 sps:$4 sm:$0xff]   ;;  %v902_v51 = vld [vmem:[%s9289_s12 + $0x24] sm:$0xf] }
 0x21c   : > { %5076 = vmatprep.subr.bf16.mxu1 %v8889_v55  ;;  %4308 = vmatprep.subr.bf16.mxu0 %v10528_v18  ;;  %v8903_v18 = vld [vmem:[%s12707_s7 + $0xa4] ss:$8 sps:$4 sm:$0xff]  }
 0x21f   : > { %5077 = vmatpush1.bf16.msra.mxu1 %v8887_v15  ;;  %4309 = vmatpush1.bf16.msra.mxu0 %v10536_v47 }
 0x220   : > { %4310 = vmatprep.subr.bf16.mxu0 %v10543_v0  ;;  %5770 = vmatprep.subr.bf16.mxu1 %v8893_v16 }
 0x221   : > { %4002 = vmatmul.mubr.bf16.gmra.mrb[112].mxu0 %v10655_v29  ;;  %4568 = vmatmul.mubr.bf16.gmra.mrb[64].mxu1 %v10670_v32 }
 0x222   : > { %4011 = vmatprep.mubr.bf16.mxu0 %v12827_v49  ;;  %4577 = vmatprep.mubr.bf16.mxu1 %v12827_v49 }
 0x223   : > { %4311 = vmatpush1.bf16.msra.mxu0 %v10548_v6  ;;  %v8894_v6 = vld [vmem:[#allocation2 + $0xc] sm:$0xff]  }
 0x224   : > { %4312 = vmatprep.subr.bf16.mxu0 %v10557_v62  ;;  %v897_v62 = vld [vmem:[%s9289_s12 + $0x10] sm:$0xf] }
 0x225   : > { %929 = vst.msk [vmem:[#allocation3 + $0x14] sm:$0xf] %vm12872_vm14, %v897_v62  ;;  %vm12880_vm14 = vmmov %vm12875_vm0 }
 0x226   : > { %994 = vst.msk [vmem:[#allocation3 + $0x14] sm:$0xf] %vm12874_vm13, %v12827_v49  ;;  %vm12888_vm13 = vmmov %vm12875_vm0 }
 0x227   : > { %4313 = vmatpush1.bf16.msra.mxu0 %v10562_v10  ;;  %v898_v10 = vld [vmem:[%s9289_s12 + $0x14] sm:$0xf] }
 0x228   : > { %4314 = vmatprep.subr.bf16.mxu0 %v10569_v44  ;;  %930 = vst.msk [vmem:[#allocation3 + $0x18] sm:$0xf] %vm12873_vm10, %v898_v10  ;;  %vm12887_vm10 = vmmov %vm12875_vm0  ;;  %v8900_v10 = vld [vmem:[#allocation2 + $0x24] sm:$0xff]  }
 0x229   : > { %4012 = vmatmul.mubr.bf16.gmra.mrb[116].mxu0 %v10670_v32  ;;  %4578 = vmatmul.mubr.bf16.gmra.mrb[68].mxu1 %v10665_v23  ;;  %995 = vst.msk [vmem:[#allocation3 + $0x18] sm:$0xf] %vm12875_vm0, %v12827_v49  ;;  %vm12893_vm0 = vnez %v12781_v12 }
 0x22a   : > { %4021 = vmatprep.mubr.bf16.mxu0 %v12827_v49  ;;  %4587 = vmatprep.mubr.bf16.mxu1 %v12827_v49 }
 0x22b   : > { %4315 = vmatpush1.bf16.msra.mxu0 %v10574_v56 }
 0x22c   : > { %4316 = vmatprep.subr.bf16.mxu0 %v10581_v57  ;;  %v8901_v57 = vld [vmem:[%s12707_s7 + $0xa0] ss:$8 sps:$4 sm:$0xff]  }
 0x22d   : > { %v11008_v39 = vld [vmem:[#allocation3 + $0x14] sm:$0xf] }
 0x22e   : > { %v5533_v60 = vsel %vm9563_vm11, %v11008_v39, 0  ;;  %vm12885_vm11 = vmmov %vm12876_vm2 }
 0x22f   : > { %4317 = vmatpush1.bf16.msra.mxu0 %v10586_v28  ;;  %v8908_v28 = vld [vmem:[%s12707_s7 + $0xb4] ss:$8 sps:$4 sm:$0xff]   ;;  %934 = vst.msk [vmem:[#allocation3 + $0x28] sm:$0xf] %vm12885_vm11, %v902_v51  ;;  %vm12902_vm11 = vnez %v12783_v24 }
 0x230   : > { %v11033_v41 = vld [vmem:[#allocation3 + $0x18] sm:$0xf]  ;;  %999 = vst.msk [vmem:[#allocation3 + $0x28] sm:$0xf] %vm12888_vm13, %v12827_v49  ;;  %vm12904_vm13 = vmmov %vm12876_vm2 }
 0x231   : > { %4022 = vmatmul.mubr.bf16.gmra.mrb[120].mxu0 %v10665_v23  ;;  %4588 = vmatmul.mubr.bf16.gmra.mrb[72].mxu1 %v10691_v30  ;;  %v8906_v23 = vld [vmem:[%s12707_s7 + $0xb0] ss:$8 sps:$4 sm:$0xff]   ;;  %v5534_v15 = vsel %vm9539_vm6, %v11033_v41, 0  ;;  %vm12889_vm6 = vnez %v12779_v37  ;;  %v8932_v37 = vld [vmem:[%s12707_s7 + $0x4] ss:$8 sps:$4 sm:$0xff]  }
 0x232   : > { %4031 = vmatprep.mubr.bf16.mxu0 %v12827_v49  ;;  %4597 = vmatprep.mubr.bf16.mxu1 %v12827_v49 }
 0x239   : > { %4032 = vmatmul.mubr.bf16.gmra.mrb[124].mxu0 %v10691_v30  ;;  %4598 = vmatmul.mubr.bf16.gmra.mrb[76].mxu1 %v10689_v42  ;;  %v10990_v30 = vld [vmem:[#allocation3 + $0x10] sm:$0xf] }
 0x23a   : > { %4041 = vmatprep.mubr.bf16.mxu0 %v12827_v49  ;;  %4607 = vmatprep.mubr.bf16.mxu1 %v12827_v49 }
 0x241   : > { %4042 = vmatmul.mubr.bf16.gmra.mrb[128].mxu0 %v10689_v42  ;;  %4608 = vmatmul.mubr.bf16.gmra.mrb[80].mxu1 %v10715_v35  ;;  %v8913_v42 = vld [vmem:[%s12707_s7 + $0xc4] ss:$8 sps:$4 sm:$0xff]  }
 0x242   : > { %4051 = vmatprep.mubr.bf16.mxu0 %v12827_v49  ;;  %4617 = vmatprep.mubr.bf16.mxu1 %v12827_v49 }
 0x249   : > { %4052 = vmatmul.mubr.bf16.gmra.mrb[132].mxu0 %v10715_v35  ;;  %4618 = vmatmul.mubr.bf16.gmra.mrb[84].mxu1 %v10713_v22  ;;  %v8895_v35 = vld [vmem:[#allocation2 + $0x14] sm:$0xff]  }
 0x24a   : > { %4061 = vmatprep.mubr.bf16.mxu0 %v12827_v49  ;;  %4627 = vmatprep.mubr.bf16.mxu1 %v12827_v49 }
 0x251   : > { %4062 = vmatmul.mubr.bf16.gmra.mrb[136].mxu0 %v10713_v22  ;;  %4628 = vmatmul.mubr.bf16.gmra.mrb[88].mxu1 %v10739_v5 }
 0x252   : > { %4071 = vmatprep.mubr.bf16.mxu0 %v12827_v49  ;;  %4637 = vmatprep.mubr.bf16.mxu1 %v12827_v49 }
 0x259   : > { %4072 = vmatmul.mubr.bf16.gmra.mrb[140].mxu0 %v10739_v5  ;;  %4638 = vmatmul.mubr.bf16.gmra.mrb[92].mxu1 %v10737_v9  ;;  %v900_v5 = vld [vmem:[%s9289_s12 + $0x1c] sm:$0xf] }
 0x25a   : > { %4081 = vmatprep.mubr.bf16.mxu0 %v12827_v49  ;;  %4647 = vmatprep.mubr.bf16.mxu1 %v12827_v49  ;;  %932 = vst.msk [vmem:[#allocation3 + $0x20] sm:$0xf] %vm12877_vm3, %v900_v5  ;;  %vm12894_vm3 = vmmov %vm12876_vm2 }
 0x25b   : > { %997 = vst.msk [vmem:[#allocation3 + $0x20] sm:$0xf] %vm12880_vm14, %v12827_v49  ;;  %vm12897_vm14 = vmmov %vm12887_vm10 }
 0x261   : > { %4082 = vmatmul.mubr.bf16.gmra.mrb[144].mxu0 %v10737_v9  ;;  %4648 = vmatmul.mubr.bf16.gmra.mrb[96].mxu1 %v10763_v3  ;;  %v899_v9 = vld [vmem:[%s9289_s12 + $0x18] sm:$0xf] }
 0x262   : > { %4091 = vmatprep.mubr.bf16.mxu0 %v12827_v49  ;;  %4657 = vmatprep.mubr.bf16.mxu1 %v12827_v49  ;;  %931 = vst.msk [vmem:[#allocation3 + $0x1c] sm:$0xf] %vm12876_vm2, %v899_v9 }
 0x263   : > { %996 = vst.msk [vmem:[#allocation3 + $0x1c] sm:$0xf] %vm12879_vm15, %v12827_v49  ;;  %vm12896_vm15 = vmmov %vm12887_vm10 }
 0x269   : > { %4092 = vmatmul.mubr.bf16.gmra.mrb[148].mxu0 %v10763_v3  ;;  %4658 = vmatmul.mubr.bf16.gmra.mrb[100].mxu1 %v10761_v54  ;;  %v8890_v3 = vld [vmem:[#allocation2 + $0x4] sm:$0xff]  }
 0x26a   : > { %4101 = vmatprep.mubr.bf16.mxu0 %v12827_v49  ;;  %4667 = vmatprep.mubr.bf16.mxu1 %v12827_v49  ;;  %v11051_v4 = vld [vmem:[#allocation3 + $0x1c] sm:$0xf] }
 0x271   : > { %4102 = vmatmul.mubr.bf16.gmra.mrb[152].mxu0 %v10761_v54  ;;  %4668 = vmatmul.mubr.bf16.gmra.mrb[104].mxu1 %v10775_v58  ;;  %v8891_v54 = vld [vmem:[%s12707_s7 + $0x80] ss:$8 sps:$4 sm:$0xff]  }
 0x272   : > { %4111 = vmatprep.mubr.bf16.mxu0 %v12827_v49  ;;  %4677 = vmatprep.mubr.bf16.mxu1 %v12827_v49 }
 0x279   : > { %4112 = vmatmul.mubr.bf16.gmra.mrb[156].mxu0 %v10775_v58  ;;  %4678 = vmatmul.mubr.bf16.gmra.mrb[108].mxu1 %v10773_v52  ;;  %v5532_v58 = vsel %vm9494_vm5, %v10990_v30, 0  ;;  %vm12884_vm5 = vmmov %vm12876_vm2 }
 0x27a   : > { %4121 = vmatprep.mubr.bf16.mxu0 %v12827_v49  ;;  %5094 = vmatprep.mubr.bf16.mxu1 %v12827_v49  ;;  %v11021_v34 = vcombine.low %v5532_v58, %v5533_v60  ;;  %933 = vst.msk [vmem:[#allocation3 + $0x24] sm:$0xf] %vm12884_vm5, %v901_v45  ;;  %vm12898_vm5 = vnez %v12787_v50  ;;  %v8904_v60 = vld [vmem:[#allocation2 + $0x2c] sm:$0xff]  }
 0x27b   : > { %998 = vst.msk [vmem:[#allocation3 + $0x24] sm:$0xf] %vm12887_vm10, %v12827_v49  ;;  %vm12903_vm10 = vmmov %vm12876_vm2 }
 0x281   : > { %4122 = vmatmul.mubr.bf16.gmra.mrb[160].mxu0 %v10773_v52  ;;  %5095 = vmatmul.mubr.bf16.vlgmr.msra.gmra.mrb[112].mxu1 %v8890_v3  ;;  %v8921_v3 = vld [vmem:[%s12707_s7 + $0xe0] ss:$8 sps:$4 sm:$0xff]  }
 0x282   : > { %5771 = vmatpush1.bf16.msra.mxu1 %v8891_v54  ;;  %4131 = vmatprep.mubr.bf16.mxu0 %v12827_v49  ;;  %v5535_v54 = vsel %vm12889_vm6, %v11051_v4, 0  ;;  %v11091_v9 = vld [vmem:[#allocation3 + $0x24] sm:$0xf]  ;;  %vm12906_vm6 = vmmov %vm12897_vm14 }
 0x283   : > { %5104 = vmatprep.mubr.bf16.mxu1 %v12827_v49  ;;  %5772 = vmatprep.subr.bf16.mxu1 %v8898_v2  ;;  %v11064_v2 = vcombine.low %v5534_v15, %v5535_v54  ;;  %v5537_v12 = vsel %vm12898_vm5, %v11091_v9, 0  ;;  %v8905_v54 = vld [vmem:[#allocation2 + $0x34] sm:$0xff]  }
 0x284   : > { %v10957_v47 = vpop.f32.mrb[56].mxu0 }
 0x285   : > { %v10959_v0 = vpop.f32.mrb[57].mxu0 }
 0x286   : > { %v10963_v44 = vpop.f32.mrb[58].mxu0  ;;  %5773 = vmatpush1.bf16.msra.mxu1 %v8896_v31  ;;  %v8926_v31 = vld [vmem:[%s12707_s7 + $0xf0] ss:$8 sps:$4 sm:$0xff]  }
 0x287   : > { %v10967_v56 = vpop.f32.mrb[59].mxu0  ;;  %5774 = vmatprep.subr.bf16.mxu1 %v8903_v18 }
 0x289   : > { %4132 = vmatmul.mubr.bf16.gmra.mrb[164].mxu0 %v10787_v53  ;;  %5105 = vmatmul.mubr.bf16.gmra.mrb[116].mxu1 %v8894_v6  ;;  %v11076_v6 = vld [vmem:[#allocation3 + $0x20] sm:$0xf] }
 0x28a   : > { %4334 = vmatprep.mubr.bf16.mxu0 %v12827_v49  ;;  %5114 = vmatprep.mubr.bf16.mxu1 %v12827_v49 }
 0x28b   : > { %5775 = vmatpush1.bf16.msra.mxu1 %v8901_v57  ;;  %v903_v57 = vld [vmem:[%s9289_s12 + $0x28] sm:$0xf] }
 0x28c   : > { %v10985_v32 = vpop.f32.mrb[60].mxu0  ;;  %5776 = vmatprep.subr.bf16.mxu1 %v8908_v28  ;;  %v904_v28 = vld [vmem:[%s9289_s12 + $0x2c] sm:$0xf]  ;;  %935 = vst.msk [vmem:[#allocation3 + $0x2c] sm:$0xf] %vm12876_vm2, %v903_v57  ;;  %vm12908_vm2 = vnez %v12791_v25 }
 0x28d   : > { %v10992_v22 = vpop.f32.mrb[61].mxu0  ;;  %936 = vst.msk [vmem:[#allocation3 + $0x30] sm:$0xf] %vm12894_vm3, %v904_v28 }
 0x28e   : > { %v10996_v52 = vpop.f32.mrb[62].mxu0  ;;  %1000 = vst.msk [vmem:[#allocation3 + $0x2c] sm:$0xf] %vm12896_vm15, %v12827_v49  ;;  %vm12912_vm15 = vmmov %vm12894_vm3 }
 0x28f   : > { %v11003_v53 = vpop.f32.mrb[63].mxu0  ;;  %5777 = vmatpush1.bf16.msra.mxu1 %v8906_v23  ;;  %1001 = vst.msk [vmem:[#allocation3 + $0x30] sm:$0xf] %vm12897_vm14, %v12827_v49 }
 0x290   : > { %12878 = vst [vmem:[#allocation16_spill] sm:$0xff] %v11003_v53  ;;  %5778 = vmatprep.subr.bf16.mxu1 %v8913_v42  ;;  %v5536_v42 = vsel %vm12893_vm0, %v11076_v6, 0  ;;  %vm12907_vm0 = vmmov %vm12906_vm6 }
 0x291   : > { %4335 = vmatmul.mubr.bf16.vlgmr.msra.gmra.mrb[40].mxu0 %v12827_v49  ;;  %5115 = vmatmul.mubr.bf16.gmra.mrb[120].mxu1 %v8895_v35  ;;  %v11101_v5 = vcombine.low %v5536_v42, %v5537_v12  ;;  %vm12914_vm14 = vmmov %vm12907_vm0 }
 0x292   : > { %4344 = vmatprep.mubr.bf16.mxu0 %v12827_v49  ;;  %5124 = vmatprep.mubr.bf16.mxu1 %v12827_v49  ;;  %vm12915_vm5 = vmmov %vm12907_vm0 }
 0x293   : > { %5779 = vmatpush1.bf16.msra.mxu1 %v8911_v36  ;;  %v11107_v36 = vld [vmem:[#allocation3 + $0x28] sm:$0xf] }
 0x294   : > { %v11028_v17 = vpop.f32.mrb[64].mxu0  ;;  %5780 = vmatprep.subr.bf16.mxu1 %v8918_v48 }
 0x295   : > { %12881 = vst [vmem:[#allocation17_spill] sm:$0xff] %v11028_v17  ;;  %v11035_v40 = vpop.f32.mrb[65].mxu0  ;;  %v11122_v45 = vld [vmem:[#allocation3 + $0x2c] sm:$0xf] }
 0x296   : > { %12882 = vst [vmem:[#allocation18_spill] sm:$0xff] %v11035_v40  ;;  %v11039_v55 = vpop.f32.mrb[66].mxu0  ;;  %v5539_v24 = vsel %vm12908_vm2, %v11122_v45, 0  ;;  %vm12939_vm2 = vmmov %vm12894_vm3 }
 0x297   : > { %12883 = vst [vmem:[#allocation19_spill] sm:$0xff] %v11039_v55  ;;  %v11046_v16 = vpop.f32.mrb[67].mxu0  ;;  %5781 = vmatpush1.bf16.msra.mxu1 %v8916_v33  ;;  %v905_v33 = vld [vmem:[%s9289_s12 + $0x30] sm:$0xf] }
 0x298   : > { %12886 = vst [vmem:[#allocation20_spill] sm:$0xff] %v11046_v16  ;;  %5782 = vmatprep.subr.bf16.mxu1 %v8923_v26  ;;  %v906_v26 = vld [vmem:[%s9289_s12 + $0x34] sm:$0xf]  ;;  %937 = vst.msk [vmem:[#allocation3 + $0x34] sm:$0xf] %vm12903_vm10, %v905_v33  ;;  %v8909_v33 = vld [vmem:[#allocation2 + $0x3c] sm:$0xff]  }
 0x299   : > { %4345 = vmatmul.mubr.bf16.gmra.mrb[44].mxu0 %v12827_v49  ;;  %5125 = vmatmul.mubr.bf16.gmra.mrb[124].mxu1 %v8899_v13  ;;  %938 = vst.msk [vmem:[#allocation3 + $0x38] sm:$0xf] %vm12904_vm13, %v906_v26  ;;  %v909_v26 = vld [vmem:[%s9289_s12 + $0x40] sm:$0xf]  ;;  %vm12923_vm10 = vmmov %vm12907_vm0  ;;  %v9185_v55 = vld [vmem:[#allocation3 + $0x8] sm:$0xf] }
 0x29a   : > { %4354 = vmatprep.mubr.bf16.mxu0 %v12827_v49  ;;  %5134 = vmatprep.mubr.bf16.mxu1 %v12827_v49  ;;  %1002 = vst.msk [vmem:[#allocation3 + $0x34] sm:$0xf] %vm12906_vm6, %v12827_v49  ;;  %vm12931_vm13 = vmmov %vm12907_vm0 }
 0x29b   : > { %5783 = vmatpush1.bf16.msra.mxu1 %v8921_v3  ;;  %1003 = vst.msk [vmem:[#allocation3 + $0x38] sm:$0xf] %vm12907_vm0, %v12827_v49  ;;  %v11138_v3 = vld [vmem:[#allocation3 + $0x30] sm:$0xf]  ;;  %vm12932_vm6 = vmmov %vm12907_vm0 }
 0x29c   : > { %v11071_v18 = vpop.f32.mrb[68].mxu0  ;;  %5784 = vmatprep.subr.bf16.mxu1 %v8928_v14 }
 0x29d   : > { %12890 = vst [vmem:[#allocation21_spill] sm:$0xff] %v11071_v18  ;;  %v11078_v62 = vpop.f32.mrb[69].mxu0 }
 0x29e   : > { %12891 = vst [vmem:[#allocation22_spill] sm:$0xff] %v11078_v62  ;;  %v11082_v23 = vpop.f32.mrb[70].mxu0 }
 0x29f   : > { %12892 = vst [vmem:[#allocation23_spill] sm:$0xff] %v11082_v23  ;;  %v11089_v35 = vpop.f32.mrb[71].mxu0  ;;  %5785 = vmatpush1.bf16.msra.mxu1 %v8926_v31  ;;  %v907_v31 = vld [vmem:[%s9289_s12 + $0x38] sm:$0xf] }
 0x2a0   : > { %12895 = vst [vmem:[#allocation24_spill] sm:$0xff] %v11089_v35  ;;  %6294 = vmatprep.subr.bf16.mxu1 %v8932_v37  ;;  %v908_v37 = vld [vmem:[%s9289_s12 + $0x3c] sm:$0xf]  ;;  %939 = vst.msk [vmem:[#allocation3 + $0x3c] sm:$0xf] %vm12894_vm3, %v907_v31 }
 0x2a1   : > { %4355 = vmatmul.mubr.bf16.gmra.mrb[48].mxu0 %v10657_v38  ;;  %5135 = vmatmul.mubr.bf16.gmra.mrb[0].mxu1 %v8900_v10  ;;  %v5538_v38 = vsel %vm12902_vm11, %v11107_v36, 0  ;;  %940 = vst.msk [vmem:[#allocation3 + $0x40] sm:$0xf] %vm12912_vm15, %v908_v37  ;;  %v11153_v57 = vld [vmem:[#allocation3 + $0x34] sm:$0xf]  ;;  %vm12922_vm11 = vmmov %vm12907_vm0  ;;  %vm12933_vm0 = vnez %v12804_v27 }
 0x2a2   : > { %4364 = vmatprep.mubr.bf16.mxu0 %v12827_v49  ;;  %5144 = vmatprep.mubr.bf16.mxu1 %v12827_v49  ;;  %v11132_v51 = vcombine.low %v5538_v38, %v5539_v24  ;;  %1004 = vst.msk [vmem:[#allocation3 + $0x3c] sm:$0xf] %vm12914_vm14, %v12827_v49  ;;  %v5541_v59 = vsel %vm9770_vm12, %v11153_v57, 0  ;;  %v11167_v12 = vld [vmem:[#allocation3 + $0x38] sm:$0xf]  ;;  %vm12920_vm12 = vmmov %vm12894_vm3 }
 0x2a3   : > { %1005 = vst.msk [vmem:[#allocation3 + $0x40] sm:$0xf] %vm12915_vm5, %v12827_v49  ;;  %v910_v38 = vld [vmem:[%s9289_s12 + $0x44] sm:$0xf]  ;;  %v5542_v19 = vsel %vm9748_vm4, %v11167_v12, 0  ;;  %vm12928_vm4 = vmmov %vm12894_vm3 }
 0x2a4   : > { %v11105_v58 = vpop.f32.mrb[72].mxu0  ;;  %942 = vst.msk [vmem:[#allocation3 + $0x48] sm:$0xf] %vm12920_vm12, %v910_v38  ;;  %vm12942_vm15 = vmmov %vm12915_vm5 }
 0x2a5   : > { %12899 = vst [vmem:[#allocation25_spill] sm:$0xff] %v11105_v58  ;;  %v11109_v48 = vpop.f32.mrb[73].mxu0  ;;  %1007 = vst.msk [vmem:[#allocation3 + $0x48] sm:$0xf] %vm12923_vm10, %v12827_v49 }
 0x2a6   : > { %12900 = vst [vmem:[#allocation26_spill] sm:$0xff] %v11109_v48  ;;  %v11113_v50 = vpop.f32.mrb[74].mxu0  ;;  %vm12943_vm14 = vmmov %vm12915_vm5 }
 0x2a7   : > { %12901 = vst [vmem:[#allocation27_spill] sm:$0xff] %v11113_v50  ;;  %v11120_v13 = vpop.f32.mrb[75].mxu0  ;;  %vm12951_vm12 = vmmov %vm12939_vm2  ;;  %v918_v50 = vld [vmem:[%s9289_s12 + $0x64] sm:$0xf] }
 0x2a8   : > { %12905 = vst [vmem:[#allocation28_spill] sm:$0xff] %v11120_v13  ;;  %v12949_v13 = vld [vmem:[#allocation11_spill] sm:$0xff]  ;;  %vm12954_vm10 = vmmov %vm12932_vm6 }
 0x2a9   : > { %4365 = vmatmul.mubr.bf16.gmra.mrb[52].mxu0 %v10655_v29  ;;  %5145 = vmatmul.mubr.bf16.gmra.mrb[4].mxu1 %v8904_v60  ;;  %v5540_v29 = vsel %vm9681_vm9, %v11138_v3, 0  ;;  %vm12919_vm9 = vmmov %vm12894_vm3  ;;  %v11182_v31 = vld [vmem:[#allocation3 + $0x3c] sm:$0xf] }
 0x2aa   : > { %5154 = vmatprep.mubr.bf16.mxu1 %v12827_v49  ;;  %6943 = vmatprep.mubr.bf16.mxu0 %v12827_v49  ;;  %v11162_v28 = vcombine.low %v5540_v29, %v5541_v59  ;;  %941 = vst.msk [vmem:[#allocation3 + $0x44] sm:$0xf] %vm12919_vm9, %v909_v26  ;;  %v5543_v8 = vsel %vm9815_vm7, %v11182_v31, 0  ;;  %v11196_v26 = vld [vmem:[#allocation3 + $0x40] sm:$0xf]  ;;  %vm12929_vm7 = vmmov %vm12894_vm3  ;;  %vm12950_vm9 = vnez %v12949_v13 }
 0x2ab   : > { %1006 = vst.msk [vmem:[#allocation3 + $0x44] sm:$0xf] %vm12922_vm11, %v12827_v49  ;;  %v11191_v29 = vcombine.low %v5542_v19, %v5543_v8  ;;  %vm12940_vm3 = vmmov %vm12939_vm2 }
 0x2ac   : > { %v11136_v15 = vpop.f32.mrb[76].mxu0  ;;  %vm12952_vm11 = vmmov %vm12939_vm2 }
 0x2ad   : > { %12909 = vst [vmem:[#allocation29_spill] sm:$0xff] %v11136_v15  ;;  %v11140_v14 = vpop.f32.mrb[77].mxu0 }
 0x2ae   : > { %12910 = vst [vmem:[#allocation30_spill] sm:$0xff] %v11140_v14  ;;  %v11144_v25 = vpop.f32.mrb[78].mxu0  ;;  %v916_v14 = vld [vmem:[%s9289_s12 + $0x5c] sm:$0xf] }
 0x2af   : > { %12911 = vst [vmem:[#allocation31_spill] sm:$0xff] %v11144_v25  ;;  %v11151_v10 = vpop.f32.mrb[79].mxu0  ;;  %v12937_v25 = vld [vmem:[#allocation10_spill] sm:$0xff]  ;;  %948 = vst.msk [vmem:[#allocation3 + $0x60] sm:$0xf] %vm12952_vm11, %v916_v14 }
 0x2b0   : > { %12913 = vst [vmem:[#allocation32_spill] sm:$0xff] %v11151_v10 }
 0x2b1   : > { %5155 = vmatmul.mubr.bf16.gmra.mrb[8].mxu1 %v8905_v54 }
 0x2b2   : > { %5164 = vmatprep.mubr.bf16.mxu1 %v12827_v49  ;;  %v11211_v37 = vld [vmem:[#allocation3 + $0x44] sm:$0xf] }
 0x2b3   : > { %v5545_v20 = vsel %vm12933_vm0, %v11211_v37, 0  ;;  %vm12963_vm0 = vmmov %vm12939_vm2 }
 0x2b4   : > { %v11165_v42 = vpop.f32.mrb[80].mxu0  ;;  %950 = vst.msk [vmem:[#allocation3 + $0x68] sm:$0xf] %vm12963_vm0, %v918_v50  ;;  %vm12981_vm11 = vmmov %vm12963_vm0 }
 0x2b5   : > { %12916 = vst [vmem:[#allocation33_spill] sm:$0xff] %v11165_v42  ;;  %v11169_v60 = vpop.f32.mrb[81].mxu0 }
 0x2b6   : > { %12917 = vst [vmem:[#allocation34_spill] sm:$0xff] %v11169_v60  ;;  %v11173_v24 = vpop.f32.mrb[82].mxu0  ;;  %v912_v60 = vld [vmem:[%s9289_s12 + $0x4c] sm:$0xf] }
 0x2b7   : > { %12918 = vst [vmem:[#allocation35_spill] sm:$0xff] %v11173_v24  ;;  %v11180_v54 = vpop.f32.mrb[83].mxu0  ;;  %v911_v24 = vld [vmem:[%s9289_s12 + $0x48] sm:$0xf]  ;;  %944 = vst.msk [vmem:[#allocation3 + $0x50] sm:$0xf] %vm12929_vm7, %v912_v60 }
 0x2b8   : > { %12921 = vst [vmem:[#allocation36_spill] sm:$0xff] %v11180_v54  ;;  %v8910_v54 = vld [vmem:[#allocation2 + $0x44] sm:$0xff]   ;;  %943 = vst.msk [vmem:[#allocation3 + $0x4c] sm:$0xf] %vm12928_vm4, %v911_v24  ;;  %v11225_v24 = vld [vmem:[#allocation3 + $0x48] sm:$0xf] }
 0x2b9   : > { %5165 = vmatmul.mubr.bf16.gmra.mrb[12].mxu1 %v8909_v33  ;;  %v5544_v33 = vsel %vm9823_vm8, %v11196_v26, 0  ;;  %1008 = vst.msk [vmem:[#allocation3 + $0x4c] sm:$0xf] %vm12931_vm13, %v12827_v49  ;;  %vm12938_vm8 = vnez %v12937_v25  ;;  %vm12955_vm4 = vmmov %vm12932_vm6  ;;  %vm12961_vm13 = vnez %v12829_v1 }
 0x2ba   : > { %5174 = vmatprep.mubr.bf16.mxu1 %v12827_v49  ;;  %1009 = vst.msk [vmem:[#allocation3 + $0x50] sm:$0xf] %vm12932_vm6, %v12827_v49  ;;  %v11220_v8 = vcombine.low %v5544_v33, %v5545_v20  ;;  %v5546_v27 = vsel %vm12938_vm8, %v11225_v24, 0  ;;  %v12944_v20 = vld [vmem:[#allocation12_spill] sm:$0xff]  ;;  %vm12962_vm6 = vmmov %vm12939_vm2 }
 0x2bb   : > { %vm12945_vm5 = vnez %v12944_v20  ;;  %1013 = vst.msk [vmem:[#allocation3 + $0x60] sm:$0xf] %vm12955_vm4, %v12827_v49  ;;  %vm12965_vm8 = vmmov %vm12955_vm4 }
 0x2bc   : > { %v11194_v59 = vpop.f32.mrb[84].mxu0 }
 0x2bd   : > { %12925 = vst [vmem:[#allocation9_spill] sm:$0xff] %v11194_v59  ;;  %v11198_v38 = vpop.f32.mrb[85].mxu0  ;;  %v914_v59 = vld [vmem:[%s9289_s12 + $0x54] sm:$0xf] }
 0x2be   : > { %12926 = vst [vmem:[#allocation37_spill] sm:$0xff] %v11198_v38  ;;  %v11202_v42 = vpop.f32.mrb[86].mxu0  ;;  %v913_v38 = vld [vmem:[%s9289_s12 + $0x50] sm:$0xf]  ;;  %946 = vst.msk [vmem:[#allocation3 + $0x58] sm:$0xf] %vm12940_vm3, %v914_v59  ;;  %vm12967_vm3 = vnez %v12835_v7 }
 0x2bf   : > { %12927 = vst [vmem:[#allocation38_spill] sm:$0xff] %v11202_v42  ;;  %v11209_v19 = vpop.f32.mrb[87].mxu0  ;;  %v8914_v42 = vld [vmem:[#allocation2 + $0x4c] sm:$0xff]   ;;  %945 = vst.msk [vmem:[#allocation3 + $0x54] sm:$0xf] %vm12939_vm2, %v913_v38 }
 0x2c0   : > { %12930 = vst [vmem:[#allocation39_spill] sm:$0xff] %v11209_v19  ;;  %v11240_v33 = vld [vmem:[#allocation3 + $0x4c] sm:$0xf]  ;;  %1010 = vst.msk [vmem:[#allocation3 + $0x54] sm:$0xf] %vm12942_vm15, %v12827_v49 }
 0x2c1   : > { %5175 = vmatmul.mubr.bf16.gmra.mrb[16].mxu1 %v8910_v54  ;;  %1011 = vst.msk [vmem:[#allocation3 + $0x58] sm:$0xf] %vm12943_vm14, %v12827_v49  ;;  %v5547_v25 = vsel %vm12945_vm5, %v11240_v33, 0  ;;  %v11254_v38 = vld [vmem:[#allocation3 + $0x50] sm:$0xf]  ;;  %vm12966_vm2 = vmmov %vm12955_vm4 }
 0x2c2   : > { %5184 = vmatprep.mubr.bf16.mxu1 %v12827_v49  ;;  %1015 = vst.msk [vmem:[#allocation3 + $0x68] sm:$0xf] %vm12966_vm2, %v12827_v49  ;;  %vm12971_vm15 = vmmov %vm12963_vm0 }
 0x2c3   : > { %vm12972_vm14 = vmmov %vm12963_vm0 }
 0x2c4   : > { %v11223_v60 = vpop.f32.mrb[88].mxu0  ;;  %vm12974_vm5 = vmmov %vm12966_vm2 }
 0x2c5   : > { %12934 = vst [vmem:[#allocation40_spill] sm:$0xff] %v11223_v60  ;;  %v11227_v19 = vpop.f32.mrb[89].mxu0  ;;  %v915_v60 = vld [vmem:[%s9289_s12 + $0x58] sm:$0xf]  ;;  %vm12984_vm4 = vmmov %vm12966_vm2 }
 0x2c6   : > { %12935 = vst [vmem:[#allocation41_spill] sm:$0xff] %v11227_v19  ;;  %v11231_v10 = vpop.f32.mrb[90].mxu0  ;;  %v8915_v19 = vld [vmem:[#allocation2 + $0x54] sm:$0xff]   ;;  %947 = vst.msk [vmem:[#allocation3 + $0x5c] sm:$0xf] %vm12951_vm12, %v915_v60  ;;  %vm12976_vm12 = vnez %v12842_v21 }
 0x2c7   : > { %12936 = vst [vmem:[#allocation42_spill] sm:$0xff] %v11231_v10  ;;  %v11238_v54 = vpop.f32.mrb[91].mxu0  ;;  %v11249_v10 = vcombine.low %v5546_v27, %v5547_v25  ;;  %v11269_v20 = vld [vmem:[#allocation3 + $0x54] sm:$0xf]  ;;  %1012 = vst.msk [vmem:[#allocation3 + $0x5c] sm:$0xf] %vm12954_vm10, %v12827_v49 }
 0x2c8   : > { %12941 = vst [vmem:[#allocation10_spill] sm:$0xff] %v11238_v54  ;;  %v12956_v25 = vld [vmem:[#allocation13_spill] sm:$0xff]  ;;  %v11283_v60 = vld [vmem:[#allocation3 + $0x58] sm:$0xf]  ;;  %vm12983_vm10 = vmmov %vm12966_vm2 }
 0x2c9   : > { %5185 = vmatmul.mubr.bf16.gmra.mrb[20].mxu1 %v8914_v42  ;;  %v5548_v42 = vsel %vm12950_vm9, %v11254_v38, 0  ;;  %vm12957_vm7 = vnez %v12956_v25  ;;  %vm12975_vm9 = vmmov %vm12966_vm2 }
 0x2ca   : > { %5194 = vmatprep.mubr.bf16.mxu1 %v12827_v49  ;;  %v5549_v13 = vsel %vm12957_vm7, %v11269_v20, 0  ;;  %vm12989_vm7 = vmmov %vm12963_vm0 }
 0x2cc   : > { %v11252_v59 = vpop.f32.mrb[92].mxu0 }
 0x2cd   : > { %12946 = vst [vmem:[#allocation12_spill] sm:$0xff] %v11252_v59  ;;  %v11256_v54 = vpop.f32.mrb[93].mxu0  ;;  %v917_v59 = vld [vmem:[%s9289_s12 + $0x60] sm:$0xf] }
 0x2ce   : > { %12947 = vst [vmem:[#allocation43_spill] sm:$0xff] %v11256_v54  ;;  %v11260_v15 = vpop.f32.mrb[94].mxu0  ;;  %v8919_v54 = vld [vmem:[#allocation2 + $0x5c] sm:$0xff]   ;;  %949 = vst.msk [vmem:[#allocation3 + $0x64] sm:$0xf] %vm12962_vm6, %v917_v59 }
 0x2cf   : > { %12948 = vst [vmem:[#allocation44_spill] sm:$0xff] %v11260_v15  ;;  %v11267_v27 = vpop.f32.mrb[95].mxu0  ;;  %v11278_v15 = vcombine.low %v5548_v42, %v5549_v13  ;;  %v11298_v25 = vld [vmem:[#allocation3 + $0x5c] sm:$0xf]  ;;  %1014 = vst.msk [vmem:[#allocation3 + $0x64] sm:$0xf] %vm12965_vm8, %v12827_v49 }
 0x2d0   : > { %12953 = vst [vmem:[#allocation11_spill] sm:$0xff] %v11267_v27  ;;  %v5551_v1 = vsel %vm12967_vm3, %v11298_v25, 0  ;;  %v11312_v59 = vld [vmem:[#allocation3 + $0x60] sm:$0xf]  ;;  %vm12991_vm6 = vmmov %vm12966_vm2  ;;  %vm13001_vm8 = vsmask.f32 4352 }
 0x2d1   : > { %5195 = vmatmul.mubr.bf16.gmra.mrb[24].mxu1 %v8915_v19  ;;  %v5550_v19 = vsel %vm12961_vm13, %v11283_v60, 0  ;;  %v5552_v7 = vsel %vm10011_vm1, %v11312_v59, 0  ;;  %vm12980_vm1 = vmmov %vm12963_vm0 }
 0x2d2   : > { %5204 = vmatprep.mubr.bf16.mxu1 %v12827_v49  ;;  %v11307_v13 = vcombine.low %v5550_v19, %v5551_v1  ;;  %vm12990_vm13 = vmmov %vm12963_vm0 }
 0x2d3   : > { %vm12992_vm0 = vmmov %vm12966_vm2 }
 0x2d4   : > { %v11281_v14 = vpop.f32.mrb[96].mxu0  ;;  %vm13006_vm2 = vmmov %vm13001_vm8 }
 0x2d5   : > { %12958 = vst [vmem:[#allocation13_spill] sm:$0xff] %v11281_v14  ;;  %v11285_v27 = vpop.f32.mrb[97].mxu0  ;;  %v920_v14 = vld [vmem:[%s9289_s12 + $0x6c] sm:$0xf] }
 0x2d6   : > { %12959 = vst [vmem:[#allocation45_spill] sm:$0xff] %v11285_v27  ;;  %v11289_v48 = vpop.f32.mrb[98].mxu0  ;;  %v919_v27 = vld [vmem:[%s9289_s12 + $0x68] sm:$0xf]  ;;  %952 = vst.msk [vmem:[#allocation3 + $0x70] sm:$0xf] %vm12972_vm14, %v920_v14 }
 0x2d7   : > { %12960 = vst [vmem:[#allocation46_spill] sm:$0xff] %v11289_v48  ;;  %v11296_v42 = vpop.f32.mrb[99].mxu0  ;;  %v8920_v48 = vld [vmem:[#allocation2 + $0x64] sm:$0xff]   ;;  %951 = vst.msk [vmem:[#allocation3 + $0x6c] sm:$0xf] %vm12971_vm15, %v919_v27  ;;  %vm13013_vm15 = vnez %v12844_v11  ;;  %v6082_v11 = vshrl.u32 %v11101_v5, 16 }
 0x2d8   : > { %12964 = vst [vmem:[#allocation47_spill] sm:$0xff] %v11296_v42  ;;  %v11327_v19 = vld [vmem:[#allocation3 + $0x64] sm:$0xf]  ;;  %1016 = vst.msk [vmem:[#allocation3 + $0x6c] sm:$0xf] %vm12974_vm5, %v12827_v49  ;;  %vm13018_vm5 = vnez %v12846_v43 }
 0x2d9   : > { %5205 = vmatmul.mubr.bf16.gmra.mrb[28].mxu1 %v8919_v54  ;;  %1017 = vst.msk [vmem:[#allocation3 + $0x70] sm:$0xf] %vm12975_vm9, %v12827_v49  ;;  %v5553_v61 = vsel %vm12976_vm12, %v11327_v19, 0  ;;  %vm13014_vm14 = vmmov %vm13006_vm2  ;;  %vm13020_vm9 = vnez %v12850_v63 }
 0x2da   : > { %5214 = vmatprep.mubr.bf16.mxu1 %v12827_v49  ;;  %v11336_v1 = vcombine.low %v5552_v7, %v5553_v61  ;;  %v8925_v61 = vld [vmem:[#allocation2 + $0x74] sm:$0xff]   ;;  %vm13021_vm12 = vmmov %vm13006_vm2 }
 0x2dc   : > { %v11310_v50 = vpop.f32.mrb[100].mxu0 }
 0x2dd   : > { %12968 = vst [vmem:[#allocation48_spill] sm:$0xff] %v11310_v50  ;;  %v11314_v42 = vpop.f32.mrb[101].mxu0 }
 0x2de   : > { %12969 = vst [vmem:[#allocation49_spill] sm:$0xff] %v11314_v42  ;;  %v11318_v58 = vpop.f32.mrb[102].mxu0  ;;  %v922_v42 = vld [vmem:[%s9289_s12 + $0x74] sm:$0xf] }
 0x2df   : > { %12970 = vst [vmem:[#allocation50_spill] sm:$0xff] %v11318_v58  ;;  %v11325_v54 = vpop.f32.mrb[103].mxu0  ;;  %v921_v58 = vld [vmem:[%s9289_s12 + $0x70] sm:$0xf]  ;;  %954 = vst.msk [vmem:[#allocation3 + $0x78] sm:$0xf] %vm12981_vm11, %v922_v42 }
 0x2e0   : > { %12973 = vst [vmem:[#allocation51_spill] sm:$0xff] %v11325_v54  ;;  %v8924_v54 = vld [vmem:[#allocation2 + $0x6c] sm:$0xff]   ;;  %953 = vst.msk [vmem:[#allocation3 + $0x74] sm:$0xf] %vm12980_vm1, %v921_v58  ;;  %v923_v42 = vld [vmem:[%s9289_s12 + $0x78] sm:$0xf]  ;;  %vm13025_vm1 = vnez %v12848_v46 }
 0x2e1   : > { %5215 = vmatmul.mubr.bf16.gmra.mrb[32].mxu1 %v8920_v48  ;;  %1018 = vst.msk [vmem:[#allocation3 + $0x74] sm:$0xf] %vm12983_vm10, %v12827_v49  ;;  %vm13029_vm10 = vmmov %vm13006_vm2  ;;  %v6100_v46 = vshrl.u32 %v11162_v28, 16 }
 0x2e2   : > { %5224 = vmatprep.mubr.bf16.mxu1 %v12827_v49  ;;  %1019 = vst.msk [vmem:[#allocation3 + $0x78] sm:$0xf] %vm12984_vm4, %v12827_v49  ;;  %vm13034_vm4 = vmmov %vm13006_vm2 }
 0x2e3   : > { %955 = vst.msk [vmem:[#allocation3 + $0x7c] sm:$0xf] %vm12989_vm7, %v923_v42  ;;  %vm13039_vm7 = vmmov %vm13006_vm2 }
 0x2e4   : > { %v11339_v27 = vpop.f32.mrb[104].mxu0  ;;  %1020 = vst.msk [vmem:[#allocation3 + $0x7c] sm:$0xf] %vm12991_vm6, %v12827_v49  ;;  %vm13049_vm6 = vmmov %vm13006_vm2 }
 0x2e5   : > { %12977 = vst [vmem:[#allocation52_spill] sm:$0xff] %v11339_v27  ;;  %v11341_v14 = vpop.f32.mrb[105].mxu0 }
 0x2e6   : > { %12978 = vst [vmem:[#allocation53_spill] sm:$0xff] %v11341_v14  ;;  %v11345_v50 = vpop.f32.mrb[106].mxu0 }
 0x2e7   : > { %12979 = vst [vmem:[#allocation54_spill] sm:$0xff] %v11345_v50  ;;  %v11349_v21 = vpop.f32.mrb[107].mxu0 }
 0x2e8   : > { %12982 = vst [vmem:[#allocation55_spill] sm:$0xff] %v11349_v21  ;;  %v924_v21 = vld [vmem:[%s9289_s12 + $0x7c] sm:$0xf] }
 0x2e9   : > { %5225 = vmatmul.mubr.bf16.gmra.mrb[36].mxu1 %v8924_v54  ;;  %956 = vst.msk [vmem:[#allocation3 + $0x80] sm:$0xf] %vm12990_vm13, %v924_v21  ;;  %vm13044_vm13 = vmmov %vm13006_vm2 }
 0x2ea   : > { %5234 = vmatprep.mubr.bf16.mxu1 %v12827_v49  ;;  %1021 = vst.msk [vmem:[#allocation3 + $0x80] sm:$0xf] %vm12992_vm0, %v12827_v49  ;;  %vm13054_vm0 = vmmov %vm13006_vm2 }
 0x2ec   : > { %v11356_v48 = vpop.f32.mrb[108].mxu0 }
 0x2ed   : > { %12985 = vst [vmem:[#allocation56_spill] sm:$0xff] %v11356_v48  ;;  %v11358_v7 = vpop.f32.mrb[109].mxu0  ;;  %v12995_v48 = vld [vmem:[#allocation8_spill] sm:$0xff] }
 0x2ee   : > { %12986 = vst [vmem:[#allocation57_spill] sm:$0xff] %v11358_v7  ;;  %v11360_v50 = vpop.f32.mrb[110].mxu0  ;;  %v6055_v14 = vshrl.u32 %v12995_v48, 16  ;;  %v6058_v42 = vshll.u32 %v12995_v48, 16 }
 0x2ef   : > { %12987 = vst [vmem:[#allocation58_spill] sm:$0xff] %v11360_v50  ;;  %v11362_v58 = vpop.f32.mrb[111].mxu0  ;;  %v12994_v50 = vld [vmem:[#allocation7_spill] sm:$0xff] }
 0x2f0   : > { %12988 = vst [vmem:[#allocation59_spill] sm:$0xff] %v11362_v58  ;;  %v6047_v7 = vshrl.u32 %v12994_v50, 16  ;;  %v6050_v58 = vshll.u32 %v12994_v50, 16  ;;  %v6057_v18 = vrot.slane %v6055_v14, 3  ;;  %v6060_v16 = vrot.slane %v6058_v42, 4 }
 0x2f1   : > { %5235 = vmatmul.mubr.bf16.gmra.mrb[40].mxu1 %v8925_v61  ;;  %v8929_v61 = vld [vmem:[#allocation2 + $0x7c] sm:$0xff]   ;;  %v9184_v50 = vld [vmem:[#allocation3 + $0x4] sm:$0xf] }
 0x2f2   : > { %5244 = vmatprep.mubr.bf16.mxu1 %v12827_v49  ;;  %v6049_v23 = vrot.slane %v6047_v7, 3  ;;  %v6052_v62 = vrot.slane %v6050_v58, 4  ;;  %v7675_v40 = vcombine.low %v9184_v50, %v9185_v55  ;;  %v6061_v17 = vor.u32 %v6060_v16, %v6057_v18  ;;  %v8930_v7 = vld [vmem:[%s12707_s7] ss:$8 sps:$4 sm:$0xff]   ;;  %v8936_v58 = vld [vmem:[%s12707_s7 + $0x14] ss:$8 sps:$4 sm:$0xff]  }
 0x2f3   : > { %v8934_v55 = vld [vmem:[%s12707_s7 + $0x10] ss:$8 sps:$4 sm:$0xff]   ;;  %v8941_v16 = vld [vmem:[%s12707_s7 + $0x24] ss:$8 sps:$4 sm:$0xff]   ;;  %v6064_v18 = vshrl.u32 %v11021_v34, 16 }
 0x2f4   : > { %v11373_v54 = vpop.f32.mrb[112].mxu0  ;;  %v6053_v48 = vor.u32 %v6052_v62, %v6049_v23  ;;  %v6067_v62 = vshll.u32 %v11021_v34, 16  ;;  %v8946_v34 = vld [vmem:[%s12707_s7 + $0x34] ss:$8 sps:$4 sm:$0xff]  }
 0x2f5   : > { %12993 = vst [vmem:[#allocation60_spill] sm:$0xff] %v11373_v54  ;;  %v11379_v21 = vpop.f32.mrb[113].mxu0 }
 0x2f6   : > { %12996 = vst [vmem:[#allocation7_spill] sm:$0xff] %v11379_v21  ;;  %v11381_v27 = vpop.f32.mrb[114].mxu0  ;;  %v11401_v42 = vsel %vm13001_vm8, %v6053_v48, %v6061_v17  ;;  %v6066_v48 = vrot.slane %v6064_v18, 3  ;;  %v6073_v18 = vshrl.u32 %v11064_v2, 16  ;;  %vm13059_vm8 = vmmov %vm13054_vm0 }
 0x2f7   : > { %v11383_v35 = vpop.f32.mrb[115].mxu0 }
 0x2f9   : > { %5245 = vmatmul.mubr.bf16.gmra.mrb[44].mxu1 %v8929_v61  ;;  %v9186_v61 = vld [vmem:[#allocation3 + $0xc] sm:$0xf] }
 0x2fa   : > { %5802 = vmatprep.mubr.bf16.mxu1 %v12827_v49  ;;  %v7676_v50 = vcombine.low %v9186_v61, %v10990_v30 }
 0x2fc   : > { %v11386_v54 = vpop.f32.mrb[116].mxu0 }
 0x2fd   : > { %12997 = vst [vmem:[#allocation8_spill] sm:$0xff] %v11386_v54  ;;  %v11388_v21 = vpop.f32.mrb[117].mxu0 }
 0x2fe   : > { %12998 = vst [vmem:[#allocation61_spill] sm:$0xff] %v11388_v21  ;;  %v11390_v53 = vpop.f32.mrb[118].mxu0 }
 0x2ff   : > { %12999 = vst [vmem:[#allocation62_spill] sm:$0xff] %v11390_v53  ;;  %v11395_v14 = vpop.f32.mrb[119].mxu0 }
 0x300   : > { %13000 = vst [vmem:[#allocation63_spill] sm:$0xff] %v11395_v14 }
 0x301   : > { %5803 = vmatmul.mubr.bf16.vlgmr.msra.gmra.mrb[48].mxu1 %v7675_v40 }
 0x302   : > { %6295 = vmatpush1.bf16.msra.mxu1 %v8930_v7  ;;  %5812 = vmatprep.mubr.bf16.mxu1 %v12827_v49  ;;  %v6069_v7 = vrot.slane %v6067_v62, 4  ;;  %v6076_v62 = vshll.u32 %v11064_v2, 16  ;;  %v13010_v2 = vld [vmem:[#allocation14_spill] sm:$0xff] }
 0x303   : > { %6296 = vmatprep.subr.bf16.mxu1 %v8936_v58  ;;  %v8939_v58 = vld [vmem:[%s12707_s7 + $0x20] ss:$8 sps:$4 sm:$0xff]   ;;  %vm13011_vm3 = vnez %v13010_v2 }
 0x304   : > { %v11412_v40 = vpop.f32.mrb[120].mxu0 }
 0x305   : > { %13002 = vst [vmem:[#allocation64_spill] sm:$0xff] %v11412_v40  ;;  %v11414_v23 = vpop.f32.mrb[121].mxu0 }
 0x306   : > { %13003 = vst [vmem:[#allocation65_spill] sm:$0xff] %v11414_v23  ;;  %v11417_v14 = vpop.f32.mrb[122].mxu0  ;;  %6297 = vmatpush1.bf16.msra.mxu1 %v8934_v55  ;;  %v6070_v23 = vor.u32 %v6069_v7, %v6066_v48  ;;  %v8944_v55 = vld [vmem:[%s12707_s7 + $0x30] ss:$8 sps:$4 sm:$0xff]   ;;  %v6075_v7 = vrot.slane %v6073_v18, 3 }
 0x307   : > { %13004 = vst [vmem:[#allocation66_spill] sm:$0xff] %v11417_v14  ;;  %v11422_v53 = vpop.f32.mrb[123].mxu0  ;;  %6298 = vmatprep.subr.bf16.mxu1 %v8941_v16  ;;  %v8951_v16 = vld [vmem:[%s12707_s7 + $0x44] ss:$8 sps:$4 sm:$0xff]   ;;  %v11445_v48 = vld [vmem:[#allocation3 + $0x68] sm:$0xf] }
 0x308   : > { %13005 = vst [vmem:[#allocation67_spill] sm:$0xff] %v11422_v53  ;;  %v11428_v30 = vsel %vm13006_vm2, %v6061_v17, %v6070_v23  ;;  %v8949_v53 = vld [vmem:[%s12707_s7 + $0x40] ss:$8 sps:$4 sm:$0xff]   ;;  %vm13064_vm2 = vmmov %vm13054_vm0 }
 0x309   : > { %5813 = vmatmul.mubr.bf16.gmra.mrb[52].mxu1 %v7676_v50  ;;  %v7677_v50 = vcombine.low %v11008_v39, %v11033_v41  ;;  %v8956_v39 = vld [vmem:[%s12707_s7 + $0x54] ss:$8 sps:$4 sm:$0xff]  }
 0x30a   : > { %5822 = vmatprep.mubr.bf16.mxu1 %v12827_v49  ;;  %6299 = vmatpush1.bf16.msra.mxu1 %v8939_v58  ;;  %v6078_v58 = vrot.slane %v6076_v62, 4  ;;  %v11460_v41 = vld [vmem:[#allocation3 + $0x6c] sm:$0xf] }
 0x30b   : > { %6300 = vmatprep.subr.bf16.mxu1 %v8946_v34 }
 0x30c   : > { %v11439_v61 = vpop.f32.mrb[124].mxu0  ;;  %v6079_v18 = vor.u32 %v6078_v58, %v6075_v7  ;;  %v8961_v7 = vld [vmem:[%s12707_s7 + $0x64] ss:$8 sps:$4 sm:$0xff]   ;;  %v11485_v58 = vld [vmem:[#allocation3 + $0x70] sm:$0xf] }
 0x30d   : > { %13007 = vst [vmem:[#allocation68_spill] sm:$0xff] %v11439_v61  ;;  %v11441_v17 = vpop.f32.mrb[125].mxu0  ;;  %v5554_v61 = vsel %vm13011_vm3, %v11445_v48, 0  ;;  %vm13070_vm3 = vmmov %vm13054_vm0 }
 0x30e   : > { %13008 = vst [vmem:[#allocation69_spill] sm:$0xff] %v11441_v17  ;;  %v11447_v34 = vpop.f32.mrb[126].mxu0  ;;  %6301 = vmatpush1.bf16.msra.mxu1 %v8944_v55  ;;  %v5555_v55 = vsel %vm13013_vm15, %v11460_v41, 0  ;;  %v11468_v2 = vsel %vm13014_vm14, %v6070_v23, %v6079_v18  ;;  %vm13071_vm15 = vmmov %vm13054_vm0 }
 0x30f   : > { %13009 = vst [vmem:[#allocation70_spill] sm:$0xff] %v11447_v34  ;;  %v11455_v14 = vpop.f32.mrb[127].mxu0  ;;  %6302 = vmatprep.subr.bf16.mxu1 %v8951_v16  ;;  %v11465_v62 = vcombine.low %v5554_v61, %v5555_v55  ;;  %v8954_v16 = vld [vmem:[%s12707_s7 + $0x50] ss:$8 sps:$4 sm:$0xff]   ;;  %v6085_v61 = vshll.u32 %v11101_v5, 16  ;;  %v6084_v55 = vrot.slane %v6082_v11, 3 }
 0x310   : > { %13012 = vst [vmem:[#allocation14_spill] sm:$0xff] %v11455_v14  ;;  %v8959_v34 = vld [vmem:[%s12707_s7 + $0x60] ss:$8 sps:$4 sm:$0xff]   ;;  %v5556_v5 = vsel %vm13018_vm5, %v11485_v58, 0  ;;  %vm13074_vm5 = vmmov %vm13054_vm0 }
 0x311   : > { %5823 = vmatmul.mubr.bf16.gmra.mrb[56].mxu1 %v7677_v50  ;;  %v6087_v14 = vrot.slane %v6085_v61, 4  ;;  %v6094_v61 = vshll.u32 %v11132_v51, 16 }
 0x312   : > { %5832 = vmatprep.mubr.bf16.mxu1 %v12827_v49  ;;  %6303 = vmatpush1.bf16.msra.mxu1 %v8949_v53  ;;  %v7678_v53 = vcombine.low %v11051_v4, %v11076_v6  ;;  %v8966_v4 = vld [vmem:[%s12707_s7 + $0x74] ss:$8 sps:$4 sm:$0xff]  }
 0x313   : > { %6304 = vmatprep.subr.bf16.mxu1 %v8956_v39  ;;  %v6088_v6 = vor.u32 %v6087_v14, %v6084_v55  ;;  %v6091_v14 = vshrl.u32 %v11132_v51, 16  ;;  %v11522_v55 = vld [vmem:[#allocation3 + $0x78] sm:$0xf]  ;;  %v11531_v51 = vld [vmem:[#allocation3 + $0x7c] sm:$0xf] }
 0x314   : > { %v11479_v50 = vpop.f32.mrb[128].mxu0 }
 0x315   : > { %13015 = vst [vmem:[#allocation71_spill] sm:$0xff] %v11479_v50  ;;  %v11481_v23 = vpop.f32.mrb[129].mxu0  ;;  %v11508_v43 = vsel %vm13021_vm12, %v6079_v18, %v6088_v6  ;;  %v7679_v18 = vcombine.low %v11091_v9, %v11107_v36  ;;  %vm7232_vm12 = vcmask 64512  }
 0x316   : > { %13016 = vst [vmem:[#allocation72_spill] sm:$0xff] %v11481_v23  ;;  %v11487_v39 = vpop.f32.mrb[130].mxu0  ;;  %6305 = vmatpush1.bf16.msra.mxu1 %v8954_v16  ;;  %v11497_v23 = vld [vmem:[#allocation3 + $0x74] sm:$0xf] }
 0x317   : > { %13017 = vst [vmem:[#allocation73_spill] sm:$0xff] %v11487_v39  ;;  %v11495_v50 = vpop.f32.mrb[131].mxu0  ;;  %6306 = vmatprep.subr.bf16.mxu1 %v8961_v7  ;;  %v5557_v16 = vsel %vm13020_vm9, %v11497_v23, 0  ;;  %v8964_v7 = vld [vmem:[%s12707_s7 + $0x70] ss:$8 sps:$4 sm:$0xff]   ;;  %vm13075_vm9 = vmmov %vm13054_vm0 }
 0x318   : > { %13019 = vst [vmem:[#allocation74_spill] sm:$0xff] %v11495_v50  ;;  %v11505_v11 = vcombine.low %v5556_v5, %v5557_v16  ;;  %v6093_v5 = vrot.slane %v6091_v14, 3 }
 0x319   : > { %5833 = vmatmul.mubr.bf16.gmra.mrb[60].mxu1 %v7678_v53 }
 0x31a   : > { %5842 = vmatprep.mubr.bf16.mxu1 %v12827_v49  ;;  %6307 = vmatpush1.bf16.msra.mxu1 %v8959_v34  ;;  %v6096_v34 = vrot.slane %v6094_v61, 4 }
 0x31b   : > { %6308 = vmatprep.subr.bf16.mxu1 %v8966_v4  ;;  %v5558_v4 = vsel %vm13025_vm1, %v11522_v55, 0 }
 0x31c   : > { %v11516_v63 = vpop.f32.mrb[132].mxu0 }
 0x31d   : > { %13022 = vst [vmem:[#allocation75_spill] sm:$0xff] %v11516_v63  ;;  %v11518_v53 = vpop.f32.mrb[133].mxu0  ;;  %v6097_v63 = vor.u32 %v6096_v34, %v6093_v5  ;;  %v6102_v5 = vrot.slane %v6100_v46, 3 }
 0x31e   : > { %13023 = vst [vmem:[#allocation76_spill] sm:$0xff] %v11518_v53  ;;  %v11524_v16 = vpop.f32.mrb[134].mxu0  ;;  %6309 = vmatpush1.bf16.msra.mxu1 %v8964_v7  ;;  %v13027_v53 = vld [vmem:[#allocation15_spill] sm:$0xff]  ;;  %v6103_v7 = vshll.u32 %v11162_v28, 16  ;;  %v6109_v28 = vshrl.u32 %v11191_v29, 16 }
 0x31f   : > { %13024 = vst [vmem:[#allocation77_spill] sm:$0xff] %v11524_v16  ;;  %v11529_v50 = vpop.f32.mrb[135].mxu0  ;;  %vm13028_vm11 = vnez %v13027_v53  ;;  %v11539_v14 = vsel %vm13029_vm10, %v6088_v6, %v6097_v63  ;;  %v7680_v53 = vcombine.low %v11122_v45, %v11138_v3  ;;  %v7681_v3 = vcombine.low %v11153_v57, %v11167_v12 }
 0x320   : > { %13026 = vst [vmem:[#allocation78_spill] sm:$0xff] %v11529_v50  ;;  %v5559_v9 = vsel %vm13028_vm11, %v11531_v51, 0  ;;  %v6111_v46 = vrot.slane %v6109_v28, 3  ;;  %v7682_v12 = vcombine.low %v11182_v31, %v11196_v26  ;;  %v7683_v26 = vcombine.low %v11211_v37, %v11225_v24 }
 0x321   : > { %5843 = vmatmul.mubr.bf16.gmra.mrb[64].mxu1 %v7679_v18  ;;  %v11536_v36 = vcombine.low %v5558_v4, %v5559_v9  ;;  %v6105_v18 = vrot.slane %v6103_v7, 4  ;;  %v7684_v24 = vcombine.low %v11240_v33, %v11254_v38  ;;  %v7685_v38 = vcombine.low %v11269_v20, %v11283_v60 }
 0x322   : > { %5852 = vmatprep.mubr.bf16.mxu1 %v12827_v49 }
 0x323   : > { %v6106_v6 = vor.u32 %v6105_v18, %v6102_v5 }
 0x324   : > { %v11544_v61 = vpop.f32.mrb[136].mxu0 }
 0x325   : > { %13030 = vst [vmem:[#allocation15_spill] sm:$0xff] %v11544_v61  ;;  %v11546_v50 = vpop.f32.mrb[137].mxu0  ;;  %v11555_v9 = vsel %vm13034_vm4, %v6097_v63, %v6106_v6 }
 0x326   : > { %13031 = vst [vmem:[#allocation79_spill] sm:$0xff] %v11546_v50  ;;  %v11550_v34 = vpop.f32.mrb[138].mxu0  ;;  %v6112_v50 = vshll.u32 %v11191_v29, 16  ;;  %v6118_v29 = vshrl.u32 %v11220_v8, 16 }
 0x327   : > { %13032 = vst [vmem:[#allocation80_spill] sm:$0xff] %v11550_v34  ;;  %v11552_v4 = vpop.f32.mrb[139].mxu0 }
 0x328   : > { %13033 = vst [vmem:[#allocation81_spill] sm:$0xff] %v11552_v4  ;;  %v6114_v7 = vrot.slane %v6112_v50, 4  ;;  %v6120_v50 = vrot.slane %v6118_v29, 3 }
 0x329   : > { %5853 = vmatmul.mubr.bf16.gmra.mrb[68].mxu1 %v7680_v53 }
 0x32a   : > { %5862 = vmatprep.mubr.bf16.mxu1 %v12827_v49  ;;  %v6115_v63 = vor.u32 %v6114_v7, %v6111_v46 }
 0x32c   : > { %v11560_v61 = vpop.f32.mrb[140].mxu0  ;;  %v11571_v18 = vsel %vm13039_vm7, %v6106_v6, %v6115_v63 }
 0x32d   : > { %13035 = vst [vmem:[#allocation82_spill] sm:$0xff] %v11560_v61  ;;  %v11562_v45 = vpop.f32.mrb[141].mxu0 }
 0x32e   : > { %13036 = vst [vmem:[#allocation83_spill] sm:$0xff] %v11562_v45  ;;  %v11566_v5 = vpop.f32.mrb[142].mxu0  ;;  %v6121_v45 = vshll.u32 %v11220_v8, 16  ;;  %v6127_v8 = vshrl.u32 %v11249_v10, 16 }
 0x32f   : > { %13037 = vst [vmem:[#allocation84_spill] sm:$0xff] %v11566_v5  ;;  %v11568_v53 = vpop.f32.mrb[143].mxu0 }
 0x330   : > { %13038 = vst [vmem:[#allocation85_spill] sm:$0xff] %v11568_v53  ;;  %v6123_v28 = vrot.slane %v6121_v45, 4  ;;  %v6129_v45 = vrot.slane %v6127_v8, 3 }
 0x331   : > { %5863 = vmatmul.mubr.bf16.gmra.mrb[72].mxu1 %v7681_v3 }
 0x332   : > { %5872 = vmatprep.mubr.bf16.mxu1 %v12827_v49  ;;  %v6124_v6 = vor.u32 %v6123_v28, %v6120_v50 }
 0x334   : > { %v11576_v61 = vpop.f32.mrb[144].mxu0  ;;  %v11587_v7 = vsel %vm13044_vm13, %v6115_v63, %v6124_v6 }
 0x335   : > { %13040 = vst [vmem:[#allocation86_spill] sm:$0xff] %v11576_v61  ;;  %v11578_v57 = vpop.f32.mrb[145].mxu0 }
 0x336   : > { %13041 = vst [vmem:[#allocation87_spill] sm:$0xff] %v11578_v57  ;;  %v11582_v46 = vpop.f32.mrb[146].mxu0  ;;  %v6130_v57 = vshll.u32 %v11249_v10, 16  ;;  %v6136_v10 = vshrl.u32 %v11278_v15, 16 }
 0x337   : > { %13042 = vst [vmem:[#allocation88_spill] sm:$0xff] %v11582_v46  ;;  %v11584_v3 = vpop.f32.mrb[147].mxu0 }
 0x338   : > { %13043 = vst [vmem:[#allocation89_spill] sm:$0xff] %v11584_v3  ;;  %v6132_v29 = vrot.slane %v6130_v57, 4  ;;  %v6138_v57 = vrot.slane %v6136_v10, 3  ;;  %v7688_v3 = vcombine.low %v11460_v41, %v11485_v58  ;;  %v11713_v41 = vld [vmem:[#allocation3 + $0x80] sm:$0xf] }
 0x339   : > { %5873 = vmatmul.mubr.bf16.gmra.mrb[76].mxu1 %v7682_v12 }
 0x33a   : > { %5882 = vmatprep.mubr.bf16.mxu1 %v12827_v49  ;;  %v6133_v63 = vor.u32 %v6132_v29, %v6129_v45 }
 0x33c   : > { %v11592_v61 = vpop.f32.mrb[148].mxu0  ;;  %v11603_v28 = vsel %vm13049_vm6, %v6124_v6, %v6133_v63 }
 0x33d   : > { %13045 = vst [vmem:[#allocation90_spill] sm:$0xff] %v11592_v61  ;;  %v11594_v31 = vpop.f32.mrb[149].mxu0 }
 0x33e   : > { %13046 = vst [vmem:[#allocation91_spill] sm:$0xff] %v11594_v31  ;;  %v11598_v50 = vpop.f32.mrb[150].mxu0  ;;  %v6139_v31 = vshll.u32 %v11278_v15, 16  ;;  %v6145_v15 = vshrl.u32 %v11307_v13, 16 }
 0x33f   : > { %13047 = vst [vmem:[#allocation92_spill] sm:$0xff] %v11598_v50  ;;  %v11600_v12 = vpop.f32.mrb[151].mxu0 }
 0x340   : > { %13048 = vst [vmem:[#allocation93_spill] sm:$0xff] %v11600_v12  ;;  %v6141_v8 = vrot.slane %v6139_v31, 4  ;;  %v6147_v31 = vrot.slane %v6145_v15, 3  ;;  %v7686_v15 = vcombine.low %v11298_v25, %v11312_v59 }
 0x341   : > { %5883 = vmatmul.mubr.bf16.gmra.mrb[80].mxu1 %v7683_v26 }
 0x342   : > { %5892 = vmatprep.mubr.bf16.mxu1 %v12827_v49  ;;  %v6142_v6 = vor.u32 %v6141_v8, %v6138_v57 }
 0x344   : > { %v11608_v61 = vpop.f32.mrb[152].mxu0  ;;  %v11619_v29 = vsel %vm13054_vm0, %v6133_v63, %v6142_v6 }
 0x345   : > { %13050 = vst [vmem:[#allocation94_spill] sm:$0xff] %v11608_v61  ;;  %v11610_v37 = vpop.f32.mrb[153].mxu0 }
 0x346   : > { %13051 = vst [vmem:[#allocation95_spill] sm:$0xff] %v11610_v37  ;;  %v11614_v45 = vpop.f32.mrb[154].mxu0  ;;  %v6148_v37 = vshll.u32 %v11307_v13, 16  ;;  %v6154_v13 = vshrl.u32 %v11336_v1, 16 }
 0x347   : > { %13052 = vst [vmem:[#allocation96_spill] sm:$0xff] %v11614_v45  ;;  %v11616_v26 = vpop.f32.mrb[155].mxu0 }
 0x348   : > { %13053 = vst [vmem:[#allocation97_spill] sm:$0xff] %v11616_v26  ;;  %v6150_v10 = vrot.slane %v6148_v37, 4 }
 0x349   : > { %5893 = vmatmul.mubr.bf16.gmra.mrb[84].mxu1 %v7684_v24 }
 0x34a   : > { %5902 = vmatprep.mubr.bf16.mxu1 %v12827_v49  ;;  %v6151_v63 = vor.u32 %v6150_v10, %v6147_v31  ;;  %v6156_v31 = vrot.slane %v6154_v13, 3 }
 0x34c   : > { %v11624_v61 = vpop.f32.mrb[156].mxu0  ;;  %v11635_v8 = vsel %vm13059_vm8, %v6142_v6, %v6151_v63 }
 0x34d   : > { %13055 = vst [vmem:[#allocation98_spill] sm:$0xff] %v11624_v61  ;;  %v11626_v33 = vpop.f32.mrb[157].mxu0 }
 0x34e   : > { %13056 = vst [vmem:[#allocation99_spill] sm:$0xff] %v11626_v33  ;;  %v11630_v57 = vpop.f32.mrb[158].mxu0  ;;  %v6157_v33 = vshll.u32 %v11336_v1, 16 }
 0x34f   : > { %13057 = vst [vmem:[#allocation100_spill] sm:$0xff] %v11630_v57  ;;  %v11632_v24 = vpop.f32.mrb[159].mxu0 }
 0x350   : > { %13058 = vst [vmem:[#allocation101_spill] sm:$0xff] %v11632_v24 }
 0x351   : > { %5903 = vmatmul.mubr.bf16.gmra.mrb[88].mxu1 %v7685_v38  ;;  %v6159_v38 = vrot.slane %v6157_v33, 4 }
 0x352   : > { %5912 = vmatprep.mubr.bf16.mxu1 %v12827_v49 }
 0x353   : > { %v6160_v26 = vor.u32 %v6159_v38, %v6156_v31 }
 0x354   : > { %v11640_v61 = vpop.f32.mrb[160].mxu0  ;;  %v5096_v20 = vpop.f32.mrb[112].mxu1 }
 0x355   : > { %13060 = vst [vmem:[#allocation102_spill] sm:$0xff] %v11640_v61  ;;  %v11642_v60 = vpop.f32.mrb[161].mxu0  ;;  %v5098_v37 = vpop.f32.mrb[113].mxu1  ;;  %v11651_v1 = vsel %vm13064_vm2, %v6151_v63, %v6160_v26  ;;  %v6166_v61 = vshll.u32 %v11465_v62, 16 }
 0x356   : > { %13061 = vst [vmem:[#allocation103_spill] sm:$0xff] %v11642_v60  ;;  %v11646_v10 = vpop.f32.mrb[162].mxu0  ;;  %v5100_v6 = vpop.f32.mrb[114].mxu1  ;;  %v6163_v60 = vshrl.u32 %v11465_v62, 16 }
 0x357   : > { %13062 = vst [vmem:[#allocation104_spill] sm:$0xff] %v11646_v10  ;;  %v11648_v24 = vpop.f32.mrb[163].mxu0  ;;  %v5102_v57 = vpop.f32.mrb[115].mxu1  ;;  %v6168_v63 = vrot.slane %v6166_v61, 4  ;;  %v13068_v10 = vld [vmem:[#allocation5_spill] sm:$0xff] }
 0x358   : > { %13063 = vst [vmem:[#allocation105_spill] sm:$0xff] %v11648_v24  ;;  %v6165_v31 = vrot.slane %v6163_v60, 3  ;;  %v11671_v45 = vsub.s32 0, %v13068_v10  ;;  %v6172_v60 = vshrl.u32 %v11505_v11, 16 }
 0x359   : > { %5913 = vmatmul.mubr.bf16.gmra.mrb[92].mxu1 %v7686_v15  ;;  %v7687_v15 = vcombine.low %v11327_v19, %v11445_v48  ;;  %v11681_v19 = vsub.s32 1, %v13068_v10 }
 0x35a   : > { %5922 = vmatprep.mubr.bf16.mxu1 %v12827_v49  ;;  %v6169_v12 = vor.u32 %v6168_v63, %v6165_v31  ;;  %v6175_v31 = vshll.u32 %v11505_v11, 16  ;;  %v6174_v46 = vrot.slane %v6172_v60, 3 }
 0x35c   : > { %v11656_v25 = vpop.f32.mrb[164].mxu0  ;;  %v11658_v59 = vpop.f32.mrb[116].mxu1  ;;  %v11684_v48 = vsel %vm13070_vm3, %v6160_v26, %v6169_v12  ;;  %v6177_v53 = vrot.slane %v6175_v31, 4 }
 0x35d   : > { %13065 = vst [vmem:[#allocation106_spill] sm:$0xff] %v11656_v25  ;;  %v11660_v33 = vpop.f32.mrb[165].mxu0  ;;  %v11662_v13 = vpop.f32.mrb[117].mxu1 }
 0x35e   : > { %13066 = vst [vmem:[#allocation107_spill] sm:$0xff] %v11660_v33  ;;  %v11666_v38 = vpop.f32.mrb[166].mxu0  ;;  %v11668_v24 = vpop.f32.mrb[118].mxu1  ;;  %v4688_v33 = vld [vmem:[%s12705_s5] sm:$0xf] }
 0x35f   : > { %13067 = vst [vmem:[#allocation108_spill] sm:$0xff] %v11666_v38  ;;  %v11673_v62 = vpop.f32.mrb[167].mxu0  ;;  %v11675_v25 = vpop.f32.mrb[119].mxu1  ;;  %v11688_v61 = vrot.slane %v4688_v33, %v11671_v45  ;;  %v11693_v63 = vrot.slane %v4688_v33, %v11681_v19 }
 0x360   : > { %13069 = vst [vmem:[#allocation5_spill] sm:$0xff] %v11673_v62 }
 0x361   : > { %5923 = vmatmul.mubr.bf16.gmra.mrb[96].mxu1 %v7687_v15 }
 0x362   : > { %5932 = vmatprep.mubr.bf16.mxu1 %v12827_v49 }
 0x364   : > { %v4336_v62 = vpop.f32.mrb[40].mxu0  ;;  %v11695_v38 = vpop.f32.mrb[120].mxu1 }
 0x365   : > { %v8151_v15 = vadd.f32 %v11688_v61, %v4336_v62  ;;  %v4338_v50 = vpop.f32.mrb[41].mxu0  ;;  %v11698_v26 = vpop.f32.mrb[121].mxu1  ;;  %v6178_v62 = vor.u32 %v6177_v53, %v6174_v46 }
 0x366   : > { %v8153_v5 = vadd.f32 %v11693_v63, %v4338_v50  ;;  %v4340_v4 = vpop.f32.mrb[42].mxu0  ;;  %v11703_v11 = vpop.f32.mrb[122].mxu1 }
 0x367   : > { %v11705_v33 = vadd.f32 %v8151_v15, %v5096_v20  ;;  %v8155_v34 = vadd.f32 %v11688_v61, %v4340_v4  ;;  %v4342_v16 = vpop.f32.mrb[43].mxu0  ;;  %v11708_v39 = vpop.f32.mrb[123].mxu1  ;;  %v11716_v58 = vsel %vm13071_vm15, %v6169_v12, %v6178_v62  ;;  %v13072_v4 = vld [vmem:[#allocation6_spill] sm:$0xff] }
 0x368   : > { %v8154_v17 = vadd.f32 %v8153_v5, %v5098_v37  ;;  %v8157_v40 = vadd.f32 %v11693_v63, %v4342_v16  ;;  %vm13073_vm14 = vcmp.ne.s16.totalorder %v13072_v4, 0  ;;  %v6181_v16 = vshrl.u32 %v11536_v36, 16 }
 0x369   : > { %v11711_v21 = vadd.f32 %v8155_v34, %v5100_v6  ;;  %5933 = vmatmul.mubr.bf16.gmra.mrb[100].mxu1 %v7688_v3  ;;  %v5560_v20 = vsel %vm13073_vm14, %v11713_v41, 0  ;;  %v6184_v34 = vshll.u32 %v11536_v36, 16 }
 0x36a   : > { %v8158_v50 = vadd.f32 %v8157_v40, %v5102_v57  ;;  %5942 = vmatprep.mubr.bf16.mxu1 %v12827_v49  ;;  %v7689_v40 = vcombine.low %v11497_v23, %v11522_v55  ;;  %v7723_v6 = vcombine.low %v5560_v20, %v5560_v20  ;;  %v6183_v60 = vrot.slane %v6181_v16, 3 }
 0x36b   : > { %v6186_v31 = vrot.slane %v6184_v34, 4 }
 0x36c   : > { %v5351_v53 = vpack.c.bf16 %v8158_v50, %v8154_v17  ;;  %v4346_v46 = vpop.f32.mrb[44].mxu0  ;;  %v11726_v3 = vpop.f32.mrb[124].mxu1 }
 0x36d   : > { %v8159_v12 = vadd.f32 %v11688_v61, %v4346_v46  ;;  %v4348_v57 = vpop.f32.mrb[45].mxu0  ;;  %v11731_v37 = vpop.f32.mrb[125].mxu1  ;;  %v6187_v46 = vor.u32 %v6186_v31, %v6183_v60 }
 0x36e   : > { %v7643_v15 = vmul.bf16 3216621497, %v5351_v53  ;;  %v8161_v4 = vadd.f32 %v11693_v63, %v4348_v57  ;;  %v4350_v5 = vpop.f32.mrb[46].mxu0  ;;  %v11734_v36 = vpop.f32.mrb[126].mxu1  ;;  %v6190_v53 = vshrl.u32 %v7723_v6, 16 }
 0x36f   : > { %v11737_v17 = vadd.f32 %v8159_v12, %v11658_v59  ;;  %v8163_v50 = vadd.f32 %v11688_v61, %v4350_v5  ;;  %v4352_v23 = vpop.f32.mrb[47].mxu0  ;;  %v11740_v55 = vpop.f32.mrb[127].mxu1  ;;  %v11748_v57 = vsel %vm13074_vm5, %v6178_v62, %v6187_v46  ;;  %v6193_v5 = vshll.u32 %v7723_v6, 16 }
 0x370   : > { %8992 = vpow.bf16 %v7643_v15  ;;  %v8162_v20 = vadd.f32 %v8161_v4, %v11662_v13  ;;  %v8165_v16 = vadd.f32 %v11693_v63, %v4352_v23  ;;  %v8183_v12 = vadd.f32 %v11688_v61, %v10957_v47 }
 0x371   : > { %v11745_v34 = vadd.f32 %v8163_v50, %v11668_v24  ;;  %5943 = vmatmul.mubr.bf16.gmra.mrb[104].mxu1 %v7689_v40  ;;  %v8185_v24 = vadd.f32 %v11693_v63, %v10959_v0  ;;  %v8187_v40 = vadd.f32 %v11688_v61, %v10963_v44  ;;  %v8189_v62 = vadd.f32 %v11693_v63, %v10967_v56 }
 0x372   : > { %v8166_v59 = vadd.f32 %v8165_v16, %v11675_v25  ;;  %5952 = vmatprep.mubr.bf16.mxu1 %v12827_v49  ;;  %v7690_v50 = vcombine.low %v11531_v51, %v11713_v41  ;;  %v6192_v23 = vrot.slane %v6190_v53, 3  ;;  %v6195_v56 = vrot.slane %v6193_v5, 4 }
 0x374   : > { %v5352_v60 = vpack.c.bf16 %v8166_v59, %v8162_v20  ;;  %v4356_v25 = vpop.f32.mrb[48].mxu0  ;;  %v5136_v31 = vpop.f32.mrb[0].mxu1 }
 0x375   : > { %v8167_v6 = vadd.f32 %v11688_v61, %v4356_v25  ;;  %v11763_v15 = vadd.f32 %v8183_v12, %v5136_v31  ;;  %v4358_v47 = vpop.f32.mrb[49].mxu0  ;;  %v5138_v4 = vpop.f32.mrb[1].mxu1 }
 0x376   : > { %v7644_v0 = vmul.bf16 3216621497, %v5352_v60  ;;  %v8169_v16 = vadd.f32 %v11693_v63, %v4358_v47  ;;  %v8186_v44 = vadd.f32 %v8185_v24, %v5138_v4  ;;  %v4360_v13 = vpop.f32.mrb[50].mxu0  ;;  %v5140_v54 = vpop.f32.mrb[2].mxu1 }
 0x377   : > { %v11769_v20 = vadd.f32 %v8167_v6, %v11695_v38  ;;  %v8171_v59 = vadd.f32 %v11688_v61, %v4360_v13  ;;  %v11772_v12 = vadd.f32 %v8187_v40, %v5140_v54  ;;  %v4362_v25 = vpop.f32.mrb[51].mxu0  ;;  %v5142_v31 = vpop.f32.mrb[3].mxu1  ;;  %v6196_v38 = vor.u32 %v6195_v56, %v6192_v23 }
 0x378   : > { %8994 = vpow.bf16 %v7644_v0  ;;  %v8170_v51 = vadd.f32 %v8169_v16, %v11698_v26  ;;  %v8173_v41 = vadd.f32 %v11693_v63, %v4362_v25  ;;  %v8190_v53 = vadd.f32 %v8189_v62, %v5142_v31  ;;  %v13076_v0 = vld [vmem:[#allocation16_spill] sm:$0xff] }
 0x379   : > { %v11777_v24 = vadd.f32 %v8171_v59, %v11703_v11  ;;  %v5323_v5 = vpack.c.bf16 %v11772_v12, %v11763_v15  ;;  %5953 = vmatmul.mubr.bf16.gmra.mrb[108].mxu1 %v7690_v50  ;;  %v8191_v26 = vadd.f32 %v11688_v61, %v10985_v32  ;;  %v8193_v62 = vadd.f32 %v11693_v63, %v10992_v22 }
 0x37a   : > { %v8174_v13 = vadd.f32 %v8173_v41, %v11708_v39  ;;  %v5355_v54 = vpack.c.bf16 %v8190_v53, %v8186_v44  ;;  %6326 = vmatprep.mubr.bf16.mxu1 %v12827_v49  ;;  %v11790_v60 = vsel %vm13075_vm9, %v6187_v46, %v6196_v38  ;;  %v8195_v6 = vadd.f32 %v11688_v61, %v10996_v52 }
 0x37b   : > { %v8993_v40 = vpop.eup %8992  ;;  %v5321_v11 = vpack.c.bf16 %v11777_v24, %v11769_v20  ;;  %v8197_v32 = vadd.f32 %v11693_v63, %v13076_v0  ;;  %v13077_v22 = vpack.c.bf16 %v11711_v21, %v11705_v33 }
 0x37c   : > { %v5431_v39 = vadd.bf16 1065369472, %v8993_v40  ;;  %v5353_v47 = vpack.c.bf16 %v8174_v13, %v8170_v51  ;;  %v7647_v4 = vmul.bf16 3216621497, %v5355_v54  ;;  %v4366_v50 = vpop.f32.mrb[52].mxu0  ;;  %v5146_v23 = vpop.f32.mrb[4].mxu1 }
 0x37d   : > { %8996 = vtanh.bf16 %v13077_v22  ;;  %v8175_v16 = vadd.f32 %v11688_v61, %v4366_v50  ;;  %v11800_v44 = vadd.f32 %v8191_v26, %v5146_v23  ;;  %v4368_v46 = vpop.f32.mrb[53].mxu0  ;;  %v5148_v56 = vpop.f32.mrb[5].mxu1  ;;  %v13079_v50 = vld [vmem:[#allocation18_spill] sm:$0xff] }
 0x37e   : > { %8998 = vrcp.bf16 %v5431_v39  ;;  %v7645_v52 = vmul.bf16 3216621497, %v5353_v47  ;;  %v8177_v59 = vadd.f32 %v11693_v63, %v4368_v46  ;;  %v8194_v25 = vadd.f32 %v8193_v62, %v5148_v56  ;;  %v4370_v31 = vpop.f32.mrb[54].mxu0  ;;  %v5150_v51 = vpop.f32.mrb[6].mxu1  ;;  %v13078_v47 = vld [vmem:[#allocation17_spill] sm:$0xff] }
 0x37f   : > { %9000 = vpow.bf16 %v7647_v4  ;;  %v11804_v41 = vadd.f32 %v8175_v16, %v11726_v3  ;;  %v8179_v21 = vadd.f32 %v11688_v61, %v4370_v31  ;;  %v11807_v33 = vadd.f32 %v8195_v6, %v5150_v51  ;;  %v4372_v53 = vpop.f32.mrb[55].mxu0  ;;  %v5152_v38 = vpop.f32.mrb[7].mxu1 }
 0x380   : > { %9002 = vpow.bf16 %v7645_v52  ;;  %v8178_v13 = vadd.f32 %v8177_v59, %v11731_v37  ;;  %v8181_v54 = vadd.f32 %v11693_v63, %v4372_v53  ;;  %v8198_v40 = vadd.f32 %v8197_v32, %v5152_v38  ;;  %v13082_v52 = vld [vmem:[#allocation20_spill] sm:$0xff] }
 0x381   : > { %v11812_v26 = vadd.f32 %v8179_v21, %v11734_v36  ;;  %v5324_v62 = vpack.c.bf16 %v11807_v33, %v11800_v44  ;;  %6327 = vmatmul.mubr.bf16.vlgmr.msra.gmra.mrb[48].mxu1 %v11401_v42  ;;  %v8199_v37 = vadd.f32 %v11688_v61, %v13078_v47  ;;  %v8201_v36 = vadd.f32 %v11693_v63, %v13079_v50  ;;  %v13080_v42 = vld [vmem:[#allocation19_spill] sm:$0xff] }
 0x382   : > { %v8182_v3 = vadd.f32 %v8181_v54, %v11740_v55  ;;  %v5356_v6 = vpack.c.bf16 %v8198_v40, %v8194_v25  ;;  %6336 = vmatprep.mubr.bf16.mxu1 %v12827_v49  ;;  %v8203_v55 = vadd.f32 %v11688_v61, %v13080_v42  ;;  %v13081_v16 = vpack.c.bf16 %v11745_v34, %v11737_v17 }
 0x383   : > { %v8995_v39 = vpop.eup %8994  ;;  %v5322_v4 = vpack.c.bf16 %v11812_v26, %v11804_v41  ;;  %v8205_v59 = vadd.f32 %v11693_v63, %v13082_v52 }
 0x384   : > { %v5432_v23 = vadd.bf16 1065369472, %v8995_v39  ;;  %v5354_v0 = vpack.c.bf16 %v8182_v3, %v8178_v13  ;;  %v7648_v32 = vmul.bf16 3216621497, %v5356_v6  ;;  %v5156_v22 = vpop.f32.mrb[8].mxu1  ;;  %9004 = vtanh.bf16 %v13081_v16  ;;  %v13083_v39 = vld [vmem:[#allocation21_spill] sm:$0xff] }
 0x385   : > { %v11830_v46 = vadd.f32 %v8199_v37, %v5156_v22  ;;  %v5158_v56 = vpop.f32.mrb[9].mxu1  ;;  %v8207_v47 = vadd.f32 %v11688_v61, %v13083_v39  ;;  %v13084_v37 = vld [vmem:[#allocation22_spill] sm:$0xff] }
 0x386   : > { %9006 = vrcp.bf16 %v5432_v23  ;;  %v7646_v25 = vmul.bf16 3216621497, %v5354_v0  ;;  %v8202_v31 = vadd.f32 %v8201_v36, %v5158_v56  ;;  %v5160_v51 = vpop.f32.mrb[10].mxu1  ;;  %v8209_v50 = vadd.f32 %v11693_v63, %v13084_v37  ;;  %v13085_v36 = vld [vmem:[#allocation23_spill] sm:$0xff] }
 0x387   : > { %9008 = vpow.bf16 %v7648_v32  ;;  %v11834_v21 = vadd.f32 %v8203_v55, %v5160_v51  ;;  %v5162_v53 = vpop.f32.mrb[11].mxu1  ;;  %v8211_v23 = vadd.f32 %v11688_v61, %v13085_v36  ;;  %v13086_v55 = vld [vmem:[#allocation24_spill] sm:$0xff]  ;;  %v13089_v36 = vld [vmem:[#allocation27_spill] sm:$0xff] }
 0x388   : > { %v8997_v38 = vpop.eup %8996  ;;  %9010 = vpow.bf16 %v7646_v25  ;;  %v8206_v13 = vadd.f32 %v8205_v59, %v5162_v53  ;;  %v8213_v16 = vadd.f32 %v11693_v63, %v13086_v55 }
 0x389   : > { %v8999_v17 = vpop.eup %8998  ;;  %v5325_v34 = vpack.c.bf16 %v11834_v21, %v11830_v46  ;;  %6337 = vmatmul.mubr.bf16.gmra.mrb[52].mxu1 %v11428_v30  ;;  %9012 = vtanh.bf16 %v5323_v5 }
 0x38a   : > { %v9001_v54 = vpop.eup %9000  ;;  %v5448_v40 = vmul.bf16 1065369472, %v8999_v17  ;;  %v5357_v3 = vpack.c.bf16 %v8206_v13, %v8202_v31  ;;  %6346 = vmatprep.mubr.bf16.mxu1 %v12827_v49 }
 0x38b   : > { %v9003_v6 = vpop.eup %9002  ;;  %v5435_v0 = vadd.bf16 1065369472, %v9001_v54 }
 0x38c   : > { %v5479_v32 = vmul.bf16 %v8997_v38, %v5448_v40  ;;  %v5433_v30 = vadd.bf16 1065369472, %v9003_v6  ;;  %v7649_v22 = vmul.bf16 3216621497, %v5357_v3  ;;  %v5166_v42 = vpop.f32.mrb[12].mxu1  ;;  %v13087_v6 = vld [vmem:[#allocation25_spill] sm:$0xff] }
 0x38d   : > { %9014 = vrcp.bf16 %v5435_v0  ;;  %v11857_v56 = vadd.f32 %v8207_v47, %v5166_v42  ;;  %v5168_v52 = vpop.f32.mrb[13].mxu1  ;;  %v8215_v39 = vadd.f32 %v11688_v61, %v13087_v6  ;;  %v13088_v47 = vld [vmem:[#allocation26_spill] sm:$0xff]  ;;  %v13090_v0 = vld [vmem:[#allocation28_spill] sm:$0xff]  ;;  %v13093_v6 = vld [vmem:[#allocation31_spill] sm:$0xff] }
 0x38e   : > { %v7200_v15 = vunpack.c.l.bf16 %v5479_v32  ;;  %v7201_v12 = vunpack.c.h.bf16 %v5479_v32  ;;  %9016 = vrcp.bf16 %v5433_v30  ;;  %v8210_v5 = vadd.f32 %v8209_v50, %v5168_v52  ;;  %v5170_v59 = vpop.f32.mrb[14].mxu1 }
 0x38f   : > { %9018 = vpow.bf16 %v7649_v22  ;;  %v11859_v25 = vadd.f32 %v8211_v23, %v5170_v59  ;;  %v5172_v31 = vpop.f32.mrb[15].mxu1  ;;  %v9005_v51 = vpop.eup %9004  ;;  %v8217_v20 = vadd.f32 %v11693_v63, %v13088_v47  ;;  %v8219_v23 = vadd.f32 %v11688_v61, %v13089_v36  ;;  %v13094_v47 = vld [vmem:[#allocation32_spill] sm:$0xff] }
 0x390   : > { %7233 = vst.msk [vmem:[%s11855_s14] sm:$0xff] %vm7232_vm12, %v7200_v15  ;;  %7234 = vst.msk [vmem:[%s11855_s14 + $0x8] sm:$0xff] %vm7232_vm12, %v7201_v12  ;;  %9020 = vtanh.bf16 %v5321_v11  ;;  %v8214_v53 = vadd.f32 %v8213_v16, %v5172_v31  ;;  %v8221_v32 = vadd.f32 %v11693_v63, %v13090_v0 }
 0x391   : > { %v9007_v38 = vpop.eup %9006  ;;  %v5326_v13 = vpack.c.bf16 %v11859_v25, %v11857_v56  ;;  %6347 = vmatmul.mubr.bf16.gmra.mrb[56].mxu1 %v11468_v2  ;;  %9022 = vtanh.bf16 %v5324_v62  ;;  %v13099_v25 = vld [vmem:[#allocation9_spill] sm:$0xff] }
 0x392   : > { %v9009_v17 = vpop.eup %9008  ;;  %v5450_v54 = vmul.bf16 1065369472, %v9007_v38  ;;  %v5358_v40 = vpack.c.bf16 %v8214_v53, %v8210_v5  ;;  %6356 = vmatprep.mubr.bf16.mxu1 %v12827_v49 }
 0x393   : > { %v9011_v3 = vpop.eup %9010  ;;  %v5436_v24 = vadd.bf16 1065369472, %v9009_v17 }
 0x394   : > { %v5480_v11 = vmul.bf16 %v9005_v51, %v5450_v54  ;;  %v5434_v37 = vadd.bf16 1065369472, %v9011_v3  ;;  %v7650_v2 = vmul.bf16 3216621497, %v5358_v40  ;;  %v5176_v50 = vpop.f32.mrb[16].mxu1  ;;  %v9013_v62 = vpop.eup %9012  ;;  %v13091_v54 = vld [vmem:[#allocation29_spill] sm:$0xff] }
 0x395   : > { %9024 = vrcp.bf16 %v5436_v24  ;;  %v11883_v30 = vadd.f32 %v8215_v39, %v5176_v50  ;;  %v5178_v22 = vpop.f32.mrb[17].mxu1  ;;  %v8223_v40 = vadd.f32 %v11688_v61, %v13091_v54  ;;  %v13092_v3 = vld [vmem:[#allocation30_spill] sm:$0xff]  ;;  %v8227_v39 = vadd.f32 %v11688_v61, %v13093_v6 }
 0x396   : > { %v7202_v42 = vunpack.c.l.bf16 %v5480_v11  ;;  %v7203_v55 = vunpack.c.h.bf16 %v5480_v11  ;;  %9026 = vrcp.bf16 %v5434_v37  ;;  %v8218_v44 = vadd.f32 %v8217_v20, %v5178_v22  ;;  %v5180_v33 = vpop.f32.mrb[18].mxu1 }
 0x397   : > { %9028 = vpow.bf16 %v7650_v2  ;;  %v11885_v16 = vadd.f32 %v8219_v23, %v5180_v33  ;;  %v5182_v52 = vpop.f32.mrb[19].mxu1  ;;  %v8225_v41 = vadd.f32 %v11693_v63, %v13092_v3 }
 0x398   : > { %v9015_v15 = vpop.eup %9014  ;;  %7235 = vst.msk [vmem:[%s11855_s14 + $0x10] sm:$0xff] %vm7232_vm12, %v7202_v42  ;;  %7236 = vst.msk [vmem:[%s11855_s14 + $0x18] sm:$0xff] %vm7232_vm12, %v7203_v55  ;;  %9030 = vtanh.bf16 %v5322_v4  ;;  %v8222_v12 = vadd.f32 %v8221_v32, %v5182_v52 }
 0x399   : > { %v9017_v5 = vpop.eup %9016  ;;  %v5456_v59 = vmul.bf16 1065369472, %v9015_v15  ;;  %v5327_v31 = vpack.c.bf16 %v11885_v16, %v11883_v30  ;;  %6357 = vmatmul.mubr.bf16.gmra.mrb[60].mxu1 %v11508_v43  ;;  %v8229_v43 = vadd.f32 %v11693_v63, %v13094_v47 }
 0x39a   : > { %v9019_v51 = vpop.eup %9018  ;;  %v5452_v53 = vmul.bf16 1065369472, %v9017_v5  ;;  %v5359_v38 = vpack.c.bf16 %v8222_v12, %v8218_v44  ;;  %6366 = vmatprep.mubr.bf16.mxu1 %v12827_v49 }
 0x39b   : > { %v9021_v17 = vpop.eup %9020  ;;  %v5483_v26 = vmul.bf16 %v9013_v62, %v5456_v59  ;;  %v5437_v4 = vadd.bf16 1065369472, %v9019_v51 }
 0x39c   : > { %v5481_v20 = vmul.bf16 %v9021_v17, %v5452_v53  ;;  %v7651_v24 = vmul.bf16 3216621497, %v5359_v38  ;;  %v5186_v11 = vpop.f32.mrb[20].mxu1  ;;  %v9023_v42 = vpop.eup %9022  ;;  %v13096_v53 = vld [vmem:[#allocation34_spill] sm:$0xff] }
 0x39d   : > { %v7208_v37 = vunpack.c.l.bf16 %v5483_v26  ;;  %v7209_v2 = vunpack.c.h.bf16 %v5483_v26  ;;  %9032 = vrcp.bf16 %v5437_v4  ;;  %v11906_v50 = vadd.f32 %v8223_v40, %v5186_v11  ;;  %v5188_v36 = vpop.f32.mrb[21].mxu1  ;;  %v13097_v40 = vld [vmem:[#allocation35_spill] sm:$0xff] }
 0x39e   : > { %v7204_v23 = vunpack.c.l.bf16 %v5481_v20  ;;  %v7205_v0 = vunpack.c.h.bf16 %v5481_v20  ;;  %9034 = vpow.bf16 %v7651_v24  ;;  %v8226_v32 = vadd.f32 %v8225_v41, %v5188_v36  ;;  %v5190_v22 = vpop.f32.mrb[22].mxu1  ;;  %v13098_v41 = vld [vmem:[#allocation36_spill] sm:$0xff] }
 0x39f   : > { %7241 = vst.msk [vmem:[%s11855_s14 + $0x40] sm:$0xff] %vm7232_vm12, %v7208_v37  ;;  %7242 = vst.msk [vmem:[%s11855_s14 + $0x48] sm:$0xff] %vm7232_vm12, %v7209_v2  ;;  %9036 = vtanh.bf16 %v5325_v34  ;;  %v11915_v55 = vadd.f32 %v8227_v39, %v5190_v22  ;;  %v5192_v44 = vpop.f32.mrb[23].mxu1  ;;  %v13095_v34 = vld [vmem:[#allocation33_spill] sm:$0xff]  ;;  %v8233_v38 = vadd.f32 %v11693_v63, %v13096_v53  ;;  %v8235_v3 = vadd.f32 %v11688_v61, %v13097_v40 }
 0x3a0   : > { %v9025_v33 = vpop.eup %9024  ;;  %7237 = vst.msk [vmem:[%s11855_s14 + $0x20] sm:$0xff] %vm7232_vm12, %v7204_v23  ;;  %7238 = vst.msk [vmem:[%s11855_s14 + $0x28] sm:$0xff] %vm7232_vm12, %v7205_v0  ;;  %v8230_v62 = vadd.f32 %v8229_v43, %v5192_v44  ;;  %v8231_v51 = vadd.f32 %v11688_v61, %v13095_v34 }
 0x3a1   : > { %v9027_v52 = vpop.eup %9026  ;;  %v5458_v15 = vmul.bf16 1065369472, %v9025_v33  ;;  %v5328_v12 = vpack.c.bf16 %v11915_v55, %v11906_v50  ;;  %6367 = vmatmul.mubr.bf16.gmra.mrb[64].mxu1 %v11539_v14  ;;  %v8237_v14 = vadd.f32 %v11693_v63, %v13098_v41 }
 0x3a2   : > { %v9029_v5 = vpop.eup %9028  ;;  %v5454_v59 = vmul.bf16 1065369472, %v9027_v52  ;;  %v5360_v46 = vpack.c.bf16 %v8230_v62, %v8226_v32  ;;  %6376 = vmatprep.mubr.bf16.mxu1 %v12827_v49 }
 0x3a3   : > { %v9031_v21 = vpop.eup %9030  ;;  %v5484_v17 = vmul.bf16 %v9023_v42, %v5458_v15  ;;  %v5438_v54 = vadd.bf16 1065369472, %v9029_v5  ;;  %v13100_v15 = vld [vmem:[#allocation37_spill] sm:$0xff] }
 0x3a4   : > { %v5482_v26 = vmul.bf16 %v9031_v21, %v5454_v59  ;;  %v7652_v4 = vmul.bf16 3216621497, %v5360_v46  ;;  %v5196_v6 = vpop.f32.mrb[24].mxu1  ;;  %v8241_v5 = vadd.f32 %v11693_v63, %v13100_v15  ;;  %v13101_v59 = vld [vmem:[#allocation38_spill] sm:$0xff] }
 0x3a5   : > { %v7210_v39 = vunpack.c.l.bf16 %v5484_v17  ;;  %v7211_v47 = vunpack.c.h.bf16 %v5484_v17  ;;  %9038 = vrcp.bf16 %v5438_v54  ;;  %v11933_v43 = vadd.f32 %v8231_v51, %v5196_v6  ;;  %v5198_v20 = vpop.f32.mrb[25].mxu1  ;;  %v13102_v17 = vld [vmem:[#allocation39_spill] sm:$0xff] }
 0x3a6   : > { %v7206_v24 = vunpack.c.l.bf16 %v5482_v26  ;;  %v7207_v11 = vunpack.c.h.bf16 %v5482_v26  ;;  %9040 = vpow.bf16 %v7652_v4  ;;  %v8234_v37 = vadd.f32 %v8233_v38, %v5198_v20  ;;  %v5200_v2 = vpop.f32.mrb[26].mxu1  ;;  %v13103_v20 = vld [vmem:[#allocation40_spill] sm:$0xff] }
 0x3a7   : > { %7243 = vst.msk [vmem:[%s11855_s14 + $0x50] sm:$0xff] %vm7232_vm12, %v7210_v39  ;;  %7244 = vst.msk [vmem:[%s11855_s14 + $0x58] sm:$0xff] %vm7232_vm12, %v7211_v47  ;;  %9042 = vtanh.bf16 %v5326_v13  ;;  %v11942_v36 = vadd.f32 %v8235_v3, %v5200_v2  ;;  %v5202_v23 = vpop.f32.mrb[27].mxu1  ;;  %v8239_v13 = vadd.f32 %v11688_v61, %v13099_v25  ;;  %v8243_v46 = vadd.f32 %v11688_v61, %v13101_v59 }
 0x3a8   : > { %v9033_v0 = vpop.eup %9032  ;;  %7239 = vst.msk [vmem:[%s11855_s14 + $0x30] sm:$0xff] %vm7232_vm12, %v7206_v24  ;;  %7240 = vst.msk [vmem:[%s11855_s14 + $0x38] sm:$0xff] %vm7232_vm12, %v7207_v11  ;;  %v8238_v32 = vadd.f32 %v8237_v14, %v5202_v23  ;;  %v8245_v54 = vadd.f32 %v11693_v63, %v13102_v17  ;;  %v8247_v24 = vadd.f32 %v11688_v61, %v13103_v20  ;;  %v13105_v23 = vld [vmem:[#allocation42_spill] sm:$0xff] }
 0x3a9   : > { %v9035_v22 = vpop.eup %9034  ;;  %v5460_v42 = vmul.bf16 1065369472, %v9033_v0  ;;  %v5329_v44 = vpack.c.bf16 %v11942_v36, %v11933_v43  ;;  %6377 = vmatmul.mubr.bf16.gmra.mrb[68].mxu1 %v11555_v9  ;;  %v8251_v0 = vadd.f32 %v11688_v61, %v13105_v23 }
 0x3aa   : > { %v9037_v33 = vpop.eup %9036  ;;  %v5439_v62 = vadd.bf16 1065369472, %v9035_v22  ;;  %v5361_v56 = vpack.c.bf16 %v8238_v32, %v8234_v37  ;;  %6386 = vmatprep.mubr.bf16.mxu1 %v12827_v49  ;;  %v13104_v37 = vld [vmem:[#allocation41_spill] sm:$0xff] }
 0x3ab   : > { %v5485_v52 = vmul.bf16 %v9037_v33, %v5460_v42  ;;  %v8249_v2 = vadd.f32 %v11693_v63, %v13104_v37 }
 0x3ac   : > { %9044 = vrcp.bf16 %v5439_v62  ;;  %v7653_v21 = vmul.bf16 3216621497, %v5361_v56  ;;  %v5206_v9 = vpop.f32.mrb[28].mxu1  ;;  %v13106_v56 = vld [vmem:[#allocation10_spill] sm:$0xff] }
 0x3ad   : > { %v7212_v34 = vunpack.c.l.bf16 %v5485_v52  ;;  %v7213_v51 = vunpack.c.h.bf16 %v5485_v52  ;;  %9046 = vtanh.bf16 %v5327_v31  ;;  %v11961_v53 = vadd.f32 %v8239_v13, %v5206_v9  ;;  %v5208_v38 = vpop.f32.mrb[29].mxu1 }
 0x3ae   : > { %9048 = vpow.bf16 %v7653_v21  ;;  %v8242_v40 = vadd.f32 %v8241_v5, %v5208_v38  ;;  %v5210_v3 = vpop.f32.mrb[30].mxu1  ;;  %v8253_v25 = vadd.f32 %v11693_v63, %v13106_v56  ;;  %v13107_v38 = vld [vmem:[#allocation12_spill] sm:$0xff]  ;;  %v13112_v56 = vld [vmem:[#allocation45_spill] sm:$0xff] }
 0x3af   : > { %7245 = vst.msk [vmem:[%s11855_s14 + $0x60] sm:$0xff] %vm7232_vm12, %v7212_v34  ;;  %7246 = vst.msk [vmem:[%s11855_s14 + $0x68] sm:$0xff] %vm7232_vm12, %v7213_v51  ;;  %v11969_v41 = vadd.f32 %v8243_v46, %v5210_v3  ;;  %v5212_v14 = vpop.f32.mrb[31].mxu1  ;;  %v8255_v17 = vadd.f32 %v11688_v61, %v13107_v38 }
 0x3b0   : > { %v9039_v26 = vpop.eup %9038  ;;  %v8246_v4 = vadd.f32 %v8245_v54, %v5212_v14  ;;  %v13108_v54 = vld [vmem:[#allocation43_spill] sm:$0xff] }
 0x3b1   : > { %v9041_v30 = vpop.eup %9040  ;;  %v5462_v16 = vmul.bf16 1065369472, %v9039_v26  ;;  %v5330_v31 = vpack.c.bf16 %v11969_v41, %v11961_v53  ;;  %6387 = vmatmul.mubr.bf16.gmra.mrb[72].mxu1 %v11571_v18 }
 0x3b2   : > { %v9043_v6 = vpop.eup %9042  ;;  %v5440_v39 = vadd.bf16 1065369472, %v9041_v30  ;;  %v5362_v47 = vpack.c.bf16 %v8246_v4, %v8242_v40  ;;  %6396 = vmatprep.mubr.bf16.mxu1 %v12827_v49  ;;  %v8257_v40 = vadd.f32 %v11693_v63, %v13108_v54  ;;  %v13109_v30 = vld [vmem:[#allocation44_spill] sm:$0xff] }
 0x3b3   : > { %v5486_v11 = vmul.bf16 %v9043_v6, %v5462_v16 }
 0x3b4   : > { %9050 = vrcp.bf16 %v5440_v39  ;;  %v7654_v32 = vmul.bf16 3216621497, %v5362_v47  ;;  %v5216_v18 = vpop.f32.mrb[32].mxu1  ;;  %v13110_v39 = vld [vmem:[#allocation11_spill] sm:$0xff] }
 0x3b5   : > { %v7214_v22 = vunpack.c.l.bf16 %v5486_v11  ;;  %v7215_v42 = vunpack.c.h.bf16 %v5486_v11  ;;  %9052 = vtanh.bf16 %v5328_v12  ;;  %v11984_v33 = vadd.f32 %v8247_v24, %v5216_v18  ;;  %v5218_v62 = vpop.f32.mrb[33].mxu1 }
 0x3b6   : > { %9054 = vpow.bf16 %v7654_v32  ;;  %v8250_v13 = vadd.f32 %v8249_v2, %v5218_v62  ;;  %v5220_v52 = vpop.f32.mrb[34].mxu1  ;;  %v8261_v47 = vadd.f32 %v11693_v63, %v13110_v39 }
 0x3b7   : > { %v9045_v15 = vpop.eup %9044  ;;  %7247 = vst.msk [vmem:[%s11855_s14 + $0x70] sm:$0xff] %vm7232_vm12, %v7214_v22  ;;  %7248 = vst.msk [vmem:[%s11855_s14 + $0x78] sm:$0xff] %vm7232_vm12, %v7215_v42  ;;  %v11992_v5 = vadd.f32 %v8251_v0, %v5220_v52  ;;  %v5222_v59 = vpop.f32.mrb[35].mxu1  ;;  %v13111_v42 = vld [vmem:[#allocation13_spill] sm:$0xff] }
 0x3b8   : > { %v9047_v46 = vpop.eup %9046  ;;  %v5464_v50 = vmul.bf16 1065369472, %v9045_v15  ;;  %v8254_v55 = vadd.f32 %v8253_v25, %v5222_v59  ;;  %v8263_v62 = vadd.f32 %v11688_v61, %v13111_v42  ;;  %v8265_v25 = vadd.f32 %v11693_v63, %v13112_v56 }
 0x3b9   : > { %v9049_v12 = vpop.eup %9048  ;;  %v5331_v21 = vpack.c.bf16 %v11992_v5, %v11984_v33  ;;  %6397 = vmatmul.mubr.bf16.gmra.mrb[76].mxu1 %v11587_v7  ;;  %v8259_v7 = vadd.f32 %v11688_v61, %v13109_v30  ;;  %v13115_v30 = vld [vmem:[#allocation48_spill] sm:$0xff] }
 0x3ba   : > { %v5487_v9 = vmul.bf16 %v9047_v46, %v5464_v50  ;;  %v5441_v34 = vadd.bf16 1065369472, %v9049_v12  ;;  %v5363_v51 = vpack.c.bf16 %v8254_v55, %v8250_v13  ;;  %6406 = vmatprep.mubr.bf16.mxu1 %v12827_v49  ;;  %v13113_v46 = vld [vmem:[#allocation46_spill] sm:$0xff]  ;;  %v13114_v12 = vld [vmem:[#allocation47_spill] sm:$0xff] }
 0x3bc   : > { %v7216_v3 = vunpack.c.l.bf16 %v5487_v9  ;;  %v7217_v14 = vunpack.c.h.bf16 %v5487_v9  ;;  %9056 = vrcp.bf16 %v5441_v34  ;;  %v7655_v26 = vmul.bf16 3216621497, %v5363_v51  ;;  %v5226_v4 = vpop.f32.mrb[36].mxu1 }
 0x3bd   : > { %9058 = vtanh.bf16 %v5329_v44  ;;  %v12007_v16 = vadd.f32 %v8255_v17, %v5226_v4  ;;  %v5228_v6 = vpop.f32.mrb[37].mxu1  ;;  %v8269_v9 = vadd.f32 %v11693_v63, %v13114_v12 }
 0x3be   : > { %7249 = vst.msk [vmem:[%s11855_s14 + $0x80] sm:$0xff] %vm7232_vm12, %v7216_v3  ;;  %7250 = vst.msk [vmem:[%s11855_s14 + $0x88] sm:$0xff] %vm7232_vm12, %v7217_v14  ;;  %9060 = vpow.bf16 %v7655_v26  ;;  %v8258_v20 = vadd.f32 %v8257_v40, %v5228_v6  ;;  %v5230_v24 = vpop.f32.mrb[38].mxu1  ;;  %v13116_v6 = vld [vmem:[#allocation49_spill] sm:$0xff] }
 0x3bf   : > { %v9051_v11 = vpop.eup %9050  ;;  %v12015_v37 = vadd.f32 %v8259_v7, %v5230_v24  ;;  %v5232_v2 = vpop.f32.mrb[39].mxu1  ;;  %v8271_v7 = vadd.f32 %v11688_v61, %v13115_v30  ;;  %v8273_v39 = vadd.f32 %v11693_v63, %v13116_v6  ;;  %v8979_v30 = vld [vmem:[%s12709_s9 + $0x34] ss:$8 sps:$4 sm:$0xff]   ;;  %v8977_v6 = vld [vmem:[%s12709_s9 + $0x30] ss:$8 sps:$4 sm:$0xff]  }
 0x3c0   : > { %v9053_v23 = vpop.eup %9052  ;;  %v5466_v43 = vmul.bf16 1065369472, %v9051_v11  ;;  %v8262_v36 = vadd.f32 %v8261_v47, %v5232_v2  ;;  %v13117_v2 = vld [vmem:[#allocation50_spill] sm:$0xff] }
 0x3c1   : > { %v9055_v44 = vpop.eup %9054  ;;  %v5332_v0 = vpack.c.bf16 %v12015_v37, %v12007_v16  ;;  %6407 = vmatmul.mubr.bf16.gmra.mrb[80].mxu1 %v11603_v28  ;;  %v8267_v28 = vadd.f32 %v11688_v61, %v13113_v46  ;;  %v8970_v37 = vld [vmem:[%s12709_s9 + $0x4] ss:$8 sps:$4 sm:$0xff]  }
 0x3c2   : > { %v5488_v32 = vmul.bf16 %v9053_v23, %v5466_v43  ;;  %v5442_v18 = vadd.bf16 1065369472, %v9055_v44  ;;  %v5364_v22 = vpack.c.bf16 %v8262_v36, %v8258_v20  ;;  %6416 = vmatprep.mubr.bf16.mxu1 %v12827_v49  ;;  %v13118_v36 = vld [vmem:[#allocation51_spill] sm:$0xff]  ;;  %6911 = vmatprep.subr.bf16.mxu0 %v8970_v37 }
 0x3c3   : > { %v8277_v44 = vadd.f32 %v11693_v63, %v13118_v36 }
 0x3c4   : > { %v7218_v13 = vunpack.c.l.bf16 %v5488_v32  ;;  %v7219_v52 = vunpack.c.h.bf16 %v5488_v32  ;;  %9062 = vrcp.bf16 %v5442_v18  ;;  %v7656_v15 = vmul.bf16 3216621497, %v5364_v22  ;;  %v5236_v59 = vpop.f32.mrb[40].mxu1 }
 0x3c5   : > { %9064 = vtanh.bf16 %v5330_v31  ;;  %v12030_v50 = vadd.f32 %v8263_v62, %v5236_v59  ;;  %v5238_v55 = vpop.f32.mrb[41].mxu1 }
 0x3c6   : > { %7251 = vst.msk [vmem:[%s11855_s14 + $0x90] sm:$0xff] %vm7232_vm12, %v7218_v13  ;;  %7252 = vst.msk [vmem:[%s11855_s14 + $0x98] sm:$0xff] %vm7232_vm12, %v7219_v52  ;;  %9066 = vpow.bf16 %v7656_v15  ;;  %v8266_v34 = vadd.f32 %v8265_v25, %v5238_v55  ;;  %v5240_v51 = vpop.f32.mrb[42].mxu1 }
 0x3c7   : > { %v9057_v38 = vpop.eup %9056  ;;  %v12038_v17 = vadd.f32 %v8267_v28, %v5240_v51  ;;  %v5242_v54 = vpop.f32.mrb[43].mxu1 }
 0x3c8   : > { %v9059_v40 = vpop.eup %9058  ;;  %v5468_v53 = vmul.bf16 1065369472, %v9057_v38  ;;  %v8270_v41 = vadd.f32 %v8269_v9, %v5242_v54 }
 0x3c9   : > { %v9061_v31 = vpop.eup %9060  ;;  %v5333_v3 = vpack.c.bf16 %v12038_v17, %v12030_v50  ;;  %6417 = vmatmul.mubr.bf16.gmra.mrb[84].mxu1 %v11619_v29  ;;  %v8275_v29 = vadd.f32 %v11688_v61, %v13117_v2  ;;  %v8973_v17 = vld [vmem:[%s12709_s9 + $0x14] ss:$8 sps:$4 sm:$0xff]  }
 0x3ca   : > { %v5489_v14 = vmul.bf16 %v9059_v40, %v5468_v53  ;;  %v5443_v26 = vadd.bf16 1065369472, %v9061_v31  ;;  %v5365_v4 = vpack.c.bf16 %v8270_v41, %v8266_v34  ;;  %6426 = vmatprep.mubr.bf16.mxu1 %v12827_v49  ;;  %v8971_v53 = vld [vmem:[%s12709_s9 + $0x10] ss:$8 sps:$4 sm:$0xff]  }
 0x3cc   : > { %v7220_v47 = vunpack.c.l.bf16 %v5489_v14  ;;  %v7221_v20 = vunpack.c.h.bf16 %v5489_v14  ;;  %9068 = vrcp.bf16 %v5443_v26  ;;  %v7657_v24 = vmul.bf16 3216621497, %v5365_v4  ;;  %v5246_v11 = vpop.f32.mrb[44].mxu1 }
 0x3cd   : > { %9070 = vtanh.bf16 %v5331_v21  ;;  %v12053_v23 = vadd.f32 %v8271_v7, %v5246_v11  ;;  %v5248_v43 = vpop.f32.mrb[45].mxu1 }
 0x3ce   : > { %7253 = vst.msk [vmem:[%s11855_s14 + $0xa0] sm:$0xff] %vm7232_vm12, %v7220_v47  ;;  %7254 = vst.msk [vmem:[%s11855_s14 + $0xa8] sm:$0xff] %vm7232_vm12, %v7221_v20  ;;  %9072 = vpow.bf16 %v7657_v24  ;;  %v8274_v32 = vadd.f32 %v8273_v39, %v5248_v43  ;;  %v5250_v18 = vpop.f32.mrb[46].mxu1  ;;  %v8982_v20 = vld [vmem:[%s12709_s9 + $0x44] ss:$8 sps:$4 sm:$0xff]  }
 0x3cf   : > { %v9063_v22 = vpop.eup %9062  ;;  %v8276_v42 = vadd.f32 %v8275_v29, %v5250_v18  ;;  %v5252_v61 = vpop.f32.mrb[47].mxu1  ;;  %v8985_v29 = vld [vmem:[%s12709_s9 + $0x54] ss:$8 sps:$4 sm:$0xff]   ;;  %v8983_v43 = vld [vmem:[%s12709_s9 + $0x50] ss:$8 sps:$4 sm:$0xff]  }
 0x3d0   : > { %v9065_v62 = vpop.eup %9064  ;;  %v5470_v33 = vmul.bf16 1065369472, %v9063_v22  ;;  %v8278_v5 = vadd.f32 %v8277_v44, %v5252_v61  ;;  %v8991_v18 = vld [vmem:[%s12709_s9 + $0x74] ss:$8 sps:$4 sm:$0xff]   ;;  %v8989_v22 = vld [vmem:[%s12709_s9 + $0x70] ss:$8 sps:$4 sm:$0xff]  }
 0x3d1   : > { %v9067_v21 = vpop.eup %9066  ;;  %v5334_v56 = vpack.c.bf16 %v8276_v42, %v12053_v23  ;;  %6427 = vmatmul.mubr.bf16.gmra.mrb[88].mxu1 %v11635_v8  ;;  %v4700_v42 = vsub.s32 2, %v13068_v10  ;;  %v4704_v61 = vsub.s32 3, %v13068_v10  ;;  %v13121_v10 = vld [vmem:[#allocation54_spill] sm:$0xff] }
 0x3d2   : > { %v5490_v63 = vmul.bf16 %v9065_v62, %v5470_v33  ;;  %v5444_v25 = vadd.bf16 1065369472, %v9067_v21  ;;  %v5366_v13 = vpack.c.bf16 %v8278_v5, %v8274_v32  ;;  %6436 = vmatprep.mubr.bf16.mxu1 %v12827_v49  ;;  %v8988_v32 = vld [vmem:[%s12709_s9 + $0x64] ss:$8 sps:$4 sm:$0xff]   ;;  %v9187_v62 = vld [vmem:[%s12705_s5] sm:$0xf] }
 0x3d3   : > { %v12149_v33 = vrot.slane %v9187_v62, %v4700_v42  ;;  %v13119_v5 = vld [vmem:[#allocation52_spill] sm:$0xff] }
 0x3d4   : > { %v7222_v52 = vunpack.c.l.bf16 %v5490_v63  ;;  %v7223_v15 = vunpack.c.h.bf16 %v5490_v63  ;;  %9074 = vrcp.bf16 %v5444_v25  ;;  %v7658_v59 = vmul.bf16 3216621497, %v5366_v13  ;;  %v6487_v25 = vld [vmem:[%s12708_s8] sm:$0x3] }
 0x3d5   : > { %9076 = vtanh.bf16 %v5332_v0  ;;  %v8279_v21 = vadd.f32 %v12149_v33, %v13119_v5 }
 0x3d6   : > { %7255 = vst.msk [vmem:[%s11855_s14 + $0xb0] sm:$0xff] %vm7232_vm12, %v7222_v52  ;;  %7256 = vst.msk [vmem:[%s11855_s14 + $0xb8] sm:$0xff] %vm7232_vm12, %v7223_v15  ;;  %9078 = vpow.bf16 %v7658_v59  ;;  %v8285_v52 = vadd.f32 %v12149_v33, %v13121_v10  ;;  %v12163_v15 = vrot.slane %v6487_v25, %v11671_v45 }
 0x3d7   : > { %v9069_v8 = vpop.eup %9068 }
 0x3d8   : > { %v9071_v46 = vpop.eup %9070  ;;  %v5472_v28 = vmul.bf16 1065369472, %v9069_v8 }
 0x3d9   : > { %v9073_v50 = vpop.eup %9072  ;;  %6437 = vmatmul.mubr.bf16.gmra.mrb[92].mxu1 %v11651_v1  ;;  %v8968_v1 = vld [vmem:[%s12709_s9] ss:$8 sps:$4 sm:$0xff]  }
 0x3da   : > { %v5491_v55 = vmul.bf16 %v9071_v46, %v5472_v28  ;;  %v5445_v12 = vadd.bf16 1065369472, %v9073_v50  ;;  %6446 = vmatprep.mubr.bf16.mxu1 %v12827_v49  ;;  %6912 = vmatpush1.bf16.msra.mxu0 %v8968_v1  ;;  %v13122_v46 = vld [vmem:[#allocation55_spill] sm:$0xff]  ;;  %v12168_v50 = vrot.slane %v6487_v25, %v11681_v19 }
 0x3db   : > { %6913 = vmatprep.subr.bf16.mxu0 %v8973_v17 }
 0x3dc   : > { %v7224_v9 = vunpack.c.l.bf16 %v5491_v55  ;;  %v7225_v16 = vunpack.c.h.bf16 %v5491_v55  ;;  %9080 = vrcp.bf16 %v5445_v12 }
 0x3dd   : > { %9082 = vtanh.bf16 %v5333_v3  ;;  %v8974_v3 = vld [vmem:[%s12709_s9 + $0x20] ss:$8 sps:$4 sm:$0xff]  }
 0x3de   : > { %7257 = vst.msk [vmem:[%s11855_s14 + $0xc0] sm:$0xff] %vm7232_vm12, %v7224_v9  ;;  %7258 = vst.msk [vmem:[%s11855_s14 + $0xc8] sm:$0xff] %vm7232_vm12, %v7225_v16  ;;  %6914 = vmatpush1.bf16.msra.mxu0 %v8971_v53 }
 0x3df   : > { %v9075_v0 = vpop.eup %9074 }
 0x3e0   : > { %v9077_v34 = vpop.eup %9076  ;;  %v5474_v51 = vmul.bf16 1065369472, %v9075_v0 }
 0x3e1   : > { %v9079_v38 = vpop.eup %9078  ;;  %6447 = vmatmul.mubr.bf16.gmra.mrb[96].mxu1 %v11684_v48  ;;  %v8976_v48 = vld [vmem:[%s12709_s9 + $0x24] ss:$8 sps:$4 sm:$0xff]  }
 0x3e2   : > { %v5492_v54 = vmul.bf16 %v9077_v34, %v5474_v51  ;;  %v5446_v40 = vadd.bf16 1065369472, %v9079_v38  ;;  %6456 = vmatprep.mubr.bf16.mxu1 %v12827_v49  ;;  %6915 = vmatprep.subr.bf16.mxu0 %v8976_v48  ;;  %v13123_v38 = vld [vmem:[#allocation56_spill] sm:$0xff]  ;;  %v13125_v48 = vld [vmem:[#allocation58_spill] sm:$0xff] }
 0x3e3   : > { %6916 = vmatpush1.bf16.msra.mxu0 %v8974_v3  ;;  %v8291_v17 = vadd.f32 %v12149_v33, %v13123_v38  ;;  %v8297_v3 = vadd.f32 %v12149_v33, %v13125_v48  ;;  %v13132_v38 = vld [vmem:[#allocation63_spill] sm:$0xff] }
 0x3e4   : > { %v7226_v41 = vunpack.c.l.bf16 %v5492_v54  ;;  %v7227_v31 = vunpack.c.h.bf16 %v5492_v54  ;;  %9084 = vrcp.bf16 %v5446_v40  ;;  %6917 = vmatprep.subr.bf16.mxu0 %v8979_v30  ;;  %v13124_v40 = vld [vmem:[#allocation57_spill] sm:$0xff] }
 0x3e5   : > { %9086 = vtanh.bf16 %v5334_v56  ;;  %v13120_v56 = vld [vmem:[#allocation53_spill] sm:$0xff] }
 0x3e6   : > { %7259 = vst.msk [vmem:[%s11855_s14 + $0xd0] sm:$0xff] %vm7232_vm12, %v7226_v41  ;;  %7260 = vst.msk [vmem:[%s11855_s14 + $0xd8] sm:$0xff] %vm7232_vm12, %v7227_v31 }
 0x3e7   : > { %v9081_v14 = vpop.eup %9080  ;;  %6918 = vmatpush1.bf16.msra.mxu0 %v8977_v6 }
 0x3e8   : > { %v5476_v26 = vmul.bf16 1065369472, %v9081_v14  ;;  %v9083_v4 = vpop.eup %9082  ;;  %6919 = vmatprep.subr.bf16.mxu0 %v8982_v20 }
 0x3e9   : > { %6457 = vmatmul.mubr.bf16.gmra.mrb[100].mxu1 %v11716_v58  ;;  %v8980_v58 = vld [vmem:[%s12709_s9 + $0x40] ss:$8 sps:$4 sm:$0xff]  }
 0x3ea   : > { %v5493_v7 = vmul.bf16 %v9083_v4, %v5476_v26  ;;  %6466 = vmatprep.mubr.bf16.mxu1 %v12827_v49  ;;  %v13126_v4 = vld [vmem:[#allocation59_spill] sm:$0xff] }
 0x3eb   : > { %6920 = vmatpush1.bf16.msra.mxu0 %v8980_v58 }
 0x3ec   : > { %v7228_v39 = vunpack.c.l.bf16 %v5493_v7  ;;  %v7229_v47 = vunpack.c.h.bf16 %v5493_v7  ;;  %6921 = vmatprep.subr.bf16.mxu0 %v8985_v29 }
 0x3ee   : > { %7261 = vst.msk [vmem:[%s11855_s14 + $0xe0] sm:$0xff] %vm7232_vm12, %v7228_v39  ;;  %7262 = vst.msk [vmem:[%s11855_s14 + $0xe8] sm:$0xff] %vm7232_vm12, %v7229_v47 }
 0x3ef   : > { %v9085_v24 = vpop.eup %9084  ;;  %6922 = vmatpush1.bf16.msra.mxu0 %v8983_v43 }
 0x3f0   : > { %v5478_v11 = vmul.bf16 1065369472, %v9085_v24  ;;  %v9087_v2 = vpop.eup %9086  ;;  %6923 = vmatprep.subr.bf16.mxu0 %v8988_v32 }
 0x3f1   : > { %6467 = vmatmul.mubr.bf16.gmra.mrb[104].mxu1 %v11748_v57  ;;  %v8986_v57 = vld [vmem:[%s12709_s9 + $0x60] ss:$8 sps:$4 sm:$0xff]  }
 0x3f2   : > { %v5494_v23 = vmul.bf16 %v9087_v2, %v5478_v11  ;;  %6476 = vmatprep.mubr.bf16.mxu1 %v12827_v49 }
 0x3f3   : > { %6924 = vmatpush1.bf16.msra.mxu0 %v8986_v57 }
 0x3f4   : > { %v7230_v36 = vunpack.c.l.bf16 %v5494_v23  ;;  %v7231_v44 = vunpack.c.h.bf16 %v5494_v23  ;;  %6925 = vmatprep.subr.bf16.mxu0 %v8991_v18  ;;  %v13127_v23 = vld [vmem:[#allocation60_spill] sm:$0xff] }
 0x3f5   : > { %v8303_v43 = vadd.f32 %v12149_v33, %v13127_v23 }
 0x3f6   : > { %7263 = vst.msk [vmem:[%s11855_s14 + $0xf0] sm:$0xff] %vm7232_vm12, %v7230_v36  ;;  %7264 = vst.msk [vmem:[%s11855_s14 + $0xf8] sm:$0xff] %vm7232_vm12, %v7231_v44  ;;  %v13128_v44 = vld [vmem:[#allocation7_spill] sm:$0xff] }
 0x3f7   : > { %6926 = vmatpush1.bf16.msra.mxu0 %v8989_v22  ;;  %v8309_v22 = vadd.f32 %v12149_v33, %v11381_v27 }
 0x3f9   : > { %6477 = vmatmul.mubr.bf16.gmra.mrb[108].mxu1 %v11790_v60  ;;  %v12151_v60 = vrot.slane %v9187_v62, %v4704_v61 }
 0x3fb   : > { %v8282_v63 = vadd.f32 %v12151_v60, %v13120_v56  ;;  %v8288_v28 = vadd.f32 %v12151_v60, %v13122_v46  ;;  %v8294_v53 = vadd.f32 %v12151_v60, %v13124_v40  ;;  %v8300_v30 = vadd.f32 %v12151_v60, %v13126_v4  ;;  %v13129_v46 = vld [vmem:[#allocation8_spill] sm:$0xff] }
 0x3fc   : > { %v8306_v32 = vadd.f32 %v12151_v60, %v13128_v44  ;;  %v8312_v62 = vadd.f32 %v12151_v60, %v11383_v35  ;;  %v8315_v35 = vadd.f32 %v12149_v33, %v13129_v46  ;;  %v13136_v44 = vld [vmem:[#allocation67_spill] sm:$0xff] }
 0x454   : > { %v6328_v13 = vpop.f32.mrb[48].mxu1 }
 0x455   : > { %v8280_v59 = vadd.f32 %v8279_v21, %v6328_v13  ;;  %v6330_v8 = vpop.f32.mrb[49].mxu1 }
 0x456   : > { %v8283_v55 = vadd.f32 %v8282_v63, %v6330_v8  ;;  %v6332_v12 = vpop.f32.mrb[50].mxu1 }
 0x457   : > { %v8286_v9 = vadd.f32 %v8285_v52, %v6332_v12  ;;  %v6334_v16 = vpop.f32.mrb[51].mxu1  ;;  %v8281_v1 = vadd.f32 %v8280_v59, %v12163_v15 }
 0x458   : > { %v8289_v37 = vadd.f32 %v8288_v28, %v6334_v16  ;;  %v8284_v34 = vadd.f32 %v8283_v55, %v12168_v50  ;;  %v13130_v55 = vld [vmem:[#allocation61_spill] sm:$0xff] }
 0x459   : > { %v8287_v0 = vadd.f32 %v8286_v9, %v12163_v15  ;;  %v8318_v12 = vadd.f32 %v12151_v60, %v13130_v55 }
 0x45a   : > { %v8290_v51 = vadd.f32 %v8289_v37, %v12168_v50 }
 0x45b   : > { %v6595_v54 = vpack.c.bf16 %v8287_v0, %v8281_v1  ;;  %v13131_v1 = vld [vmem:[#allocation62_spill] sm:$0xff] }
 0x45c   : > { %v6643_v41 = vpack.c.bf16 %v8290_v51, %v8284_v34  ;;  %v6338_v31 = vpop.f32.mrb[52].mxu1  ;;  %v8321_v0 = vadd.f32 %v12149_v33, %v13131_v1  ;;  %v13139_v1 = vld [vmem:[#allocation70_spill] sm:$0xff] }
 0x45d   : > { %v8292_v14 = vadd.f32 %v8291_v17, %v6338_v31  ;;  %v6340_v26 = vpop.f32.mrb[53].mxu1  ;;  %v8324_v17 = vadd.f32 %v12151_v60, %v13132_v38  ;;  %v13140_v38 = vld [vmem:[#allocation14_spill] sm:$0xff] }
 0x45e   : > { %v7740_v7 = vmul.bf16 3216621497, %v6643_v41  ;;  %v8295_v6 = vadd.f32 %v8294_v53, %v6340_v26  ;;  %v6342_v39 = vpop.f32.mrb[54].mxu1 }
 0x45f   : > { %v8298_v47 = vadd.f32 %v8297_v3, %v6342_v39  ;;  %v6344_v20 = vpop.f32.mrb[55].mxu1  ;;  %v12183_v24 = vadd.f32 %v8292_v14, %v12163_v15 }
 0x460   : > { %9088 = vpow.bf16 %v7740_v7  ;;  %v8301_v58 = vadd.f32 %v8300_v30, %v6344_v20  ;;  %v8296_v2 = vadd.f32 %v8295_v6, %v12168_v50  ;;  %v13133_v6 = vld [vmem:[#allocation64_spill] sm:$0xff] }
 0x461   : > { %v8299_v11 = vadd.f32 %v8298_v47, %v12163_v15  ;;  %v8327_v39 = vadd.f32 %v12149_v33, %v13133_v6  ;;  %v13134_v47 = vld [vmem:[#allocation65_spill] sm:$0xff] }
 0x462   : > { %v8302_v29 = vadd.f32 %v8301_v58, %v12168_v50  ;;  %v8330_v20 = vadd.f32 %v12151_v60, %v13134_v47 }
 0x463   : > { %v6596_v36 = vpack.c.bf16 %v8299_v11, %v12183_v24 }
 0x464   : > { %v6644_v57 = vpack.c.bf16 %v8302_v29, %v8296_v2  ;;  %v6348_v18 = vpop.f32.mrb[56].mxu1  ;;  %v13135_v2 = vld [vmem:[#allocation66_spill] sm:$0xff] }
 0x465   : > { %v8304_v42 = vadd.f32 %v8303_v43, %v6348_v18  ;;  %v6350_v61 = vpop.f32.mrb[57].mxu1  ;;  %v8333_v29 = vadd.f32 %v12149_v33, %v13135_v2 }
 0x466   : > { %v7741_v5 = vmul.bf16 3216621497, %v6644_v57  ;;  %v8307_v21 = vadd.f32 %v8306_v32, %v6350_v61  ;;  %v6352_v56 = vpop.f32.mrb[58].mxu1  ;;  %v8336_v32 = vadd.f32 %v12151_v60, %v13136_v44  ;;  %v13143_v44 = vld [vmem:[#allocation73_spill] sm:$0xff] }
 0x467   : > { %v8310_v63 = vadd.f32 %v8309_v22, %v6352_v56  ;;  %v6354_v25 = vpop.f32.mrb[59].mxu1  ;;  %v12198_v10 = vadd.f32 %v8304_v42, %v12163_v15 }
 0x468   : > { %9090 = vpow.bf16 %v7741_v5  ;;  %v8313_v13 = vadd.f32 %v8312_v62, %v6354_v25  ;;  %v8308_v27 = vadd.f32 %v8307_v21, %v12168_v50 }
 0x469   : > { %v12201_v52 = vadd.f32 %v8310_v63, %v12163_v15 }
 0x46a   : > { %v8314_v59 = vadd.f32 %v8313_v13, %v12168_v50 }
 0x46b   : > { %v9089_v8 = vpop.eup %9088  ;;  %v6597_v28 = vpack.c.bf16 %v12201_v52, %v12198_v10 }
 0x46c   : > { %v6739_v9 = vadd.bf16 1065369472, %v9089_v8  ;;  %v6645_v16 = vpack.c.bf16 %v8314_v59, %v8308_v27  ;;  %v6358_v37 = vpop.f32.mrb[60].mxu1  ;;  %v13137_v8 = vld [vmem:[#allocation68_spill] sm:$0xff] }
 0x46d   : > { %v8316_v34 = vadd.f32 %v8315_v35, %v6358_v37  ;;  %v6360_v51 = vpop.f32.mrb[61].mxu1  ;;  %v13138_v35 = vld [vmem:[#allocation69_spill] sm:$0xff] }
 0x46e   : > { %9092 = vrcp.bf16 %v6739_v9  ;;  %v7742_v40 = vmul.bf16 3216621497, %v6645_v16  ;;  %v8319_v53 = vadd.f32 %v8318_v12, %v6360_v51  ;;  %v6362_v41 = vpop.f32.mrb[62].mxu1  ;;  %v8342_v55 = vadd.f32 %v12151_v60, %v13138_v35 }
 0x46f   : > { %9094 = vtanh.bf16 %v6595_v54  ;;  %v8322_v31 = vadd.f32 %v8321_v0, %v6362_v41  ;;  %v6364_v48 = vpop.f32.mrb[63].mxu1  ;;  %v12216_v14 = vadd.f32 %v8316_v34, %v12163_v15  ;;  %v8345_v0 = vadd.f32 %v12149_v33, %v13139_v1 }
 0x470   : > { %9096 = vpow.bf16 %v7742_v40  ;;  %v8325_v3 = vadd.f32 %v8324_v17, %v6364_v48  ;;  %v8320_v4 = vadd.f32 %v8319_v53, %v12168_v50  ;;  %v8348_v17 = vadd.f32 %v12151_v60, %v13140_v38  ;;  %v13147_v38 = vld [vmem:[#allocation77_spill] sm:$0xff] }
 0x471   : > { %v12219_v26 = vadd.f32 %v8322_v31, %v12163_v15 }
 0x472   : > { %v8326_v30 = vadd.f32 %v8325_v3, %v12168_v50 }
 0x473   : > { %v9091_v7 = vpop.eup %9090  ;;  %v6598_v54 = vpack.c.bf16 %v12219_v26, %v12216_v14 }
 0x474   : > { %v6740_v58 = vadd.bf16 1065369472, %v9091_v7  ;;  %v6646_v24 = vpack.c.bf16 %v8326_v30, %v8320_v4  ;;  %v6368_v11 = vpop.f32.mrb[64].mxu1 }
 0x475   : > { %v8328_v23 = vadd.f32 %v8327_v39, %v6368_v11  ;;  %v6370_v43 = vpop.f32.mrb[65].mxu1 }
 0x476   : > { %v7743_v57 = vmul.bf16 3216621497, %v6646_v24  ;;  %v8331_v18 = vadd.f32 %v8330_v20, %v6370_v43  ;;  %v6372_v22 = vpop.f32.mrb[66].mxu1  ;;  %9098 = vrcp.bf16 %v6740_v58  ;;  %v13142_v24 = vld [vmem:[#allocation72_spill] sm:$0xff] }
 0x477   : > { %9100 = vtanh.bf16 %v6596_v36  ;;  %v8334_v42 = vadd.f32 %v8333_v29, %v6372_v22  ;;  %v6374_v61 = vpop.f32.mrb[67].mxu1  ;;  %v12234_v21 = vadd.f32 %v8328_v23, %v12163_v15  ;;  %v8339_v36 = vadd.f32 %v12149_v33, %v13137_v8  ;;  %v13144_v22 = vld [vmem:[#allocation74_spill] sm:$0xff] }
 0x478   : > { %9102 = vpow.bf16 %v7743_v57  ;;  %v8337_v62 = vadd.f32 %v8336_v32, %v6374_v61  ;;  %v8332_v13 = vadd.f32 %v8331_v18, %v12168_v50  ;;  %v8354_v11 = vadd.f32 %v12151_v60, %v13142_v24 }
 0x479   : > { %v9093_v5 = vpop.eup %9092  ;;  %v12237_v56 = vadd.f32 %v8334_v42, %v12163_v15  ;;  %v8357_v32 = vadd.f32 %v12149_v33, %v13143_v44  ;;  %v8360_v42 = vadd.f32 %v12151_v60, %v13144_v22  ;;  %v13151_v22 = vld [vmem:[#allocation80_spill] sm:$0xff] }
 0x47a   : > { %v9095_v63 = vpop.eup %9094  ;;  %v6756_v25 = vmul.bf16 1065369472, %v9093_v5  ;;  %v8338_v27 = vadd.f32 %v8337_v62, %v12168_v50 }
 0x47b   : > { %v9097_v59 = vpop.eup %9096  ;;  %v6599_v46 = vpack.c.bf16 %v12237_v56, %v12234_v21 }
 0x47c   : > { %v6741_v12 = vadd.bf16 1065369472, %v9097_v59  ;;  %v6647_v9 = vpack.c.bf16 %v8338_v27, %v8332_v13  ;;  %v6378_v16 = vpop.f32.mrb[68].mxu1  ;;  %v6787_v37 = vmul.bf16 %v9095_v63, %v6756_v25 }
 0x47d   : > { %v8340_v34 = vadd.f32 %v8339_v36, %v6378_v16  ;;  %v6380_v51 = vpop.f32.mrb[69].mxu1  ;;  %v13146_v16 = vld [vmem:[#allocation76_spill] sm:$0xff] }
 0x47e   : > { %v7744_v40 = vmul.bf16 3216621497, %v6647_v9  ;;  %v8343_v53 = vadd.f32 %v8342_v55, %v6380_v51  ;;  %v6382_v41 = vpop.f32.mrb[70].mxu1  ;;  %6944 = vmatmul.mubr.bf16.vlgmr.msra.gmra.mrb[168].mxu0 %v6787_v37  ;;  %9104 = vrcp.bf16 %v6741_v12  ;;  %v8366_v37 = vadd.f32 %v12151_v60, %v13146_v16 }
 0x47f   : > { %9106 = vtanh.bf16 %v6597_v28  ;;  %v8346_v31 = vadd.f32 %v8345_v0, %v6382_v41  ;;  %v6384_v48 = vpop.f32.mrb[71].mxu1  ;;  %6953 = vmatprep.mubr.bf16.mxu0 %v12827_v49  ;;  %v12256_v30 = vadd.f32 %v8340_v34, %v12163_v15  ;;  %v13141_v28 = vld [vmem:[#allocation71_spill] sm:$0xff]  ;;  %v13148_v41 = vld [vmem:[#allocation78_spill] sm:$0xff] }
 0x480   : > { %9108 = vpow.bf16 %v7744_v40  ;;  %v8349_v3 = vadd.f32 %v8348_v17, %v6384_v48  ;;  %v8344_v39 = vadd.f32 %v8343_v53, %v12168_v50  ;;  %v8351_v20 = vadd.f32 %v12149_v33, %v13141_v28 }
 0x481   : > { %v9099_v4 = vpop.eup %9098  ;;  %v12259_v7 = vadd.f32 %v8346_v31, %v12163_v15  ;;  %v8369_v17 = vadd.f32 %v12149_v33, %v13147_v38  ;;  %v8372_v31 = vadd.f32 %v12151_v60, %v13148_v41  ;;  %v13155_v41 = vld [vmem:[#allocation84_spill] sm:$0xff] }
 0x482   : > { %v9101_v6 = vpop.eup %9100  ;;  %v8350_v47 = vadd.f32 %v8349_v3, %v12168_v50  ;;  %v6758_v10 = vmul.bf16 1065369472, %v9099_v4 }
 0x483   : > { %v9103_v52 = vpop.eup %9102  ;;  %v6600_v58 = vpack.c.bf16 %v12259_v7, %v12256_v30 }
 0x484   : > { %v6742_v2 = vadd.bf16 1065369472, %v9103_v52  ;;  %v6648_v29 = vpack.c.bf16 %v8350_v47, %v8344_v39  ;;  %v6388_v23 = vpop.f32.mrb[72].mxu1  ;;  %v6788_v43 = vmul.bf16 %v9101_v6, %v6758_v10 }
 0x485   : > { %v8352_v57 = vadd.f32 %v8351_v20, %v6388_v23  ;;  %v6390_v18 = vpop.f32.mrb[73].mxu1  ;;  %v13150_v23 = vld [vmem:[#allocation79_spill] sm:$0xff] }
 0x486   : > { %v7745_v61 = vmul.bf16 3216621497, %v6648_v29  ;;  %v8355_v62 = vadd.f32 %v8354_v11, %v6390_v18  ;;  %v6392_v5 = vpop.f32.mrb[74].mxu1  ;;  %6954 = vmatmul.mubr.bf16.gmra.mrb[172].mxu0 %v6788_v43  ;;  %9110 = vrcp.bf16 %v6742_v2  ;;  %v8378_v43 = vadd.f32 %v12151_v60, %v13150_v23 }
 0x487   : > { %9112 = vtanh.bf16 %v6598_v54  ;;  %v8358_v63 = vadd.f32 %v8357_v32, %v6392_v5  ;;  %v6394_v25 = vpop.f32.mrb[75].mxu1  ;;  %6963 = vmatprep.mubr.bf16.mxu0 %v12827_v49  ;;  %v12278_v59 = vadd.f32 %v8352_v57, %v12163_v15  ;;  %v13145_v54 = vld [vmem:[#allocation75_spill] sm:$0xff]  ;;  %v13152_v5 = vld [vmem:[#allocation81_spill] sm:$0xff] }
 0x488   : > { %9114 = vpow.bf16 %v7745_v61  ;;  %v8361_v13 = vadd.f32 %v8360_v42, %v6394_v25  ;;  %v8356_v35 = vadd.f32 %v8355_v62, %v12168_v50  ;;  %v8363_v12 = vadd.f32 %v12149_v33, %v13145_v54 }
 0x489   : > { %v9105_v27 = vpop.eup %9104  ;;  %v12281_v8 = vadd.f32 %v8358_v63, %v12163_v15  ;;  %v8381_v42 = vadd.f32 %v12149_v33, %v13151_v22  ;;  %v8384_v63 = vadd.f32 %v12151_v60, %v13152_v5  ;;  %v13159_v5 = vld [vmem:[#allocation88_spill] sm:$0xff] }
 0x48a   : > { %v9107_v36 = vpop.eup %9106  ;;  %v8362_v55 = vadd.f32 %v8361_v13, %v12168_v50  ;;  %v6760_v14 = vmul.bf16 1065369472, %v9105_v27 }
 0x48b   : > { %v9109_v26 = vpop.eup %9108  ;;  %v6601_v9 = vpack.c.bf16 %v12281_v8, %v12278_v59 }
 0x48c   : > { %v6743_v1 = vadd.bf16 1065369472, %v9109_v26  ;;  %v6649_v0 = vpack.c.bf16 %v8362_v55, %v8356_v35  ;;  %v6398_v34 = vpop.f32.mrb[76].mxu1  ;;  %v6789_v51 = vmul.bf16 %v9107_v36, %v6760_v14 }
 0x48d   : > { %v8364_v40 = vadd.f32 %v8363_v12, %v6398_v34  ;;  %v6400_v53 = vpop.f32.mrb[77].mxu1  ;;  %v13154_v34 = vld [vmem:[#allocation83_spill] sm:$0xff] }
 0x48e   : > { %v7746_v48 = vmul.bf16 3216621497, %v6649_v0  ;;  %v8367_v3 = vadd.f32 %v8366_v37, %v6400_v53  ;;  %v6402_v4 = vpop.f32.mrb[78].mxu1  ;;  %6964 = vmatmul.mubr.bf16.gmra.mrb[176].mxu0 %v6789_v51  ;;  %9116 = vrcp.bf16 %v6743_v1  ;;  %v8390_v51 = vadd.f32 %v12151_v60, %v13154_v34 }
 0x48f   : > { %9118 = vtanh.bf16 %v6599_v46  ;;  %v8370_v6 = vadd.f32 %v8369_v17, %v6402_v4  ;;  %v6404_v39 = vpop.f32.mrb[79].mxu1  ;;  %6973 = vmatprep.mubr.bf16.mxu0 %v12827_v49  ;;  %v12300_v52 = vadd.f32 %v8364_v40, %v12163_v15  ;;  %v13149_v46 = vld [vmem:[#allocation15_spill] sm:$0xff]  ;;  %v13156_v4 = vld [vmem:[#allocation85_spill] sm:$0xff] }
 0x490   : > { %9120 = vpow.bf16 %v7746_v48  ;;  %v8373_v47 = vadd.f32 %v8372_v31, %v6404_v39  ;;  %v8368_v24 = vadd.f32 %v8367_v3, %v12168_v50  ;;  %v8375_v2 = vadd.f32 %v12149_v33, %v13149_v46 }
 0x491   : > { %v9111_v10 = vpop.eup %9110  ;;  %v12303_v28 = vadd.f32 %v8370_v6, %v12163_v15  ;;  %v8393_v31 = vadd.f32 %v12149_v33, %v13155_v41  ;;  %v8396_v6 = vadd.f32 %v12151_v60, %v13156_v4  ;;  %v13163_v4 = vld [vmem:[#allocation92_spill] sm:$0xff] }
 0x492   : > { %v9113_v20 = vpop.eup %9112  ;;  %v8374_v11 = vadd.f32 %v8373_v47, %v12168_v50  ;;  %v6762_v21 = vmul.bf16 1065369472, %v9111_v10 }
 0x493   : > { %v9115_v56 = vpop.eup %9114  ;;  %v6602_v29 = vpack.c.bf16 %v12303_v28, %v12300_v52 }
 0x494   : > { %v6744_v44 = vadd.bf16 1065369472, %v9115_v56  ;;  %v6650_v32 = vpack.c.bf16 %v8374_v11, %v8368_v24  ;;  %v6408_v57 = vpop.f32.mrb[80].mxu1  ;;  %v6790_v18 = vmul.bf16 %v9113_v20, %v6762_v21 }
 0x495   : > { %v8376_v61 = vadd.f32 %v8375_v2, %v6408_v57  ;;  %v6410_v62 = vpop.f32.mrb[81].mxu1  ;;  %v13158_v57 = vld [vmem:[#allocation87_spill] sm:$0xff] }
 0x496   : > { %v7747_v25 = vmul.bf16 3216621497, %v6650_v32  ;;  %v8379_v13 = vadd.f32 %v8378_v43, %v6410_v62  ;;  %v6412_v27 = vpop.f32.mrb[82].mxu1  ;;  %6974 = vmatmul.mubr.bf16.gmra.mrb[180].mxu0 %v6790_v18  ;;  %9122 = vrcp.bf16 %v6744_v44  ;;  %v8402_v18 = vadd.f32 %v12151_v60, %v13158_v57 }
 0x497   : > { %9124 = vtanh.bf16 %v6600_v58  ;;  %v8382_v36 = vadd.f32 %v8381_v42, %v6412_v27  ;;  %v6414_v35 = vpop.f32.mrb[83].mxu1  ;;  %6983 = vmatprep.mubr.bf16.mxu0 %v12827_v49  ;;  %v12322_v26 = vadd.f32 %v8376_v61, %v12163_v15  ;;  %v13153_v58 = vld [vmem:[#allocation82_spill] sm:$0xff]  ;;  %v13160_v27 = vld [vmem:[#allocation89_spill] sm:$0xff] }
 0x498   : > { %9126 = vpow.bf16 %v7747_v25  ;;  %v8385_v55 = vadd.f32 %v8384_v63, %v6414_v35  ;;  %v8380_v16 = vadd.f32 %v8379_v13, %v12168_v50  ;;  %v8387_v1 = vadd.f32 %v12149_v33, %v13153_v58 }
 0x499   : > { %v9117_v14 = vpop.eup %9116  ;;  %v12325_v54 = vadd.f32 %v8382_v36, %v12163_v15  ;;  %v8405_v63 = vadd.f32 %v12149_v33, %v13159_v5  ;;  %v8408_v36 = vadd.f32 %v12151_v60, %v13160_v27  ;;  %v13167_v27 = vld [vmem:[#allocation96_spill] sm:$0xff] }
 0x49a   : > { %v9119_v12 = vpop.eup %9118  ;;  %v8386_v37 = vadd.f32 %v8385_v55, %v12168_v50  ;;  %v6764_v30 = vmul.bf16 1065369472, %v9117_v14 }
 0x49b   : > { %v9121_v7 = vpop.eup %9120  ;;  %v6603_v0 = vpack.c.bf16 %v12325_v54, %v12322_v26 }
 0x49c   : > { %v6745_v38 = vadd.bf16 1065369472, %v9121_v7  ;;  %v6651_v17 = vpack.c.bf16 %v8386_v37, %v8380_v16  ;;  %v6418_v40 = vpop.f32.mrb[84].mxu1  ;;  %v6791_v53 = vmul.bf16 %v9119_v12, %v6764_v30 }
 0x49d   : > { %v8388_v48 = vadd.f32 %v8387_v1, %v6418_v40  ;;  %v6420_v3 = vpop.f32.mrb[85].mxu1  ;;  %v13162_v40 = vld [vmem:[#allocation91_spill] sm:$0xff] }
 0x49e   : > { %v7748_v39 = vmul.bf16 3216621497, %v6651_v17  ;;  %v8391_v47 = vadd.f32 %v8390_v51, %v6420_v3  ;;  %v6422_v10 = vpop.f32.mrb[86].mxu1  ;;  %6984 = vmatmul.mubr.bf16.gmra.mrb[184].mxu0 %v6791_v53  ;;  %9128 = vrcp.bf16 %v6745_v38  ;;  %v8414_v53 = vadd.f32 %v12151_v60, %v13162_v40 }
 0x49f   : > { %9130 = vtanh.bf16 %v6601_v9  ;;  %v8394_v20 = vadd.f32 %v8393_v31, %v6422_v10  ;;  %v6424_v24 = vpop.f32.mrb[87].mxu1  ;;  %6993 = vmatprep.mubr.bf16.mxu0 %v12827_v49  ;;  %v12344_v56 = vadd.f32 %v8388_v48, %v12163_v15  ;;  %v13157_v9 = vld [vmem:[#allocation86_spill] sm:$0xff]  ;;  %v13164_v10 = vld [vmem:[#allocation93_spill] sm:$0xff] }
 0x4a0   : > { %9132 = vpow.bf16 %v7748_v39  ;;  %v8397_v11 = vadd.f32 %v8396_v6, %v6424_v24  ;;  %v8392_v23 = vadd.f32 %v8391_v47, %v12168_v50  ;;  %v8399_v44 = vadd.f32 %v12149_v33, %v13157_v9 }
 0x4a1   : > { %v9123_v21 = vpop.eup %9122  ;;  %v12347_v46 = vadd.f32 %v8394_v20, %v12163_v15  ;;  %v8417_v6 = vadd.f32 %v12149_v33, %v13163_v4  ;;  %v8420_v20 = vadd.f32 %v12151_v60, %v13164_v10  ;;  %v13171_v10 = vld [vmem:[#allocation100_spill] sm:$0xff] }
 0x4a2   : > { %v9125_v2 = vpop.eup %9124  ;;  %v8398_v43 = vadd.f32 %v8397_v11, %v12168_v50  ;;  %v6766_v59 = vmul.bf16 1065369472, %v9123_v21 }
 0x4a3   : > { %v9127_v8 = vpop.eup %9126  ;;  %v6604_v32 = vpack.c.bf16 %v12347_v46, %v12344_v56 }
 0x4a4   : > { %v6746_v22 = vadd.bf16 1065369472, %v9127_v8  ;;  %v6652_v42 = vpack.c.bf16 %v8398_v43, %v8392_v23  ;;  %v6428_v61 = vpop.f32.mrb[88].mxu1  ;;  %v6792_v62 = vmul.bf16 %v9125_v2, %v6766_v59 }
 0x4a5   : > { %v8400_v25 = vadd.f32 %v8399_v44, %v6428_v61  ;;  %v6430_v13 = vpop.f32.mrb[89].mxu1  ;;  %v13166_v61 = vld [vmem:[#allocation95_spill] sm:$0xff] }
 0x4a6   : > { %v7749_v35 = vmul.bf16 3216621497, %v6652_v42  ;;  %v8403_v55 = vadd.f32 %v8402_v18, %v6430_v13  ;;  %v6432_v14 = vpop.f32.mrb[90].mxu1  ;;  %6994 = vmatmul.mubr.bf16.gmra.mrb[188].mxu0 %v6792_v62  ;;  %9134 = vrcp.bf16 %v6746_v22  ;;  %v8426_v62 = vadd.f32 %v12151_v60, %v13166_v61 }
 0x4a7   : > { %9136 = vtanh.bf16 %v6602_v29  ;;  %v8406_v12 = vadd.f32 %v8405_v63, %v6432_v14  ;;  %v6434_v16 = vpop.f32.mrb[91].mxu1  ;;  %7003 = vmatprep.mubr.bf16.mxu0 %v12827_v49  ;;  %v12366_v7 = vadd.f32 %v8400_v25, %v12163_v15  ;;  %v13161_v29 = vld [vmem:[#allocation90_spill] sm:$0xff]  ;;  %v13168_v14 = vld [vmem:[#allocation97_spill] sm:$0xff] }
 0x4a8   : > { %9138 = vpow.bf16 %v7749_v35  ;;  %v8409_v37 = vadd.f32 %v8408_v36, %v6434_v16  ;;  %v8404_v34 = vadd.f32 %v8403_v55, %v12168_v50  ;;  %v8411_v38 = vadd.f32 %v12149_v33, %v13161_v29 }
 0x4a9   : > { %v9129_v30 = vpop.eup %9128  ;;  %v12369_v58 = vadd.f32 %v8406_v12, %v12163_v15  ;;  %v8429_v36 = vadd.f32 %v12149_v33, %v13167_v27  ;;  %v8432_v12 = vadd.f32 %v12151_v60, %v13168_v14  ;;  %v13175_v14 = vld [vmem:[#allocation104_spill] sm:$0xff] }
 0x4aa   : > { %v9131_v1 = vpop.eup %9130  ;;  %v8410_v51 = vadd.f32 %v8409_v37, %v12168_v50  ;;  %v6768_v52 = vmul.bf16 1065369472, %v9129_v30 }
 0x4ab   : > { %v9133_v28 = vpop.eup %9132  ;;  %v6605_v17 = vpack.c.bf16 %v12369_v58, %v12366_v7 }
 0x4ac   : > { %v6747_v41 = vadd.bf16 1065369472, %v9133_v28  ;;  %v6653_v31 = vpack.c.bf16 %v8410_v51, %v8404_v34  ;;  %v6438_v48 = vpop.f32.mrb[92].mxu1  ;;  %v6793_v3 = vmul.bf16 %v9131_v1, %v6768_v52 }
 0x4ad   : > { %v8412_v39 = vadd.f32 %v8411_v38, %v6438_v48  ;;  %v6440_v47 = vpop.f32.mrb[93].mxu1  ;;  %v13170_v48 = vld [vmem:[#allocation99_spill] sm:$0xff] }
 0x4ae   : > { %v7750_v24 = vmul.bf16 3216621497, %v6653_v31  ;;  %v8415_v11 = vadd.f32 %v8414_v53, %v6440_v47  ;;  %v6442_v21 = vpop.f32.mrb[94].mxu1  ;;  %7004 = vmatmul.mubr.bf16.gmra.mrb[192].mxu0 %v6793_v3  ;;  %9140 = vrcp.bf16 %v6747_v41  ;;  %v8438_v3 = vadd.f32 %v12151_v60, %v13170_v48 }
 0x4af   : > { %9142 = vtanh.bf16 %v6603_v0  ;;  %v8418_v2 = vadd.f32 %v8417_v6, %v6442_v21  ;;  %v6444_v23 = vpop.f32.mrb[95].mxu1  ;;  %7013 = vmatprep.mubr.bf16.mxu0 %v12827_v49  ;;  %v12388_v8 = vadd.f32 %v8412_v39, %v12163_v15  ;;  %v13165_v0 = vld [vmem:[#allocation94_spill] sm:$0xff]  ;;  %v13172_v21 = vld [vmem:[#allocation101_spill] sm:$0xff] }
 0x4b0   : > { %9144 = vpow.bf16 %v7750_v24  ;;  %v8421_v43 = vadd.f32 %v8420_v20, %v6444_v23  ;;  %v8416_v57 = vadd.f32 %v8415_v11, %v12168_v50  ;;  %v8423_v22 = vadd.f32 %v12149_v33, %v13165_v0 }
 0x4b1   : > { %v9135_v59 = vpop.eup %9134  ;;  %v12391_v9 = vadd.f32 %v8418_v2, %v12163_v15  ;;  %v8441_v20 = vadd.f32 %v12149_v33, %v13171_v10  ;;  %v8444_v2 = vadd.f32 %v12151_v60, %v13172_v21  ;;  %v13179_v21 = vld [vmem:[#allocation108_spill] sm:$0xff] }
 0x4b2   : > { %v9137_v44 = vpop.eup %9136  ;;  %v8422_v18 = vadd.f32 %v8421_v43, %v12168_v50  ;;  %v6770_v26 = vmul.bf16 1065369472, %v9135_v59 }
 0x4b3   : > { %v9139_v54 = vpop.eup %9138  ;;  %v6606_v42 = vpack.c.bf16 %v12391_v9, %v12388_v8  ;;  %v13177_v8 = vld [vmem:[#allocation106_spill] sm:$0xff] }
 0x4b4   : > { %v6748_v5 = vadd.bf16 1065369472, %v9139_v54  ;;  %v6654_v63 = vpack.c.bf16 %v8422_v18, %v8416_v57  ;;  %v6448_v25 = vpop.f32.mrb[96].mxu1  ;;  %v6794_v13 = vmul.bf16 %v9137_v44, %v6770_v26  ;;  %v8459_v9 = vadd.f32 %v12149_v33, %v13177_v8 }
 0x4b5   : > { %v8424_v35 = vadd.f32 %v8423_v22, %v6448_v25  ;;  %v6450_v55 = vpop.f32.mrb[97].mxu1  ;;  %v13174_v25 = vld [vmem:[#allocation103_spill] sm:$0xff] }
 0x4b6   : > { %v7751_v16 = vmul.bf16 3216621497, %v6654_v63  ;;  %v8427_v37 = vadd.f32 %v8426_v62, %v6450_v55  ;;  %v6452_v30 = vpop.f32.mrb[98].mxu1  ;;  %7014 = vmatmul.mubr.bf16.gmra.mrb[196].mxu0 %v6794_v13  ;;  %9146 = vrcp.bf16 %v6748_v5  ;;  %v8450_v13 = vadd.f32 %v12151_v60, %v13174_v25 }
 0x4b7   : > { %9148 = vtanh.bf16 %v6604_v32  ;;  %v8430_v1 = vadd.f32 %v8429_v36, %v6452_v30  ;;  %v6454_v34 = vpop.f32.mrb[99].mxu1  ;;  %7023 = vmatprep.mubr.bf16.mxu0 %v12827_v49  ;;  %v12410_v28 = vadd.f32 %v8424_v35, %v12163_v15  ;;  %v13169_v32 = vld [vmem:[#allocation98_spill] sm:$0xff]  ;;  %v13176_v30 = vld [vmem:[#allocation105_spill] sm:$0xff] }
 0x4b8   : > { %9150 = vpow.bf16 %v7751_v16  ;;  %v8433_v51 = vadd.f32 %v8432_v12, %v6454_v34  ;;  %v8428_v40 = vadd.f32 %v8427_v37, %v12168_v50  ;;  %v8435_v41 = vadd.f32 %v12149_v33, %v13169_v32 }
 0x4b9   : > { %v9141_v52 = vpop.eup %9140  ;;  %v12413_v29 = vadd.f32 %v8430_v1, %v12163_v15  ;;  %v8453_v12 = vadd.f32 %v12149_v33, %v13175_v14  ;;  %v8456_v1 = vadd.f32 %v12151_v60, %v13176_v30 }
 0x4ba   : > { %v9143_v38 = vpop.eup %9142  ;;  %v8434_v53 = vadd.f32 %v8433_v51, %v12168_v50  ;;  %v6772_v56 = vmul.bf16 1065369472, %v9141_v52 }
 0x4bb   : > { %v9145_v46 = vpop.eup %9144  ;;  %v6607_v31 = vpack.c.bf16 %v12413_v29, %v12410_v28 }
 0x4bc   : > { %v6749_v4 = vadd.bf16 1065369472, %v9145_v46  ;;  %v6655_v6 = vpack.c.bf16 %v8434_v53, %v8428_v40  ;;  %v6458_v39 = vpop.f32.mrb[100].mxu1  ;;  %v6795_v47 = vmul.bf16 %v9143_v38, %v6772_v56 }
 0x4bd   : > { %v8436_v24 = vadd.f32 %v8435_v41, %v6458_v39  ;;  %v6460_v11 = vpop.f32.mrb[101].mxu1  ;;  %v13178_v39 = vld [vmem:[#allocation107_spill] sm:$0xff] }
 0x4be   : > { %v7752_v23 = vmul.bf16 3216621497, %v6655_v6  ;;  %v8439_v43 = vadd.f32 %v8438_v3, %v6460_v11  ;;  %v6462_v59 = vpop.f32.mrb[102].mxu1  ;;  %7024 = vmatmul.mubr.bf16.gmra.mrb[200].mxu0 %v6795_v47  ;;  %9152 = vrcp.bf16 %v6749_v4  ;;  %v8462_v47 = vadd.f32 %v12151_v60, %v13178_v39 }
 0x4bf   : > { %9154 = vtanh.bf16 %v6605_v17  ;;  %v8442_v44 = vadd.f32 %v8441_v20, %v6462_v59  ;;  %v6464_v57 = vpop.f32.mrb[103].mxu1  ;;  %7033 = vmatprep.mubr.bf16.mxu0 %v12827_v49  ;;  %v12432_v54 = vadd.f32 %v8436_v24, %v12163_v15  ;;  %v13173_v17 = vld [vmem:[#allocation102_spill] sm:$0xff]  ;;  %v13180_v59 = vld [vmem:[#allocation5_spill] sm:$0xff] }
 0x4c0   : > { %9156 = vpow.bf16 %v7752_v23  ;;  %v8445_v18 = vadd.f32 %v8444_v2, %v6464_v57  ;;  %v8440_v61 = vadd.f32 %v8439_v43, %v12168_v50  ;;  %v8447_v5 = vadd.f32 %v12149_v33, %v13173_v17 }
 0x4c1   : > { %v9147_v26 = vpop.eup %9146  ;;  %v12435_v0 = vadd.f32 %v8442_v44, %v12163_v15  ;;  %v8465_v2 = vadd.f32 %v12149_v33, %v13179_v21  ;;  %v8468_v44 = vadd.f32 %v12151_v60, %v13180_v59 }
 0x4c2   : > { %v9149_v22 = vpop.eup %9148  ;;  %v8446_v62 = vadd.f32 %v8445_v18, %v12168_v50  ;;  %v6774_v7 = vmul.bf16 1065369472, %v9147_v26 }
 0x4c3   : > { %v9151_v58 = vpop.eup %9150  ;;  %v6608_v63 = vpack.c.bf16 %v12435_v0, %v12432_v54 }
 0x4c4   : > { %v6750_v27 = vadd.bf16 1065369472, %v9151_v58  ;;  %v6656_v36 = vpack.c.bf16 %v8446_v62, %v8440_v61  ;;  %v6468_v35 = vpop.f32.mrb[104].mxu1  ;;  %v6796_v55 = vmul.bf16 %v9149_v22, %v6774_v7 }
 0x4c5   : > { %v8448_v16 = vadd.f32 %v8447_v5, %v6468_v35  ;;  %v6470_v37 = vpop.f32.mrb[105].mxu1 }
 0x4c6   : > { %v7753_v34 = vmul.bf16 3216621497, %v6656_v36  ;;  %v8451_v51 = vadd.f32 %v8450_v13, %v6470_v37  ;;  %v6472_v52 = vpop.f32.mrb[106].mxu1  ;;  %7034 = vmatmul.mubr.bf16.gmra.mrb[204].mxu0 %v6796_v55  ;;  %9158 = vrcp.bf16 %v6750_v27 }
 0x4c7   : > { %9160 = vtanh.bf16 %v6606_v42  ;;  %v8454_v38 = vadd.f32 %v8453_v12, %v6472_v52  ;;  %v6474_v40 = vpop.f32.mrb[107].mxu1  ;;  %7043 = vmatprep.mubr.bf16.mxu0 %v12827_v49  ;;  %v8449_v46 = vadd.f32 %v8448_v16, %v12163_v15 }
 0x4c8   : > { %9162 = vpow.bf16 %v7753_v34  ;;  %v8457_v53 = vadd.f32 %v8456_v1, %v6474_v40  ;;  %v8452_v48 = vadd.f32 %v8451_v51, %v12168_v50 }
 0x4c9   : > { %v9153_v56 = vpop.eup %9152  ;;  %v8455_v32 = vadd.f32 %v8454_v38, %v12163_v15 }
 0x4ca   : > { %v9155_v41 = vpop.eup %9154  ;;  %v8458_v3 = vadd.f32 %v8457_v53, %v12168_v50  ;;  %v6776_v4 = vmul.bf16 1065369472, %v9153_v56 }
 0x4cb   : > { %v9157_v6 = vpop.eup %9156  ;;  %v6609_v42 = vpack.c.bf16 %v8455_v32, %v8449_v46  ;;  %v6819_v46 = vld [vmem:[%s12710_s10] sm:$0x3] }
 0x4cc   : > { %v6751_v10 = vadd.bf16 1065369472, %v9157_v6  ;;  %v6657_v20 = vpack.c.bf16 %v8458_v3, %v8452_v48  ;;  %v6478_v24 = vpop.f32.mrb[108].mxu1  ;;  %v6797_v11 = vmul.bf16 %v9155_v41, %v6776_v4  ;;  %v7841_v32 = vld [vmem:[%s9289_s12] sm:$0xff]   ;;  %v12485_v41 = vrot.slane %v6819_v46, %v11671_v45 }
 0x4cd   : > { %v8460_v23 = vadd.f32 %v8459_v9, %v6478_v24  ;;  %v6480_v43 = vpop.f32.mrb[109].mxu1  ;;  %v12488_v48 = vrot.slane %v6819_v46, %v11681_v19  ;;  %v7843_v8 = vunpack.c.h.bf16 %v7841_v32  ;;  %v7904_v19 = vld [vmem:[%s9289_s12 + $0x8] sm:$0xff]  }
 0x4ce   : > { %v7754_v57 = vmul.bf16 3216621497, %v6657_v20  ;;  %v8463_v18 = vadd.f32 %v8462_v47, %v6480_v43  ;;  %v6482_v26 = vpop.f32.mrb[110].mxu1  ;;  %7044 = vmatmul.mubr.bf16.gmra.mrb[208].mxu0 %v6797_v11  ;;  %9164 = vrcp.bf16 %v6751_v10  ;;  %v7846_v24 = vunpack.c.l.bf16 %v7904_v19 }
 0x4cf   : > { %9166 = vtanh.bf16 %v6607_v31  ;;  %v8466_v22 = vadd.f32 %v8465_v2, %v6482_v26  ;;  %v6484_v61 = vpop.f32.mrb[111].mxu1  ;;  %7053 = vmatprep.mubr.bf16.mxu0 %v12827_v49  ;;  %v8461_v7 = vadd.f32 %v8460_v23, %v12163_v15  ;;  %v7847_v23 = vunpack.c.h.bf16 %v7904_v19 }
 0x4d0   : > { %9168 = vpow.bf16 %v7754_v57  ;;  %v8469_v33 = vadd.f32 %v8468_v44, %v6484_v61  ;;  %v8464_v17 = vadd.f32 %v8463_v18, %v12168_v50 }
 0x4d1   : > { %v9159_v62 = vpop.eup %9158  ;;  %v8467_v60 = vadd.f32 %v8466_v22, %v12163_v15  ;;  %v7905_v22 = vld [vmem:[%s9289_s12 + $0x10] sm:$0xff]  }
 0x4d2   : > { %v9161_v58 = vpop.eup %9160  ;;  %v8470_v5 = vadd.f32 %v8469_v33, %v12168_v50  ;;  %v6778_v25 = vmul.bf16 1065369472, %v9159_v62  ;;  %v7850_v33 = vunpack.c.l.bf16 %v7905_v22 }
 0x4d3   : > { %v9163_v13 = vpop.eup %9162  ;;  %v6610_v28 = vpack.c.bf16 %v8467_v60, %v8461_v7 }
 0x4d4   : > { %v6752_v29 = vadd.bf16 1065369472, %v9163_v13  ;;  %v6658_v31 = vpack.c.bf16 %v8470_v5, %v8464_v17  ;;  %v6798_v27 = vmul.bf16 %v9161_v58, %v6778_v25  ;;  %v7851_v58 = vunpack.c.h.bf16 %v7905_v22 }
 0x4d6   : > { %v7755_v36 = vmul.bf16 3216621497, %v6658_v31  ;;  %7054 = vmatmul.mubr.bf16.gmra.mrb[212].mxu0 %v6798_v27  ;;  %9170 = vrcp.bf16 %v6752_v29  ;;  %v7906_v31 = vld [vmem:[%s9289_s12 + $0x18] sm:$0xff]  }
 0x4d7   : > { %9172 = vtanh.bf16 %v6608_v63  ;;  %7063 = vmatprep.mubr.bf16.mxu0 %v12827_v49 }
 0x4d8   : > { %9174 = vpow.bf16 %v7755_v36  ;;  %v7854_v36 = vunpack.c.l.bf16 %v7906_v31 }
 0x4d9   : > { %v9165_v15 = vpop.eup %9164 }
 0x4da   : > { %v9167_v35 = vpop.eup %9166  ;;  %v6780_v55 = vmul.bf16 1065369472, %v9165_v15 }
 0x4db   : > { %v9169_v50 = vpop.eup %9168 }
 0x4dc   : > { %v6753_v14 = vadd.bf16 1065369472, %v9169_v50  ;;  %v6799_v12 = vmul.bf16 %v9167_v35, %v6780_v55  ;;  %v7855_v50 = vunpack.c.h.bf16 %v7906_v31 }
 0x4de   : > { %7064 = vmatmul.mubr.bf16.gmra.mrb[216].mxu0 %v6799_v12  ;;  %9176 = vrcp.bf16 %v6753_v14 }
 0x4df   : > { %7073 = vmatprep.mubr.bf16.mxu0 %v12827_v49  ;;  %9178 = vtanh.bf16 %v6609_v42 }
 0x4e1   : > { %v9171_v16 = vpop.eup %9170 }
 0x4e2   : > { %v9173_v37 = vpop.eup %9172  ;;  %v6782_v30 = vmul.bf16 1065369472, %v9171_v16 }
 0x4e3   : > { %v9175_v1 = vpop.eup %9174 }
 0x4e4   : > { %v6754_v54 = vadd.bf16 1065369472, %v9175_v1  ;;  %v6800_v0 = vmul.bf16 %v9173_v37, %v6782_v30 }
 0x4e6   : > { %7074 = vmatmul.mubr.bf16.gmra.mrb[220].mxu0 %v6800_v0  ;;  %9180 = vrcp.bf16 %v6754_v54  ;;  %v7907_v54 = vld [vmem:[%s9289_s12 + $0x20] sm:$0xff]  }
 0x4e7   : > { %7083 = vmatprep.mubr.bf16.mxu0 %v12827_v49  ;;  %9182 = vtanh.bf16 %v6610_v28 }
 0x4e9   : > { %v9177_v63 = vpop.eup %9176 }
 0x4ea   : > { %v6784_v34 = vmul.bf16 1065369472, %v9177_v63  ;;  %v9179_v51 = vpop.eup %9178  ;;  %v7858_v63 = vunpack.c.l.bf16 %v7907_v54 }
 0x4ec   : > { %v6801_v52 = vmul.bf16 %v9179_v51, %v6784_v34 }
 0x4ee   : > { %7084 = vmatmul.mubr.bf16.gmra.mrb[224].mxu0 %v6801_v52 }
 0x4ef   : > { %7093 = vmatprep.mubr.bf16.mxu0 %v12827_v49  ;;  %v7842_v49 = vunpack.c.l.bf16 %v7841_v32 }
 0x4f1   : > { %v9181_v38 = vpop.eup %9180 }
 0x4f2   : > { %v6786_v40 = vmul.bf16 1065369472, %v9181_v38  ;;  %v9183_v53 = vpop.eup %9182  ;;  %v7859_v38 = vunpack.c.h.bf16 %v7907_v54 }
 0x4f4   : > { %v6802_v56 = vmul.bf16 %v9183_v53, %v6786_v40 }
 0x4f6   : > { %7094 = vmatmul.mubr.bf16.gmra.mrb[228].mxu0 %v6802_v56 }
 0x551   : > { %v6945_v3 = vpop.f32.mrb[168].mxu0 }
 0x552   : > { %v6946_v4 = vadd.f32 %v6945_v3, %v12485_v41  ;;  %v6947_v6 = vpop.f32.mrb[169].mxu0  ;;  %v7908_v3 = vld [vmem:[%s9289_s12 + $0x28] sm:$0xff]  }
 0x553   : > { %v6948_v9 = vadd.f32 %v6947_v6, %v12488_v48  ;;  %v6949_v42 = vpop.f32.mrb[170].mxu0  ;;  %v7862_v6 = vunpack.c.l.bf16 %v7908_v3 }
 0x554   : > { %v7168_v39 = vadd.f32 %v7842_v49, %v6946_v4  ;;  %v6950_v47 = vadd.f32 %v6949_v42, %v12485_v41  ;;  %v6951_v10 = vpop.f32.mrb[171].mxu0 }
 0x555   : > { %7804 = vst.msk [vmem:[%s11855_s14 + $0x200] sm:$0xff] %vm7232_vm12, %v6948_v9  ;;  %v6952_v45 = vadd.f32 %v6951_v10, %v12488_v48 }
 0x556   : > { %7772 = vst.msk [vmem:[%s11855_s14 + $0x100] sm:$0xff] %vm7232_vm12, %v7168_v39  ;;  %v7169_v20 = vadd.f32 %v7843_v8, %v6950_v47  ;;  %v7863_v39 = vunpack.c.h.bf16 %v7908_v3 }
 0x557   : > { %7805 = vst.msk [vmem:[%s11855_s14 + $0x208] sm:$0xff] %vm7232_vm12, %v6952_v45 }
 0x558   : > { %7773 = vst.msk [vmem:[%s11855_s14 + $0x108] sm:$0xff] %vm7232_vm12, %v7169_v20 }
 0x559   : > { %v6955_v11 = vpop.f32.mrb[172].mxu0 }
 0x55a   : > { %v6956_v21 = vadd.f32 %v6955_v11, %v12485_v41  ;;  %v6957_v2 = vpop.f32.mrb[173].mxu0  ;;  %v7909_v11 = vld [vmem:[%s9289_s12 + $0x30] sm:$0xff]  }
 0x55b   : > { %v6958_v43 = vadd.f32 %v6957_v2, %v12488_v48  ;;  %v6959_v59 = vpop.f32.mrb[174].mxu0  ;;  %v7866_v2 = vunpack.c.l.bf16 %v7909_v11 }
 0x55c   : > { %v7170_v44 = vadd.f32 %v7846_v24, %v6956_v21  ;;  %v6960_v57 = vadd.f32 %v6959_v59, %v12485_v41  ;;  %v6961_v18 = vpop.f32.mrb[175].mxu0 }
 0x55d   : > { %7806 = vst.msk [vmem:[%s11855_s14 + $0x210] sm:$0xff] %vm7232_vm12, %v6958_v43  ;;  %v6962_v26 = vadd.f32 %v6961_v18, %v12488_v48 }
 0x55e   : > { %7774 = vst.msk [vmem:[%s11855_s14 + $0x110] sm:$0xff] %vm7232_vm12, %v7170_v44  ;;  %v7171_v61 = vadd.f32 %v7847_v23, %v6960_v57  ;;  %v7867_v44 = vunpack.c.h.bf16 %v7909_v11 }
 0x55f   : > { %7807 = vst.msk [vmem:[%s11855_s14 + $0x218] sm:$0xff] %vm7232_vm12, %v6962_v26 }
 0x560   : > { %7775 = vst.msk [vmem:[%s11855_s14 + $0x118] sm:$0xff] %vm7232_vm12, %v7171_v61 }
 0x561   : > { %v6965_v62 = vpop.f32.mrb[176].mxu0 }
 0x562   : > { %v6966_v7 = vadd.f32 %v6965_v62, %v12485_v41  ;;  %v6967_v60 = vpop.f32.mrb[177].mxu0  ;;  %v7910_v62 = vld [vmem:[%s9289_s12 + $0x38] sm:$0xff]  }
 0x563   : > { %v6968_v17 = vadd.f32 %v6967_v60, %v12488_v48  ;;  %v6969_v5 = vpop.f32.mrb[178].mxu0  ;;  %v7870_v60 = vunpack.c.l.bf16 %v7910_v62 }
 0x564   : > { %v7172_v25 = vadd.f32 %v7850_v33, %v6966_v7  ;;  %v6970_v13 = vadd.f32 %v6969_v5, %v12485_v41  ;;  %v6971_v28 = vpop.f32.mrb[179].mxu0 }
 0x565   : > { %7808 = vst.msk [vmem:[%s11855_s14 + $0x220] sm:$0xff] %vm7232_vm12, %v6968_v17  ;;  %v6972_v29 = vadd.f32 %v6971_v28, %v12488_v48 }
 0x566   : > { %7776 = vst.msk [vmem:[%s11855_s14 + $0x120] sm:$0xff] %vm7232_vm12, %v7172_v25  ;;  %v7173_v27 = vadd.f32 %v7851_v58, %v6970_v13  ;;  %v7871_v25 = vunpack.c.h.bf16 %v7910_v62 }
 0x567   : > { %7809 = vst.msk [vmem:[%s11855_s14 + $0x228] sm:$0xff] %vm7232_vm12, %v6972_v29 }
 0x568   : > { %7777 = vst.msk [vmem:[%s11855_s14 + $0x128] sm:$0xff] %vm7232_vm12, %v7173_v27 }
 0x569   : > { %v6975_v15 = vpop.f32.mrb[180].mxu0 }
 0x56a   : > { %v6976_v35 = vadd.f32 %v6975_v15, %v12485_v41  ;;  %v6977_v55 = vpop.f32.mrb[181].mxu0  ;;  %v7911_v15 = vld [vmem:[%s9289_s12 + $0x40] sm:$0xff]  }
 0x56b   : > { %v6978_v14 = vadd.f32 %v6977_v55, %v12488_v48  ;;  %v6979_v12 = vpop.f32.mrb[182].mxu0  ;;  %v7874_v55 = vunpack.c.l.bf16 %v7911_v15 }
 0x56c   : > { %v7174_v16 = vadd.f32 %v7854_v36, %v6976_v35  ;;  %v6980_v37 = vadd.f32 %v6979_v12, %v12485_v41  ;;  %v6981_v30 = vpop.f32.mrb[183].mxu0 }
 0x56d   : > { %7810 = vst.msk [vmem:[%s11855_s14 + $0x230] sm:$0xff] %vm7232_vm12, %v6978_v14  ;;  %v6982_v1 = vadd.f32 %v6981_v30, %v12488_v48 }
 0x56e   : > { %7778 = vst.msk [vmem:[%s11855_s14 + $0x130] sm:$0xff] %vm7232_vm12, %v7174_v16  ;;  %v7175_v0 = vadd.f32 %v7855_v50, %v6980_v37  ;;  %v7875_v16 = vunpack.c.h.bf16 %v7911_v15 }
 0x56f   : > { %7811 = vst.msk [vmem:[%s11855_s14 + $0x238] sm:$0xff] %vm7232_vm12, %v6982_v1 }
 0x570   : > { %7779 = vst.msk [vmem:[%s11855_s14 + $0x138] sm:$0xff] %vm7232_vm12, %v7175_v0 }
 0x571   : > { %v6985_v34 = vpop.f32.mrb[184].mxu0 }
 0x572   : > { %v6986_v51 = vadd.f32 %v6985_v34, %v12485_v41  ;;  %v6987_v52 = vpop.f32.mrb[185].mxu0  ;;  %v7912_v34 = vld [vmem:[%s9289_s12 + $0x48] sm:$0xff]  }
 0x573   : > { %v6988_v40 = vadd.f32 %v6987_v52, %v12488_v48  ;;  %v6989_v53 = vpop.f32.mrb[186].mxu0  ;;  %v7878_v52 = vunpack.c.l.bf16 %v7912_v34 }
 0x574   : > { %v7176_v56 = vadd.f32 %v7858_v63, %v6986_v51  ;;  %v6990_v46 = vadd.f32 %v6989_v53, %v12485_v41  ;;  %v6991_v32 = vpop.f32.mrb[187].mxu0 }
 0x575   : > { %7812 = vst.msk [vmem:[%s11855_s14 + $0x240] sm:$0xff] %vm7232_vm12, %v6988_v40  ;;  %v6992_v49 = vadd.f32 %v6991_v32, %v12488_v48 }
 0x576   : > { %7780 = vst.msk [vmem:[%s11855_s14 + $0x140] sm:$0xff] %vm7232_vm12, %v7176_v56  ;;  %v7177_v4 = vadd.f32 %v7859_v38, %v6990_v46  ;;  %v7879_v56 = vunpack.c.h.bf16 %v7912_v34 }
 0x577   : > { %7813 = vst.msk [vmem:[%s11855_s14 + $0x248] sm:$0xff] %vm7232_vm12, %v6992_v49 }
 0x578   : > { %7781 = vst.msk [vmem:[%s11855_s14 + $0x148] sm:$0xff] %vm7232_vm12, %v7177_v4 }
 0x579   : > { %v6995_v8 = vpop.f32.mrb[188].mxu0 }
 0x57a   : > { %v6996_v9 = vadd.f32 %v6995_v8, %v12485_v41  ;;  %v6997_v42 = vpop.f32.mrb[189].mxu0  ;;  %v7913_v8 = vld [vmem:[%s9289_s12 + $0x50] sm:$0xff]  }
 0x57b   : > { %v6998_v47 = vadd.f32 %v6997_v42, %v12488_v48  ;;  %v6999_v10 = vpop.f32.mrb[190].mxu0  ;;  %v7882_v42 = vunpack.c.l.bf16 %v7913_v8 }
 0x57c   : > { %v7178_v45 = vadd.f32 %v7862_v6, %v6996_v9  ;;  %v7000_v19 = vadd.f32 %v6999_v10, %v12485_v41  ;;  %v7001_v20 = vpop.f32.mrb[191].mxu0 }
 0x57d   : > { %7814 = vst.msk [vmem:[%s11855_s14 + $0x250] sm:$0xff] %vm7232_vm12, %v6998_v47  ;;  %v7002_v24 = vadd.f32 %v7001_v20, %v12488_v48 }
 0x57e   : > { %7782 = vst.msk [vmem:[%s11855_s14 + $0x150] sm:$0xff] %vm7232_vm12, %v7178_v45  ;;  %v7179_v21 = vadd.f32 %v7863_v39, %v7000_v19  ;;  %v7883_v45 = vunpack.c.h.bf16 %v7913_v8 }
 0x57f   : > { %7815 = vst.msk [vmem:[%s11855_s14 + $0x258] sm:$0xff] %vm7232_vm12, %v7002_v24 }
 0x580   : > { %7783 = vst.msk [vmem:[%s11855_s14 + $0x158] sm:$0xff] %vm7232_vm12, %v7179_v21 }
 0x581   : > { %v7005_v23 = vpop.f32.mrb[192].mxu0 }
 0x582   : > { %v7006_v43 = vadd.f32 %v7005_v23, %v12485_v41  ;;  %v7007_v59 = vpop.f32.mrb[193].mxu0  ;;  %v7914_v23 = vld [vmem:[%s9289_s12 + $0x58] sm:$0xff]  }
 0x583   : > { %v7008_v57 = vadd.f32 %v7007_v59, %v12488_v48  ;;  %v7009_v18 = vpop.f32.mrb[194].mxu0  ;;  %v7886_v59 = vunpack.c.l.bf16 %v7914_v23 }
 0x584   : > { %v7180_v26 = vadd.f32 %v7866_v2, %v7006_v43  ;;  %v7010_v22 = vadd.f32 %v7009_v18, %v12485_v41  ;;  %v7011_v61 = vpop.f32.mrb[195].mxu0 }
 0x585   : > { %7816 = vst.msk [vmem:[%s11855_s14 + $0x260] sm:$0xff] %vm7232_vm12, %v7008_v57  ;;  %v7012_v33 = vadd.f32 %v7011_v61, %v12488_v48 }
 0x586   : > { %7784 = vst.msk [vmem:[%s11855_s14 + $0x160] sm:$0xff] %vm7232_vm12, %v7180_v26  ;;  %v7181_v7 = vadd.f32 %v7867_v44, %v7010_v22  ;;  %v7887_v26 = vunpack.c.h.bf16 %v7914_v23 }
 0x587   : > { %7817 = vst.msk [vmem:[%s11855_s14 + $0x268] sm:$0xff] %vm7232_vm12, %v7012_v33 }
 0x588   : > { %7785 = vst.msk [vmem:[%s11855_s14 + $0x168] sm:$0xff] %vm7232_vm12, %v7181_v7 }
 0x589   : > { %v7015_v58 = vpop.f32.mrb[196].mxu0 }
 0x58a   : > { %v7016_v17 = vadd.f32 %v7015_v58, %v12485_v41  ;;  %v7017_v5 = vpop.f32.mrb[197].mxu0  ;;  %v7915_v58 = vld [vmem:[%s9289_s12 + $0x60] sm:$0xff]  }
 0x58b   : > { %v7018_v13 = vadd.f32 %v7017_v5, %v12488_v48  ;;  %v7019_v28 = vpop.f32.mrb[198].mxu0  ;;  %v7890_v5 = vunpack.c.l.bf16 %v7915_v58 }
 0x58c   : > { %v7182_v29 = vadd.f32 %v7870_v60, %v7016_v17  ;;  %v7020_v31 = vadd.f32 %v7019_v28, %v12485_v41  ;;  %v7021_v27 = vpop.f32.mrb[199].mxu0 }
 0x58d   : > { %7818 = vst.msk [vmem:[%s11855_s14 + $0x270] sm:$0xff] %vm7232_vm12, %v7018_v13  ;;  %v7022_v36 = vadd.f32 %v7021_v27, %v12488_v48 }
 0x58e   : > { %7786 = vst.msk [vmem:[%s11855_s14 + $0x170] sm:$0xff] %vm7232_vm12, %v7182_v29  ;;  %v7183_v35 = vadd.f32 %v7871_v25, %v7020_v31  ;;  %v7891_v29 = vunpack.c.h.bf16 %v7915_v58 }
 0x58f   : > { %7819 = vst.msk [vmem:[%s11855_s14 + $0x278] sm:$0xff] %vm7232_vm12, %v7022_v36 }
 0x590   : > { %7787 = vst.msk [vmem:[%s11855_s14 + $0x178] sm:$0xff] %vm7232_vm12, %v7183_v35 }
 0x591   : > { %v7025_v50 = vpop.f32.mrb[200].mxu0 }
 0x592   : > { %v7026_v14 = vadd.f32 %v7025_v50, %v12485_v41  ;;  %v7027_v12 = vpop.f32.mrb[201].mxu0  ;;  %v7916_v50 = vld [vmem:[%s9289_s12 + $0x68] sm:$0xff]  }
 0x593   : > { %v7028_v37 = vadd.f32 %v7027_v12, %v12488_v48  ;;  %v7029_v30 = vpop.f32.mrb[202].mxu0  ;;  %v7894_v12 = vunpack.c.l.bf16 %v7916_v50 }
 0x594   : > { %v7184_v1 = vadd.f32 %v7874_v55, %v7026_v14  ;;  %v7030_v54 = vadd.f32 %v7029_v30, %v12485_v41  ;;  %v7031_v0 = vpop.f32.mrb[203].mxu0 }
 0x595   : > { %7820 = vst.msk [vmem:[%s11855_s14 + $0x280] sm:$0xff] %vm7232_vm12, %v7028_v37  ;;  %v7032_v63 = vadd.f32 %v7031_v0, %v12488_v48 }
 0x596   : > { %7788 = vst.msk [vmem:[%s11855_s14 + $0x180] sm:$0xff] %vm7232_vm12, %v7184_v1  ;;  %v7185_v51 = vadd.f32 %v7875_v16, %v7030_v54  ;;  %v7895_v1 = vunpack.c.h.bf16 %v7916_v50 }
 0x597   : > { %7821 = vst.msk [vmem:[%s11855_s14 + $0x288] sm:$0xff] %vm7232_vm12, %v7032_v63 }
 0x598   : > { %7789 = vst.msk [vmem:[%s11855_s14 + $0x188] sm:$0xff] %vm7232_vm12, %v7185_v51 }
 0x599   : > { %v7035_v38 = vpop.f32.mrb[204].mxu0 }
 0x59a   : > { %v7036_v40 = vadd.f32 %v7035_v38, %v12485_v41  ;;  %v7037_v53 = vpop.f32.mrb[205].mxu0  ;;  %v7917_v38 = vld [vmem:[%s9289_s12 + $0x70] sm:$0xff]  }
 0x59b   : > { %v7038_v46 = vadd.f32 %v7037_v53, %v12488_v48  ;;  %v7039_v32 = vpop.f32.mrb[206].mxu0  ;;  %v7898_v53 = vunpack.c.l.bf16 %v7917_v38 }
 0x59c   : > { %v7186_v49 = vadd.f32 %v7878_v52, %v7036_v40  ;;  %v7040_v3 = vadd.f32 %v7039_v32, %v12485_v41  ;;  %v7041_v4 = vpop.f32.mrb[207].mxu0 }
 0x59d   : > { %7822 = vst.msk [vmem:[%s11855_s14 + $0x290] sm:$0xff] %vm7232_vm12, %v7038_v46  ;;  %v7042_v6 = vadd.f32 %v7041_v4, %v12488_v48 }
 0x59e   : > { %7790 = vst.msk [vmem:[%s11855_s14 + $0x190] sm:$0xff] %vm7232_vm12, %v7186_v49  ;;  %v7187_v9 = vadd.f32 %v7879_v56, %v7040_v3  ;;  %v7899_v49 = vunpack.c.h.bf16 %v7917_v38 }
 0x59f   : > { %7823 = vst.msk [vmem:[%s11855_s14 + $0x298] sm:$0xff] %vm7232_vm12, %v7042_v6 }
 0x5a0   : > { %7791 = vst.msk [vmem:[%s11855_s14 + $0x198] sm:$0xff] %vm7232_vm12, %v7187_v9 }
 0x5a1   : > { %v7045_v39 = vpop.f32.mrb[208].mxu0 }
 0x5a2   : > { %v7046_v47 = vadd.f32 %v7045_v39, %v12485_v41  ;;  %v7047_v10 = vpop.f32.mrb[209].mxu0  ;;  %v7918_v39 = vld [vmem:[%s9289_s12 + $0x78] sm:$0xff]  }
 0x5a3   : > { %v7048_v19 = vadd.f32 %v7047_v10, %v12488_v48  ;;  %v7049_v20 = vpop.f32.mrb[210].mxu0  ;;  %v7902_v10 = vunpack.c.l.bf16 %v7918_v39 }
 0x5a4   : > { %v7188_v24 = vadd.f32 %v7882_v42, %v7046_v47  ;;  %v7050_v11 = vadd.f32 %v7049_v20, %v12485_v41  ;;  %v7051_v21 = vpop.f32.mrb[211].mxu0 }
 0x5a5   : > { %7824 = vst.msk [vmem:[%s11855_s14 + $0x2a0] sm:$0xff] %vm7232_vm12, %v7048_v19  ;;  %v7052_v2 = vadd.f32 %v7051_v21, %v12488_v48 }
 0x5a6   : > { %7792 = vst.msk [vmem:[%s11855_s14 + $0x1a0] sm:$0xff] %vm7232_vm12, %v7188_v24  ;;  %v7189_v43 = vadd.f32 %v7883_v45, %v7050_v11  ;;  %v7903_v24 = vunpack.c.h.bf16 %v7918_v39 }
 0x5a7   : > { %7825 = vst.msk [vmem:[%s11855_s14 + $0x2a8] sm:$0xff] %vm7232_vm12, %v7052_v2 }
 0x5a8   : > { %7793 = vst.msk [vmem:[%s11855_s14 + $0x1a8] sm:$0xff] %vm7232_vm12, %v7189_v43 }
 0x5a9   : > { %v7055_v44 = vpop.f32.mrb[212].mxu0 }
 0x5aa   : > { %v7056_v57 = vadd.f32 %v7055_v44, %v12485_v41  ;;  %v7057_v18 = vpop.f32.mrb[213].mxu0 }
 0x5ab   : > { %v7058_v22 = vadd.f32 %v7057_v18, %v12488_v48  ;;  %v7059_v61 = vpop.f32.mrb[214].mxu0 }
 0x5ac   : > { %v7190_v33 = vadd.f32 %v7886_v59, %v7056_v57  ;;  %v7060_v62 = vadd.f32 %v7059_v61, %v12485_v41  ;;  %v7061_v7 = vpop.f32.mrb[215].mxu0 }
 0x5ad   : > { %7826 = vst.msk [vmem:[%s11855_s14 + $0x2b0] sm:$0xff] %vm7232_vm12, %v7058_v22  ;;  %v7062_v60 = vadd.f32 %v7061_v7, %v12488_v48 }
 0x5ae   : > { %7794 = vst.msk [vmem:[%s11855_s14 + $0x1b0] sm:$0xff] %vm7232_vm12, %v7190_v33  ;;  %v7191_v17 = vadd.f32 %v7887_v26, %v7060_v62 }
 0x5af   : > { %7827 = vst.msk [vmem:[%s11855_s14 + $0x2b8] sm:$0xff] %vm7232_vm12, %v7062_v60 }
 0x5b0   : > { %7795 = vst.msk [vmem:[%s11855_s14 + $0x1b8] sm:$0xff] %vm7232_vm12, %v7191_v17 }
 0x5b1   : > { %v7065_v25 = vpop.f32.mrb[216].mxu0 }
 0x5b2   : > { %v7066_v13 = vadd.f32 %v7065_v25, %v12485_v41  ;;  %v7067_v28 = vpop.f32.mrb[217].mxu0 }
 0x5b3   : > { %v7068_v31 = vadd.f32 %v7067_v28, %v12488_v48  ;;  %v7069_v27 = vpop.f32.mrb[218].mxu0 }
 0x5b4   : > { %v7192_v36 = vadd.f32 %v7890_v5, %v7066_v13  ;;  %v7070_v15 = vadd.f32 %v7069_v27, %v12485_v41  ;;  %v7071_v35 = vpop.f32.mrb[219].mxu0 }
 0x5b5   : > { %7828 = vst.msk [vmem:[%s11855_s14 + $0x2c0] sm:$0xff] %vm7232_vm12, %v7068_v31  ;;  %v7072_v55 = vadd.f32 %v7071_v35, %v12488_v48 }
 0x5b6   : > { %7796 = vst.msk [vmem:[%s11855_s14 + $0x1c0] sm:$0xff] %vm7232_vm12, %v7192_v36  ;;  %v7193_v14 = vadd.f32 %v7891_v29, %v7070_v15 }
 0x5b7   : > { %7829 = vst.msk [vmem:[%s11855_s14 + $0x2c8] sm:$0xff] %vm7232_vm12, %v7072_v55 }
 0x5b8   : > { %7797 = vst.msk [vmem:[%s11855_s14 + $0x1c8] sm:$0xff] %vm7232_vm12, %v7193_v14 }
 0x5b9   : > { %v7075_v16 = vpop.f32.mrb[220].mxu0 }
 0x5ba   : > { %v7076_v37 = vadd.f32 %v7075_v16, %v12485_v41  ;;  %v7077_v30 = vpop.f32.mrb[221].mxu0 }
 0x5bb   : > { %v7078_v54 = vadd.f32 %v7077_v30, %v12488_v48  ;;  %v7079_v0 = vpop.f32.mrb[222].mxu0 }
 0x5bc   : > { %v7194_v63 = vadd.f32 %v7894_v12, %v7076_v37  ;;  %v7080_v34 = vadd.f32 %v7079_v0, %v12485_v41  ;;  %v7081_v51 = vpop.f32.mrb[223].mxu0 }
 0x5bd   : > { %7830 = vst.msk [vmem:[%s11855_s14 + $0x2d0] sm:$0xff] %vm7232_vm12, %v7078_v54  ;;  %v7082_v52 = vadd.f32 %v7081_v51, %v12488_v48 }
 0x5be   : > { %7798 = vst.msk [vmem:[%s11855_s14 + $0x1d0] sm:$0xff] %vm7232_vm12, %v7194_v63  ;;  %v7195_v40 = vadd.f32 %v7895_v1, %v7080_v34 }
 0x5bf   : > { %7831 = vst.msk [vmem:[%s11855_s14 + $0x2d8] sm:$0xff] %vm7232_vm12, %v7082_v52 }
 0x5c0   : > { %7799 = vst.msk [vmem:[%s11855_s14 + $0x1d8] sm:$0xff] %vm7232_vm12, %v7195_v40 }
 0x5c1   : > { %v7085_v56 = vpop.f32.mrb[224].mxu0 }
 0x5c2   : > { %v7086_v46 = vadd.f32 %v7085_v56, %v12485_v41  ;;  %v7087_v32 = vpop.f32.mrb[225].mxu0 }
 0x5c3   : > { %v7088_v3 = vadd.f32 %v7087_v32, %v12488_v48  ;;  %v7089_v4 = vpop.f32.mrb[226].mxu0 }
 0x5c4   : > { %v7196_v6 = vadd.f32 %v7898_v53, %v7086_v46  ;;  %v7090_v8 = vadd.f32 %v7089_v4, %v12485_v41  ;;  %v7091_v9 = vpop.f32.mrb[227].mxu0 }
 0x5c5   : > { %7832 = vst.msk [vmem:[%s11855_s14 + $0x2e0] sm:$0xff] %vm7232_vm12, %v7088_v3  ;;  %v7092_v42 = vadd.f32 %v7091_v9, %v12488_v48 }
 0x5c6   : > { %7800 = vst.msk [vmem:[%s11855_s14 + $0x1e0] sm:$0xff] %vm7232_vm12, %v7196_v6  ;;  %v7197_v47 = vadd.f32 %v7899_v49, %v7090_v8 }
 0x5c7   : > { %7833 = vst.msk [vmem:[%s11855_s14 + $0x2e8] sm:$0xff] %vm7232_vm12, %v7092_v42 }
 0x5c8   : > { %7801 = vst.msk [vmem:[%s11855_s14 + $0x1e8] sm:$0xff] %vm7232_vm12, %v7197_v47 }
 0x5c9   : > { %v7095_v45 = vpop.f32.mrb[228].mxu0 }
 0x5ca   : > { %v7096_v19 = vadd.f32 %v7095_v45, %v12485_v41  ;;  %v7097_v20 = vpop.f32.mrb[229].mxu0 }
 0x5cb   : > { %v7098_v11 = vadd.f32 %v7097_v20, %v12488_v48  ;;  %v7099_v21 = vpop.f32.mrb[230].mxu0 }
 0x5cc   : > { %v7198_v2 = vadd.f32 %v7902_v10, %v7096_v19  ;;  %v7100_v23 = vadd.f32 %v7099_v21, %v12485_v41  ;;  %v7101_v43 = vpop.f32.mrb[231].mxu0 }
 0x5cd   : > { %7834 = vst.msk [vmem:[%s11855_s14 + $0x2f0] sm:$0xff] %vm7232_vm12, %v7098_v11  ;;  %v7102_v59 = vadd.f32 %v7101_v43, %v12488_v48 }
 0x5ce   : > { %7802 = vst.msk [vmem:[%s11855_s14 + $0x1f0] sm:$0xff] %vm7232_vm12, %v7198_v2  ;;  %v7199_v44 = vadd.f32 %v7903_v24, %v7100_v23 }
 0x5cf   : > { %7835 = vst.msk [vmem:[%s11855_s14 + $0x2f8] sm:$0xff] %vm7232_vm12, %v7102_v59 }
 0x5d0   : > { %7803 = vst.msk [vmem:[%s11855_s14 + $0x1f8] sm:$0xff] %vm7232_vm12, %v7199_v44 }
 0x5d1 PF: > { %s21_s17 = sadd.s32 1, %s9194_s17  }
 0x5d2   : > { %p18_p4 = scmp.ge.s32.totalorder %s21_s17, 4  }
 0x5d4   :  { %20 = sbr.rel (!%p18_p4) target bundleno = 1 (0x1), region = 103 }

</bundles_post_ra>
